<compile_context>
chip_gen: v7x
topology: tpu7x:2x2x1
jax: 0.10.0
libtpu: 0.0.40
codegen_flags: <defaults>
</compile_context>

<pallas_src>
import functools
import math

import numpy as np
import jax
import jax.numpy as jnp
from jax import lax
from jax.experimental import pallas as pl
from jax.experimental.pallas import tpu as pltpu


_FUSED_PARAM_ORDER = ("w_qkv", "b_qkv", "wo", "bo", "ln1g", "ln1b",
                      "w1", "b1", "w2", "b2", "ln2g", "ln2b")
# cell index inside the stacked (n_layers, 4, ...) parameter tensors
_CELL_ORDER = ("sa_txt", "ca_txt", "sa_vis", "ca_vis")
_SA_TXT, _CA_TXT, _SA_VIS, _CA_VIS = range(4)
_NEG_BIG = -1e30


# ------------------------------- in-kernel math ------------------------------

def _layer_norm(x, g, b, eps=1e-5):
    mu = jnp.mean(x, axis=-1, keepdims=True)
    var = jnp.mean((x - mu) ** 2, axis=-1, keepdims=True)
    return (x - mu) * lax.rsqrt(var + eps) * g + b


def _one_cell(x_q, x_kv, *, cell, self_attn, prm, kbias, qmask,
              n_head, d_k, d_v):
    """One Self/Cross attention encoder cell on the L tokens of one image.

    x_q, x_kv : (L, D) f32 (x_q is also the residual stream)
    kbias     : (1, L) additive key mask (0 valid / -1e30 padded)
    qmask     : (L, 1) f32 non-pad mask for query rows
    cell      : static int in [0, 4) selecting this cell's parameter slice
    self_attn : static bool; if True x_kv is x_q and q|k|v share one fused dot
    """
    (w_qkv_r, b_qkv_r, wo_r, bo_r, ln1g_r, ln1b_r,
     w1_r, b1_r, w2_r, b2_r, ln2g_r, ln2b_r) = prm

    Dq = n_head * d_k
    Dk = n_head * d_k

    w_qkv = w_qkv_r[0, cell]                       # (D, Dq+Dk+Dv) f32 master
    b_qkv = b_qkv_r[0, cell]                       # (1,  Dq+Dk+Dv)
    xq_b = x_q.astype(jnp.bfloat16)

    if self_attn:
        # Fused q|k|v projection: one dot, 3x wider MXU N.
        qkv = jnp.dot(xq_b, w_qkv.astype(jnp.bfloat16),
                      preferred_element_type=jnp.float32) + b_qkv
        q = qkv[:, :Dq]
        k = qkv[:, Dq:Dq + Dk]
        v = qkv[:, Dq + Dk:]
    else:
        # Cross attention: q from x_q, fused k|v from x_kv.
        q = jnp.dot(xq_b, w_qkv[:, :Dq].astype(jnp.bfloat16),
                    preferred_element_type=jnp.float32) + b_qkv[:, :Dq]
        kv = jnp.dot(x_kv.astype(jnp.bfloat16),
                     w_qkv[:, Dq:].astype(jnp.bfloat16),
                     preferred_element_type=jnp.float32) + b_qkv[:, Dq:]
        k = kv[:, :Dk]
        v = kv[:, Dk:]

    inv_temp = 1.0 / math.sqrt(d_k)
    heads = []
    for h in range(n_head):                         # n_head is static & small
        qh = q[:, h * d_k:(h + 1) * d_k].astype(jnp.bfloat16)
        kh = k[:, h * d_k:(h + 1) * d_k].astype(jnp.bfloat16)
        vh = v[:, h * d_v:(h + 1) * d_v].astype(jnp.bfloat16)
        # q @ k^T without materializing the transpose.
        s = lax.dot_general(qh, kh, (((1,), (1,)), ((), ())),
                            preferred_element_type=jnp.float32)
        s = s * inv_temp + kbias
        m = jnp.max(s, axis=-1, keepdims=True)
        e = jnp.exp(s - m)
        p = e * pl.reciprocal(jnp.sum(e, axis=-1, keepdims=True), approx=True)
        heads.append(jnp.dot(p.astype(jnp.bfloat16), vh,
                             preferred_element_type=jnp.float32))   # (L, d_v)
    att = heads[0] if n_head == 1 else jnp.concatenate(heads, axis=-1)

    # Single output-projection dot over all heads (K = n_head*d_v).
    o = jnp.dot(att.astype(jnp.bfloat16), wo_r[0, cell].astype(jnp.bfloat16),
                preferred_element_type=jnp.float32) + bo_r[0, cell]
    o = _layer_norm(o + x_q, ln1g_r[0, cell], ln1b_r[0, cell]) * qmask

    # PositionwiseFeedForward (Conv1d k=1 == pointwise linear).
    h1 = jnp.maximum(
        jnp.dot(o.astype(jnp.bfloat16), w1_r[0, cell].astype(jnp.bfloat16),
                preferred_element_type=jnp.float32) + b1_r[0, cell], 0.0)
    f = jnp.dot(h1.astype(jnp.bfloat16), w2_r[0, cell].astype(jnp.bfloat16),
                preferred_element_type=jnp.float32) + b2_r[0, cell]
    f = _layer_norm(f + o, ln2g_r[0, cell], ln2b_r[0, cell]) * qmask
    return f


def _sha_kernel(lens_ref, streams_ref,
                w_qkv, b_qkv, wo, bo, ln1g, ln1b, w1, b1, w2, b2, ln2g, ln2b,
                state_ref, *, L, n_head, d_k, d_v):
    """Grid step (l, b): layer l of the encoder on the L tokens of image b.

    state_ref is the (2, B*L, D) residual-stream carry (resident output block,
    constant index_map): stream 0 = textual, stream 1 = visual.
    """
    l = pl.program_id(0)
    b = pl.program_id(1)
    row0 = pl.multiple_of(b * L, 8)                 # L is a multiple of 8
    rows = pl.ds(row0, L)

    # Layer 0: seed the carried state from the input streams (DMA'd once).
    @pl.when(l == 0)
    def _():
        state_ref[0, rows, :] = streams_ref[0, rows, :]
        state_ref[1, rows, :] = streams_ref[1, rows, :]

    x_t = state_ref[0, rows, :]                     # (L, D) f32
    x_v = state_ref[1, rows, :]

    # Masks from the SMEM-prefetched per-image length (no mask DMAs).
    n_b = lens_ref[b]
    kidx = lax.broadcasted_iota(jnp.int32, (1, L), 1)
    qidx = lax.broadcasted_iota(jnp.int32, (L, 1), 0)
    kbias = jnp.where(kidx < n_b, 0.0, _NEG_BIG)    # (1, L) additive key mask
    qmask = (qidx < n_b).astype(jnp.float32)        # (L, 1) non-pad row mask

    prm = (w_qkv, b_qkv, wo, bo, ln1g, ln1b, w1, b1, w2, b2, ln2g, ln2b)
    run_cell = functools.partial(_one_cell, prm=prm, kbias=kbias, qmask=qmask,
                                 n_head=n_head, d_k=d_k, d_v=d_v)

    # All four cells read the layer-input features (matches the PyTorch layer).
    t_new = (run_cell(x_t, x_t, cell=_SA_TXT, self_attn=True)
             + run_cell(x_t, x_v, cell=_CA_TXT, self_attn=False))
    v_new = (run_cell(x_v, x_v, cell=_SA_VIS, self_attn=True)
             + run_cell(x_v, x_t, cell=_CA_VIS, self_attn=False))

    state_ref[0, rows, :] = t_new
    state_ref[1, rows, :] = v_new


# ------------------------------ pallas_call wrapper ---------------------------

def sha_layers_fused(txt_pad, vis_pad, lens, stacked, *, n_head, d_k, d_v):
    """All SHA encoder layers in one pallas_call.

    txt_pad / vis_pad: (B*L, D) f32 padded token matrices (padded rows zero).
    stacked: dict of (n_layers, 4, r, c) parameter tensors (cells stacked in
             _CELL_ORDER on axis 1, layers on axis 0).
    Returns (textual, visual), each (B*L, D) f32 with padded rows zeroed.
    """
    BL, D = txt_pad.shape
    B = int(lens.shape[0])
    L = BL // B
    n_layers = int(stacked["w_qkv"].shape[0])
    streams = jnp.stack([txt_pad, vis_pad], axis=0)          # (2, B*L, D)
    weights = [stacked[k] for k in _FUSED_PARAM_ORDER]

    resident = lambda l, b, lens_ref: (0, 0, 0)              # DMA once / carried
    per_layer = lambda l, b, lens_ref: (l, 0, 0, 0)          # new weights per layer

    kernel = functools.partial(_sha_kernel, L=L, n_head=n_head, d_k=d_k, d_v=d_v)
    out = pl.pallas_call(
        kernel,
        out_shape=jax.ShapeDtypeStruct((2, BL, D), jnp.float32),
        grid_spec=pltpu.PrefetchScalarGridSpec(
            num_scalar_prefetch=1,                           # lens -> SMEM
            grid=(n_layers, B),                              # layers outer, images inner
            in_specs=[pl.BlockSpec((2, BL, D), resident)]
                     + [pl.BlockSpec((1,) + tuple(w.shape[1:]), per_layer)
                        for w in weights],
            out_specs=pl.BlockSpec((2, BL, D), resident),
        ),
        compiler_params=pltpu.CompilerParams(
            # The state is carried across both grid axes -> no parallel axes.
            dimension_semantics=("arbitrary", "arbitrary"),
            vmem_limit_bytes=48 * 1024 * 1024),
    )(lens, streams, *weights)
    return out[0], out[1]


# ------------------------------- host-side glue -------------------------------

def _pad_gather_indices(num_objs, L):
    """Vectorized replacement for torch split / pad_sequence and the unpad mask."""
    B = len(num_objs)
    total = int(np.sum(num_objs))
    pad_idx = np.full((B * L,), total, dtype=np.int32)   # default -> zero row
    unpad_idx = np.zeros((total,), dtype=np.int32)
    offsets = np.concatenate([[0], np.cumsum(num_objs)]).astype(np.int64)
    for b, n in enumerate(num_objs):
        pad_idx[b * L:b * L + n] = np.arange(offsets[b], offsets[b] + n)
        unpad_idx[offsets[b]:offsets[b] + n] = b * L + np.arange(n)
    return jnp.asarray(pad_idx), jnp.asarray(unpad_idx)


def _pad_tokens(flat, pad_idx):
    flat_ext = jnp.concatenate([flat, jnp.zeros((1, flat.shape[1]), flat.dtype)], 0)
    return flat_ext[pad_idx]                              # single gather, (B*L, D)


def sha_encoder(visual_feats, text_feats, num_objs, stacked, cfg):
    """SHA_Encoder.forward (inference): n_layers hybrid layers, then vis += txt."""
    L = max(8, -(-max(num_objs) // 8) * 8)                # sublane-aligned pad len
    lens = jnp.asarray(np.asarray(num_objs, np.int32))
    pad_idx, unpad_idx = _pad_gather_indices(num_objs, L)

    txt = _pad_tokens(text_feats, pad_idx)                # (B*L, D)
    vis = _pad_tokens(visual_feats, pad_idx)

    txt, vis = sha_layers_fused(txt, vis, lens, stacked,
                                n_head=cfg["n_head"], d_k=cfg["d_k"],
                                d_v=cfg["d_v"])

    textual_output = txt[unpad_idx]                       # single gather
    visual_output = vis[unpad_idx] + textual_output
    return visual_output, textual_output


# --------------------------------- parameters ---------------------------------

def init_cell_params(key, d_model, n_head, d_k, d_v, d_inner):
    ks = jax.random.split(key, 6)

    def lin(k, fi, fo):
        return jax.random.normal(k, (fi, fo), jnp.float32) / np.sqrt(fi)

    z = lambda *s: jnp.zeros(s, jnp.float32)
    o = lambda *s: jnp.ones(s, jnp.float32)
    wq = lin(ks[0], d_model, n_head * d_k)
    wk = lin(ks[1], d_model, n_head * d_k)
    wv = lin(ks[2], d_model, n_head * d_v)
    return dict(
        # f32 masters; fused [wq | wk | wv] so the kernel does 1 (SA) / 2 (CA)
        # wide projection dots instead of 3 narrow ones.
        w_qkv=jnp.concatenate([wq, wk, wv], axis=1),
        b_qkv=z(1, n_head * (2 * d_k + d_v)),
        wo=lin(ks[3], n_head * d_v, d_model), bo=z(1, d_model),
        ln1g=o(1, d_model), ln1b=z(1, d_model),
        w1=lin(ks[4], d_model, d_inner), b1=z(1, d_inner),
        w2=lin(ks[5], d_inner, d_model), b2=z(1, d_model),
        ln2g=o(1, d_model), ln2b=z(1, d_model),
    )


def stack_all_layers(layers_cells):
    """Stack per-layer, per-cell params into (n_layers, 4, ...) tensors."""
    return {k: jnp.stack(
                [jnp.stack([cells[c][k] for c in _CELL_ORDER], axis=0)
                 for cells in layers_cells], axis=0)
            for k in _FUSED_PARAM_ORDER}


# --------------------------- pure-JAX f32 reference ---------------------------

def _ref_layer_norm(x, g, b, eps=1e-5):
    mu = jnp.mean(x, axis=-1, keepdims=True)
    var = jnp.mean((x - mu) ** 2, axis=-1, keepdims=True)
    return (x - mu) / jnp.sqrt(var + eps) * g + b


def _ref_cell(xq, xkv, p, lens, n_head, d_k, d_v):
    B, L, D = xq.shape
    Dq = n_head * d_k
    Dk = n_head * d_k
    q = xq @ p["w_qkv"][:, :Dq] + p["b_qkv"][:, :Dq]
    kv = xkv @ p["w_qkv"][:, Dq:] + p["b_qkv"][:, Dq:]
    k, v = kv[..., :Dk], kv[..., Dk:]
    q = q.reshape(B, L, n_head, d_k)
    k = k.reshape(B, L, n_head, d_k)
    v = v.reshape(B, L, n_head, d_v)
    s = jnp.einsum("bqhd,bkhd->bhqk", q, k) / np.sqrt(d_k)
    key_ok = jnp.arange(L)[None, :] < lens[:, None]            # (B, L)
    s = jnp.where(key_ok[:, None, None, :], s, _NEG_BIG)
    attn = jax.nn.softmax(s, axis=-1)
    o = jnp.einsum("bhqk,bkhd->bqhd", attn, v).reshape(B, L, n_head * d_v)
    o = o @ p["wo"] + p["bo"]
    qm = key_ok.astype(jnp.float32)[..., None]
    o = _ref_layer_norm(o + xq, p["ln1g"], p["ln1b"]) * qm
    h1 = jax.nn.relu(o @ p["w1"] + p["b1"])
    f = h1 @ p["w2"] + p["b2"]
    return _ref_layer_norm(f + o, p["ln2g"], p["ln2b"]) * qm


def _ref_sha_encoder(visual_feats, text_feats, num_objs, layers_cells, cfg):
    B = len(num_objs)
    L = max(8, -(-max(num_objs) // 8) * 8)
    D = visual_feats.shape[1]
    lens = jnp.asarray(np.asarray(num_objs, np.int32))
    pad_idx, unpad_idx = _pad_gather_indices(num_objs, L)
    txt = _pad_tokens(text_feats, pad_idx).reshape(B, L, D)
    vis = _pad_tokens(visual_feats, pad_idx).reshape(B, L, D)
    kw = dict(n_head=cfg["n_head"], d_k=cfg["d_k"], d_v=cfg["d_v"])
    for cells in layers_cells:
        t = (_ref_cell(txt, txt, cells["sa_txt"], lens, **kw)
             + _ref_cell(txt, vis, cells["ca_txt"], lens, **kw))
        v = (_ref_cell(vis, vis, cells["sa_vis"], lens, **kw)
             + _ref_cell(vis, txt, cells["ca_vis"], lens, **kw))
        txt, vis = t, v
    txt_f = txt.reshape(B * L, D)[unpad_idx]
    vis_f = vis.reshape(B * L, D)[unpad_idx]
    return vis_f + txt_f, txt_f


# ------------------------------------ demo ------------------------------------

if __name__ == "__main__":
    # Small config consistent with the module (CONTEXT_HIDDEN_DIM, NUM_HEAD,
    # KEY_DIM, VAL_DIM, INNER_DIM).
    cfg = dict(d_model=32, n_head=2, d_k=16, d_v=16, d_inner=64)
    n_layers = 2
    num_objs = [5, 3]                       # per-image object counts (static list)
    n_total = sum(num_objs)

    key = jax.random.PRNGKey(0)
    k_vis, k_txt, k_params = jax.random.split(key, 3)
    visual_feats = jax.random.normal(k_vis, (n_total, cfg["d_model"]), jnp.float32)
    text_feats = jax.random.normal(k_txt, (n_total, cfg["d_model"]), jnp.float32)

    layer_keys = jax.random.split(k_params, n_layers * 4)
    layers_cells = []
    for li in range(n_layers):
        layers_cells.append(
            {name: init_cell_params(layer_keys[li * 4 + ci], cfg["d_model"],
                                    cfg["n_head"], cfg["d_k"], cfg["d_v"],
                                    cfg["d_inner"])
             for ci, name in enumerate(_CELL_ORDER)})
    stacked = stack_all_layers(layers_cells)

    visual_out, textual_out = sha_encoder(visual_feats, text_feats, num_objs,
                                          stacked, cfg)
    jax.block_until_ready((visual_out, textual_out))

    assert visual_out.shape == (n_total, cfg["d_model"])
    assert textual_out.shape == (n_total, cfg["d_model"])
    assert bool(jnp.all(jnp.isfinite(visual_out)))
    assert bool(jnp.all(jnp.isfinite(textual_out)))

    # Tolerance check vs a pure-JAX f32 reference with the same padding/mask
    # semantics as the PyTorch module (kernel uses bf16 MXU operands and an
    # approximate softmax reciprocal, so allow a loose bound).
    vis_ref, txt_ref = _ref_sha_encoder(visual_feats, text_feats, num_objs,
                                        layers_cells, cfg)
    max_diff = max(float(jnp.max(jnp.abs(visual_out - vis_ref))),
                   float(jnp.max(jnp.abs(textual_out - txt_ref))))
    assert max_diff < 0.25, f"kernel/reference mismatch: {max_diff}"

    print("KERNEL_OK")
</pallas_src>

<mosaic_0001>
module attributes {stable_mosaic.version = 11 : i64} {
  func.func @_sha_kernel(%arg0: i32, %arg1: i32, %arg2: memref<2xi32, #tpu.memory_space<smem>>, %arg3: memref<2x16x32xf32, #tpu.memory_space<vmem>>, %arg4: memref<1x4x32x96xf32, #tpu.memory_space<vmem>>, %arg5: memref<1x4x1x96xf32, #tpu.memory_space<vmem>>, %arg6: memref<1x4x32x32xf32, #tpu.memory_space<vmem>>, %arg7: memref<1x4x1x32xf32, #tpu.memory_space<vmem>>, %arg8: memref<1x4x1x32xf32, #tpu.memory_space<vmem>>, %arg9: memref<1x4x1x32xf32, #tpu.memory_space<vmem>>, %arg10: memref<1x4x32x64xf32, #tpu.memory_space<vmem>>, %arg11: memref<1x4x1x64xf32, #tpu.memory_space<vmem>>, %arg12: memref<1x4x64x32xf32, #tpu.memory_space<vmem>>, %arg13: memref<1x4x1x32xf32, #tpu.memory_space<vmem>>, %arg14: memref<1x4x1x32xf32, #tpu.memory_space<vmem>>, %arg15: memref<1x4x1x32xf32, #tpu.memory_space<vmem>>, %arg16: memref<2x16x32xf32, #tpu.memory_space<vmem>>) attributes {dimension_semantics = [#tpu.dimension_semantics<arbitrary>, #tpu.dimension_semantics<arbitrary>], iteration_bounds = array<i64: 2, 2>, scalar_prefetch = 1 : i64, scratch_operands = 0 : i64, tpu.core_type = #tpu.core_type<tc>, window_params = [{pipeline_mode = #tpu.pipeline_mode<synchronous>, transform_indices = @transform_0, window_bounds = array<i64: 2, 16, 32>}, {transform_indices = @transform_1, window_bounds = array<i64: 1, 4, 32, 96>}, {transform_indices = @transform_2, window_bounds = array<i64: 1, 4, 1, 96>}, {transform_indices = @transform_3, window_bounds = array<i64: 1, 4, 32, 32>}, {transform_indices = @transform_4, window_bounds = array<i64: 1, 4, 1, 32>}, {transform_indices = @transform_5, window_bounds = array<i64: 1, 4, 1, 32>}, {transform_indices = @transform_6, window_bounds = array<i64: 1, 4, 1, 32>}, {transform_indices = @transform_7, window_bounds = array<i64: 1, 4, 32, 64>}, {transform_indices = @transform_8, window_bounds = array<i64: 1, 4, 1, 64>}, {transform_indices = @transform_9, window_bounds = array<i64: 1, 4, 64, 32>}, {transform_indices = @transform_10, window_bounds = array<i64: 1, 4, 1, 32>}, {transform_indices = @transform_11, window_bounds = array<i64: 1, 4, 1, 32>}, {transform_indices = @transform_12, window_bounds = array<i64: 1, 4, 1, 32>}, {pipeline_mode = #tpu.pipeline_mode<synchronous>, transform_indices = @transform_13, window_bounds = array<i64: 2, 16, 32>}]} {
    %c8_i32 = arith.constant 8 : i32
    %0 = arith.muli %arg1, %c8_i32 : i32
    %1 = tpu.assume_multiple %0, 8 : i32
    %c0_i32 = arith.constant 0 : i32
    %2 = arith.cmpi eq, %arg0, %c0_i32 : i32
    %3 = arith.extui %2 : i1 to i32
    %c0_i32_0 = arith.constant 0 : i32
    %4 = arith.cmpi ne, %3, %c0_i32_0 : i32
    scf.if %4 {
      %c0_300 = arith.constant 0 : index
      %634 = arith.index_cast %1 : i32 to index
      %c0_301 = arith.constant 0 : index
      %635 = vector.load %arg3[%c0_300, %634, %c0_301] : memref<2x16x32xf32, #tpu.memory_space<vmem>>, vector<1x8x32xf32>
      %636 = vector.shape_cast %635 : vector<1x8x32xf32> to vector<8x32xf32>
      %c0_302 = arith.constant 0 : index
      %637 = arith.index_cast %1 : i32 to index
      %c0_303 = arith.constant 0 : index
      %638 = vector.load %arg16[%c0_302, %637, %c0_303] : memref<2x16x32xf32, #tpu.memory_space<vmem>>, vector<1x8x32xf32>
      %639 = vector.shape_cast %638 : vector<1x8x32xf32> to vector<8x32xf32>
      %640 = vector.shape_cast %636 : vector<8x32xf32> to vector<1x8x32xf32>
      tpu.vector_store %arg16[%c0_302, %637, %c0_303], %640 {strides = array<i32>} : memref<2x16x32xf32, #tpu.memory_space<vmem>>, vector<1x8x32xf32>,
      %c1_304 = arith.constant 1 : index
      %641 = arith.index_cast %1 : i32 to index
      %c0_305 = arith.constant 0 : index
      %642 = vector.load %arg3[%c1_304, %641, %c0_305] : memref<2x16x32xf32, #tpu.memory_space<vmem>>, vector<1x8x32xf32>
      %643 = vector.shape_cast %642 : vector<1x8x32xf32> to vector<8x32xf32>
      %c1_306 = arith.constant 1 : index
      %644 = arith.index_cast %1 : i32 to index
      %c0_307 = arith.constant 0 : index
      %645 = vector.load %arg16[%c1_306, %644, %c0_307] : memref<2x16x32xf32, #tpu.memory_space<vmem>>, vector<1x8x32xf32>
      %646 = vector.shape_cast %645 : vector<1x8x32xf32> to vector<8x32xf32>
      %647 = vector.shape_cast %643 : vector<8x32xf32> to vector<1x8x32xf32>
      tpu.vector_store %arg16[%c1_306, %644, %c0_307], %647 {strides = array<i32>} : memref<2x16x32xf32, #tpu.memory_space<vmem>>, vector<1x8x32xf32>,
    } else {
    }
    %c0 = arith.constant 0 : index
    %5 = arith.index_cast %1 : i32 to index
    %c0_1 = arith.constant 0 : index
    %6 = vector.load %arg16[%c0, %5, %c0_1] : memref<2x16x32xf32, #tpu.memory_space<vmem>>, vector<1x8x32xf32>
    %7 = vector.shape_cast %6 : vector<1x8x32xf32> to vector<8x32xf32>
    %c1 = arith.constant 1 : index
    %8 = arith.index_cast %1 : i32 to index
    %c0_2 = arith.constant 0 : index
    %9 = vector.load %arg16[%c1, %8, %c0_2] : memref<2x16x32xf32, #tpu.memory_space<vmem>>, vector<1x8x32xf32>
    %10 = vector.shape_cast %9 : vector<1x8x32xf32> to vector<8x32xf32>
    %11 = arith.index_cast %arg1 : i32 to index
    %12 = memref.load %arg2[%11] : memref<2xi32, #tpu.memory_space<smem>>
    %13 = tpu.iota {dimensions = array<i32: 1>} : vector<1x8xi32>
    %14 = tpu.iota {dimensions = array<i32: 0>} : vector<8x1xi32>
    %15 = vector.broadcast %12 : i32 to vector<1x8xi32>
    %16 = arith.cmpi slt, %13, %15 : vector<1x8xi32>
    %cst = arith.constant 0.000000e+00 : f32
    %cst_3 = arith.constant -1.000000e+30 : f32
    %17 = vector.broadcast %cst : f32 to vector<1x8xf32>
    %18 = vector.broadcast %cst_3 : f32 to vector<1x8xf32>
    %19 = arith.select %16, %17, %18 : vector<1x8xi1>, vector<1x8xf32>
    %20 = vector.broadcast %12 : i32 to vector<8x1xi32>
    %21 = arith.cmpi slt, %14, %20 : vector<8x1xi32>
    %22 = arith.extui %21 : vector<8x1xi1> to vector<8x1xi32>
    %23 = arith.sitofp %22 : vector<8x1xi32> to vector<8x1xf32>
    %c0_4 = arith.constant 0 : index
    %c0_5 = arith.constant 0 : index
    %c0_6 = arith.constant 0 : index
    %c0_7 = arith.constant 0 : index
    %24 = vector.load %arg4[%c0_4, %c0_5, %c0_6, %c0_7] : memref<1x4x32x96xf32, #tpu.memory_space<vmem>>, vector<1x1x32x96xf32>
    %25 = vector.shape_cast %24 : vector<1x1x32x96xf32> to vector<32x96xf32>
    %c0_8 = arith.constant 0 : index
    %c0_9 = arith.constant 0 : index
    %c0_10 = arith.constant 0 : index
    %c0_11 = arith.constant 0 : index
    %26 = vector.load %arg5[%c0_8, %c0_9, %c0_10, %c0_11] : memref<1x4x1x96xf32, #tpu.memory_space<vmem>>, vector<1x1x1x96xf32>
    %27 = vector.shape_cast %26 : vector<1x1x1x96xf32> to vector<1x96xf32>
    %28 = arith.truncf %7 : vector<8x32xf32> to vector<8x32xbf16>
    %29 = arith.truncf %25 : vector<32x96xf32> to vector<32x96xbf16>
    %cst_12 = arith.constant dense<0.000000e+00> : vector<8x96xf32>
    %30 = tpu.matmul %28, %29, %cst_12 {dimension_numbers = #tpu.dot_dimension_numbers<[1], [0], [0], [1], [0, 0, 1, 1], [], []>} : vector<8x32xbf16>, vector<32x96xbf16>, vector<8x96xf32> -> vector<8x96xf32>
    %31 = vector.broadcast %27 : vector<1x96xf32> to vector<8x96xf32>
    %32 = arith.addf %30, %31 : vector<8x96xf32>
    %33 = vector.extract_strided_slice %32 {offsets = [0, 0], sizes = [8, 32], strides = [1, 1]} : vector<8x96xf32> to vector<8x32xf32>
    %34 = vector.extract_strided_slice %32 {offsets = [0, 32], sizes = [8, 32], strides = [1, 1]} : vector<8x96xf32> to vector<8x32xf32>
    %35 = vector.extract_strided_slice %32 {offsets = [0, 64], sizes = [8, 32], strides = [1, 1]} : vector<8x96xf32> to vector<8x32xf32>
    %36 = vector.extract_strided_slice %33 {offsets = [0, 0], sizes = [8, 16], strides = [1, 1]} : vector<8x32xf32> to vector<8x16xf32>
    %37 = arith.truncf %36 : vector<8x16xf32> to vector<8x16xbf16>
    %38 = vector.extract_strided_slice %34 {offsets = [0, 0], sizes = [8, 16], strides = [1, 1]} : vector<8x32xf32> to vector<8x16xf32>
    %39 = arith.truncf %38 : vector<8x16xf32> to vector<8x16xbf16>
    %40 = vector.extract_strided_slice %35 {offsets = [0, 0], sizes = [8, 16], strides = [1, 1]} : vector<8x32xf32> to vector<8x16xf32>
    %41 = arith.truncf %40 : vector<8x16xf32> to vector<8x16xbf16>
    %cst_13 = arith.constant dense<0.000000e+00> : vector<8x8xf32>
    %42 = tpu.matmul %37, %39, %cst_13 {dimension_numbers = #tpu.dot_dimension_numbers<[1], [1], [0], [0], [0, 0, 1, 0], [], []>} : vector<8x16xbf16>, vector<8x16xbf16>, vector<8x8xf32> -> vector<8x8xf32>
    %cst_14 = arith.constant 2.500000e-01 : f32
    %43 = vector.broadcast %cst_14 : f32 to vector<8x8xf32>
    %44 = arith.mulf %42, %43 : vector<8x8xf32>
    %45 = vector.broadcast %19 : vector<1x8xf32> to vector<8x8xf32>
    %46 = arith.addf %44, %45 : vector<8x8xf32>
    %cst_15 = arith.constant dense<0xFF800000> : vector<8xf32>
    %47 = vector.multi_reduction <maximumf>, %46, %cst_15 [1] : vector<8x8xf32> to vector<8xf32>
    %48 = vector.shape_cast %47 : vector<8xf32> to vector<8x1xf32>
    %49 = vector.broadcast %48 : vector<8x1xf32> to vector<8x8xf32>
    %50 = arith.subf %46, %49 : vector<8x8xf32>
    %51 = math.exp %50 : vector<8x8xf32>
    %cst_16 = arith.constant dense<0.000000e+00> : vector<8xf32>
    %52 = vector.multi_reduction <add>, %51, %cst_16 [1] : vector<8x8xf32> to vector<8xf32>
    %53 = vector.shape_cast %52 : vector<8xf32> to vector<8x1xf32>
    %54 = tpu.reciprocal %53 {approx = true} : vector<8x1xf32> -> vector<8x1xf32>
    %55 = vector.broadcast %54 : vector<8x1xf32> to vector<8x8xf32>
    %56 = arith.mulf %51, %55 : vector<8x8xf32>
    %57 = arith.truncf %56 : vector<8x8xf32> to vector<8x8xbf16>
    %cst_17 = arith.constant dense<0.000000e+00> : vector<8x16xf32>
    %58 = tpu.matmul %57, %41, %cst_17 {dimension_numbers = #tpu.dot_dimension_numbers<[1], [0], [0], [1], [0, 0, 1, 1], [], []>} : vector<8x8xbf16>, vector<8x16xbf16>, vector<8x16xf32> -> vector<8x16xf32>
    %59 = vector.extract_strided_slice %33 {offsets = [0, 16], sizes = [8, 16], strides = [1, 1]} : vector<8x32xf32> to vector<8x16xf32>
    %60 = arith.truncf %59 : vector<8x16xf32> to vector<8x16xbf16>
    %61 = vector.extract_strided_slice %34 {offsets = [0, 16], sizes = [8, 16], strides = [1, 1]} : vector<8x32xf32> to vector<8x16xf32>
    %62 = arith.truncf %61 : vector<8x16xf32> to vector<8x16xbf16>
    %63 = vector.extract_strided_slice %35 {offsets = [0, 16], sizes = [8, 16], strides = [1, 1]} : vector<8x32xf32> to vector<8x16xf32>
    %64 = arith.truncf %63 : vector<8x16xf32> to vector<8x16xbf16>
    %cst_18 = arith.constant dense<0.000000e+00> : vector<8x8xf32>
    %65 = tpu.matmul %60, %62, %cst_18 {dimension_numbers = #tpu.dot_dimension_numbers<[1], [1], [0], [0], [0, 0, 1, 0], [], []>} : vector<8x16xbf16>, vector<8x16xbf16>, vector<8x8xf32> -> vector<8x8xf32>
    %cst_19 = arith.constant 2.500000e-01 : f32
    %66 = vector.broadcast %cst_19 : f32 to vector<8x8xf32>
    %67 = arith.mulf %65, %66 : vector<8x8xf32>
    %68 = vector.broadcast %19 : vector<1x8xf32> to vector<8x8xf32>
    %69 = arith.addf %67, %68 : vector<8x8xf32>
    %cst_20 = arith.constant dense<0xFF800000> : vector<8xf32>
    %70 = vector.multi_reduction <maximumf>, %69, %cst_20 [1] : vector<8x8xf32> to vector<8xf32>
    %71 = vector.shape_cast %70 : vector<8xf32> to vector<8x1xf32>
    %72 = vector.broadcast %71 : vector<8x1xf32> to vector<8x8xf32>
    %73 = arith.subf %69, %72 : vector<8x8xf32>
    %74 = math.exp %73 : vector<8x8xf32>
    %cst_21 = arith.constant dense<0.000000e+00> : vector<8xf32>
    %75 = vector.multi_reduction <add>, %74, %cst_21 [1] : vector<8x8xf32> to vector<8xf32>
    %76 = vector.shape_cast %75 : vector<8xf32> to vector<8x1xf32>
    %77 = tpu.reciprocal %76 {approx = true} : vector<8x1xf32> -> vector<8x1xf32>
    %78 = vector.broadcast %77 : vector<8x1xf32> to vector<8x8xf32>
    %79 = arith.mulf %74, %78 : vector<8x8xf32>
    %80 = arith.truncf %79 : vector<8x8xf32> to vector<8x8xbf16>
    %cst_22 = arith.constant dense<0.000000e+00> : vector<8x16xf32>
    %81 = tpu.matmul %80, %64, %cst_22 {dimension_numbers = #tpu.dot_dimension_numbers<[1], [0], [0], [1], [0, 0, 1, 1], [], []>} : vector<8x8xbf16>, vector<8x16xbf16>, vector<8x16xf32> -> vector<8x16xf32>
    %82 = tpu.concatenate %58, %81 in 1 : vector<8x16xf32>, vector<8x16xf32> -> vector<8x32xf32>
    %83 = arith.truncf %82 : vector<8x32xf32> to vector<8x32xbf16>
    %c0_23 = arith.constant 0 : index
    %c0_24 = arith.constant 0 : index
    %c0_25 = arith.constant 0 : index
    %c0_26 = arith.constant 0 : index
    %84 = vector.load %arg6[%c0_23, %c0_24, %c0_25, %c0_26] : memref<1x4x32x32xf32, #tpu.memory_space<vmem>>, vector<1x1x32x32xf32>
    %85 = vector.shape_cast %84 : vector<1x1x32x32xf32> to vector<32x32xf32>
    %86 = arith.truncf %85 : vector<32x32xf32> to vector<32x32xbf16>
    %cst_27 = arith.constant dense<0.000000e+00> : vector<8x32xf32>
    %87 = tpu.matmul %83, %86, %cst_27 {dimension_numbers = #tpu.dot_dimension_numbers<[1], [0], [0], [1], [0, 0, 1, 1], [], []>} : vector<8x32xbf16>, vector<32x32xbf16>, vector<8x32xf32> -> vector<8x32xf32>
    %c0_28 = arith.constant 0 : index
    %c0_29 = arith.constant 0 : index
    %c0_30 = arith.constant 0 : index
    %c0_31 = arith.constant 0 : index
    %88 = vector.load %arg7[%c0_28, %c0_29, %c0_30, %c0_31] : memref<1x4x1x32xf32, #tpu.memory_space<vmem>>, vector<1x1x1x32xf32>
    %89 = vector.shape_cast %88 : vector<1x1x1x32xf32> to vector<1x32xf32>
    %90 = vector.broadcast %89 : vector<1x32xf32> to vector<8x32xf32>
    %91 = arith.addf %87, %90 : vector<8x32xf32>
    %92 = arith.addf %91, %7 : vector<8x32xf32>
    %c0_32 = arith.constant 0 : index
    %c0_33 = arith.constant 0 : index
    %c0_34 = arith.constant 0 : index
    %c0_35 = arith.constant 0 : index
    %93 = vector.load %arg8[%c0_32, %c0_33, %c0_34, %c0_35] : memref<1x4x1x32xf32, #tpu.memory_space<vmem>>, vector<1x1x1x32xf32>
    %94 = vector.shape_cast %93 : vector<1x1x1x32xf32> to vector<1x32xf32>
    %c0_36 = arith.constant 0 : index
    %c0_37 = arith.constant 0 : index
    %c0_38 = arith.constant 0 : index
    %c0_39 = arith.constant 0 : index
    %95 = vector.load %arg9[%c0_36, %c0_37, %c0_38, %c0_39] : memref<1x4x1x32xf32, #tpu.memory_space<vmem>>, vector<1x1x1x32xf32>
    %96 = vector.shape_cast %95 : vector<1x1x1x32xf32> to vector<1x32xf32>
    %cst_40 = arith.constant dense<0.000000e+00> : vector<8xf32>
    %97 = vector.multi_reduction <add>, %92, %cst_40 [1] : vector<8x32xf32> to vector<8xf32>
    %98 = vector.shape_cast %97 : vector<8xf32> to vector<8x1xf32>
    %cst_41 = arith.constant 3.200000e+01 : f32
    %99 = vector.broadcast %cst_41 : f32 to vector<8x1xf32>
    %100 = arith.divf %98, %99 : vector<8x1xf32>
    %101 = vector.broadcast %100 : vector<8x1xf32> to vector<8x32xf32>
    %102 = arith.subf %92, %101 : vector<8x32xf32>
    %103 = arith.mulf %102, %102 : vector<8x32xf32>
    %cst_42 = arith.constant dense<0.000000e+00> : vector<8xf32>
    %104 = vector.multi_reduction <add>, %103, %cst_42 [1] : vector<8x32xf32> to vector<8xf32>
    %105 = vector.shape_cast %104 : vector<8xf32> to vector<8x1xf32>
    %cst_43 = arith.constant 3.200000e+01 : f32
    %106 = vector.broadcast %cst_43 : f32 to vector<8x1xf32>
    %107 = arith.divf %105, %106 : vector<8x1xf32>
    %108 = vector.broadcast %100 : vector<8x1xf32> to vector<8x32xf32>
    %109 = arith.subf %92, %108 : vector<8x32xf32>
    %cst_44 = arith.constant 9.99999974E-6 : f32
    %110 = vector.broadcast %cst_44 : f32 to vector<8x1xf32>
    %111 = arith.addf %107, %110 : vector<8x1xf32>
    %112 = math.rsqrt %111 : vector<8x1xf32>
    %113 = vector.broadcast %112 : vector<8x1xf32> to vector<8x32xf32>
    %114 = arith.mulf %109, %113 : vector<8x32xf32>
    %115 = vector.broadcast %94 : vector<1x32xf32> to vector<8x32xf32>
    %116 = arith.mulf %114, %115 : vector<8x32xf32>
    %117 = vector.broadcast %96 : vector<1x32xf32> to vector<8x32xf32>
    %118 = arith.addf %116, %117 : vector<8x32xf32>
    %119 = vector.broadcast %23 : vector<8x1xf32> to vector<8x32xf32>
    %120 = arith.mulf %118, %119 : vector<8x32xf32>
    %121 = arith.truncf %120 : vector<8x32xf32> to vector<8x32xbf16>
    %c0_45 = arith.constant 0 : index
    %c0_46 = arith.constant 0 : index
    %c0_47 = arith.constant 0 : index
    %c0_48 = arith.constant 0 : index
    %122 = vector.load %arg10[%c0_45, %c0_46, %c0_47, %c0_48] : memref<1x4x32x64xf32, #tpu.memory_space<vmem>>, vector<1x1x32x64xf32>
    %123 = vector.shape_cast %122 : vector<1x1x32x64xf32> to vector<32x64xf32>
    %124 = arith.truncf %123 : vector<32x64xf32> to vector<32x64xbf16>
    %cst_49 = arith.constant dense<0.000000e+00> : vector<8x64xf32>
    %125 = tpu.matmul %121, %124, %cst_49 {dimension_numbers = #tpu.dot_dimension_numbers<[1], [0], [0], [1], [0, 0, 1, 1], [], []>} : vector<8x32xbf16>, vector<32x64xbf16>, vector<8x64xf32> -> vector<8x64xf32>
    %c0_50 = arith.constant 0 : index
    %c0_51 = arith.constant 0 : index
    %c0_52 = arith.constant 0 : index
    %c0_53 = arith.constant 0 : index
    %126 = vector.load %arg11[%c0_50, %c0_51, %c0_52, %c0_53] : memref<1x4x1x64xf32, #tpu.memory_space<vmem>>, vector<1x1x1x64xf32>
    %127 = vector.shape_cast %126 : vector<1x1x1x64xf32> to vector<1x64xf32>
    %128 = vector.broadcast %127 : vector<1x64xf32> to vector<8x64xf32>
    %129 = arith.addf %125, %128 : vector<8x64xf32>
    %cst_54 = arith.constant 0.000000e+00 : f32
    %130 = vector.broadcast %cst_54 : f32 to vector<8x64xf32>
    %131 = arith.maximumf %129, %130 : vector<8x64xf32>
    %132 = arith.truncf %131 : vector<8x64xf32> to vector<8x64xbf16>
    %c0_55 = arith.constant 0 : index
    %c0_56 = arith.constant 0 : index
    %c0_57 = arith.constant 0 : index
    %c0_58 = arith.constant 0 : index
    %133 = vector.load %arg12[%c0_55, %c0_56, %c0_57, %c0_58] : memref<1x4x64x32xf32, #tpu.memory_space<vmem>>, vector<1x1x64x32xf32>
    %134 = vector.shape_cast %133 : vector<1x1x64x32xf32> to vector<64x32xf32>
    %135 = arith.truncf %134 : vector<64x32xf32> to vector<64x32xbf16>
    %cst_59 = arith.constant dense<0.000000e+00> : vector<8x32xf32>
    %136 = tpu.matmul %132, %135, %cst_59 {dimension_numbers = #tpu.dot_dimension_numbers<[1], [0], [0], [1], [0, 0, 1, 1], [], []>} : vector<8x64xbf16>, vector<64x32xbf16>, vector<8x32xf32> -> vector<8x32xf32>
    %c0_60 = arith.constant 0 : index
    %c0_61 = arith.constant 0 : index
    %c0_62 = arith.constant 0 : index
    %c0_63 = arith.constant 0 : index
    %137 = vector.load %arg13[%c0_60, %c0_61, %c0_62, %c0_63] : memref<1x4x1x32xf32, #tpu.memory_space<vmem>>, vector<1x1x1x32xf32>
    %138 = vector.shape_cast %137 : vector<1x1x1x32xf32> to vector<1x32xf32>
    %139 = vector.broadcast %138 : vector<1x32xf32> to vector<8x32xf32>
    %140 = arith.addf %136, %139 : vector<8x32xf32>
    %141 = arith.addf %140, %120 : vector<8x32xf32>
    %c0_64 = arith.constant 0 : index
    %c0_65 = arith.constant 0 : index
    %c0_66 = arith.constant 0 : index
    %c0_67 = arith.constant 0 : index
    %142 = vector.load %arg14[%c0_64, %c0_65, %c0_66, %c0_67] : memref<1x4x1x32xf32, #tpu.memory_space<vmem>>, vector<1x1x1x32xf32>
    %143 = vector.shape_cast %142 : vector<1x1x1x32xf32> to vector<1x32xf32>
    %c0_68 = arith.constant 0 : index
    %c0_69 = arith.constant 0 : index
    %c0_70 = arith.constant 0 : index
    %c0_71 = arith.constant 0 : index
    %144 = vector.load %arg15[%c0_68, %c0_69, %c0_70, %c0_71] : memref<1x4x1x32xf32, #tpu.memory_space<vmem>>, vector<1x1x1x32xf32>
    %145 = vector.shape_cast %144 : vector<1x1x1x32xf32> to vector<1x32xf32>
    %cst_72 = arith.constant dense<0.000000e+00> : vector<8xf32>
    %146 = vector.multi_reduction <add>, %141, %cst_72 [1] : vector<8x32xf32> to vector<8xf32>
    %147 = vector.shape_cast %146 : vector<8xf32> to vector<8x1xf32>
    %cst_73 = arith.constant 3.200000e+01 : f32
    %148 = vector.broadcast %cst_73 : f32 to vector<8x1xf32>
    %149 = arith.divf %147, %148 : vector<8x1xf32>
    %150 = vector.broadcast %149 : vector<8x1xf32> to vector<8x32xf32>
    %151 = arith.subf %141, %150 : vector<8x32xf32>
    %152 = arith.mulf %151, %151 : vector<8x32xf32>
    %cst_74 = arith.constant dense<0.000000e+00> : vector<8xf32>
    %153 = vector.multi_reduction <add>, %152, %cst_74 [1] : vector<8x32xf32> to vector<8xf32>
    %154 = vector.shape_cast %153 : vector<8xf32> to vector<8x1xf32>
    %cst_75 = arith.constant 3.200000e+01 : f32
    %155 = vector.broadcast %cst_75 : f32 to vector<8x1xf32>
    %156 = arith.divf %154, %155 : vector<8x1xf32>
    %157 = vector.broadcast %149 : vector<8x1xf32> to vector<8x32xf32>
    %158 = arith.subf %141, %157 : vector<8x32xf32>
    %cst_76 = arith.constant 9.99999974E-6 : f32
    %159 = vector.broadcast %cst_76 : f32 to vector<8x1xf32>
    %160 = arith.addf %156, %159 : vector<8x1xf32>
    %161 = math.rsqrt %160 : vector<8x1xf32>
    %162 = vector.broadcast %161 : vector<8x1xf32> to vector<8x32xf32>
    %163 = arith.mulf %158, %162 : vector<8x32xf32>
    %164 = vector.broadcast %143 : vector<1x32xf32> to vector<8x32xf32>
    %165 = arith.mulf %163, %164 : vector<8x32xf32>
    %166 = vector.broadcast %145 : vector<1x32xf32> to vector<8x32xf32>
    %167 = arith.addf %165, %166 : vector<8x32xf32>
    %168 = vector.broadcast %23 : vector<8x1xf32> to vector<8x32xf32>
    %169 = arith.mulf %167, %168 : vector<8x32xf32>
    %c0_77 = arith.constant 0 : index
    %c1_78 = arith.constant 1 : index
    %c0_79 = arith.constant 0 : index
    %c0_80 = arith.constant 0 : index
    %170 = vector.load %arg4[%c0_77, %c1_78, %c0_79, %c0_80] : memref<1x4x32x96xf32, #tpu.memory_space<vmem>>, vector<1x1x32x96xf32>
    %171 = vector.shape_cast %170 : vector<1x1x32x96xf32> to vector<32x96xf32>
    %c0_81 = arith.constant 0 : index
    %c1_82 = arith.constant 1 : index
    %c0_83 = arith.constant 0 : index
    %c0_84 = arith.constant 0 : index
    %172 = vector.load %arg5[%c0_81, %c1_82, %c0_83, %c0_84] : memref<1x4x1x96xf32, #tpu.memory_space<vmem>>, vector<1x1x1x96xf32>
    %173 = vector.shape_cast %172 : vector<1x1x1x96xf32> to vector<1x96xf32>
    %174 = arith.truncf %7 : vector<8x32xf32> to vector<8x32xbf16>
    %175 = vector.extract_strided_slice %171 {offsets = [0, 0], sizes = [32, 32], strides = [1, 1]} : vector<32x96xf32> to vector<32x32xf32>
    %176 = arith.truncf %175 : vector<32x32xf32> to vector<32x32xbf16>
    %cst_85 = arith.constant dense<0.000000e+00> : vector<8x32xf32>
    %177 = tpu.matmul %174, %176, %cst_85 {dimension_numbers = #tpu.dot_dimension_numbers<[1], [0], [0], [1], [0, 0, 1, 1], [], []>} : vector<8x32xbf16>, vector<32x32xbf16>, vector<8x32xf32> -> vector<8x32xf32>
    %178 = vector.extract_strided_slice %173 {offsets = [0, 0], sizes = [1, 32], strides = [1, 1]} : vector<1x96xf32> to vector<1x32xf32>
    %179 = vector.broadcast %178 : vector<1x32xf32> to vector<8x32xf32>
    %180 = arith.addf %177, %179 : vector<8x32xf32>
    %181 = arith.truncf %10 : vector<8x32xf32> to vector<8x32xbf16>
    %182 = vector.extract_strided_slice %171 {offsets = [0, 32], sizes = [32, 64], strides = [1, 1]} : vector<32x96xf32> to vector<32x64xf32>
    %183 = arith.truncf %182 : vector<32x64xf32> to vector<32x64xbf16>
    %cst_86 = arith.constant dense<0.000000e+00> : vector<8x64xf32>
    %184 = tpu.matmul %181, %183, %cst_86 {dimension_numbers = #tpu.dot_dimension_numbers<[1], [0], [0], [1], [0, 0, 1, 1], [], []>} : vector<8x32xbf16>, vector<32x64xbf16>, vector<8x64xf32> -> vector<8x64xf32>
    %185 = vector.extract_strided_slice %173 {offsets = [0, 32], sizes = [1, 64], strides = [1, 1]} : vector<1x96xf32> to vector<1x64xf32>
    %186 = vector.broadcast %185 : vector<1x64xf32> to vector<8x64xf32>
    %187 = arith.addf %184, %186 : vector<8x64xf32>
    %188 = vector.extract_strided_slice %187 {offsets = [0, 0], sizes = [8, 32], strides = [1, 1]} : vector<8x64xf32> to vector<8x32xf32>
    %189 = vector.extract_strided_slice %187 {offsets = [0, 32], sizes = [8, 32], strides = [1, 1]} : vector<8x64xf32> to vector<8x32xf32>
    %190 = vector.extract_strided_slice %180 {offsets = [0, 0], sizes = [8, 16], strides = [1, 1]} : vector<8x32xf32> to vector<8x16xf32>
    %191 = arith.truncf %190 : vector<8x16xf32> to vector<8x16xbf16>
    %192 = vector.extract_strided_slice %188 {offsets = [0, 0], sizes = [8, 16], strides = [1, 1]} : vector<8x32xf32> to vector<8x16xf32>
    %193 = arith.truncf %192 : vector<8x16xf32> to vector<8x16xbf16>
    %194 = vector.extract_strided_slice %189 {offsets = [0, 0], sizes = [8, 16], strides = [1, 1]} : vector<8x32xf32> to vector<8x16xf32>
    %195 = arith.truncf %194 : vector<8x16xf32> to vector<8x16xbf16>
    %cst_87 = arith.constant dense<0.000000e+00> : vector<8x8xf32>
    %196 = tpu.matmul %191, %193, %cst_87 {dimension_numbers = #tpu.dot_dimension_numbers<[1], [1], [0], [0], [0, 0, 1, 0], [], []>} : vector<8x16xbf16>, vector<8x16xbf16>, vector<8x8xf32> -> vector<8x8xf32>
    %cst_88 = arith.constant 2.500000e-01 : f32
    %197 = vector.broadcast %cst_88 : f32 to vector<8x8xf32>
    %198 = arith.mulf %196, %197 : vector<8x8xf32>
    %199 = vector.broadcast %19 : vector<1x8xf32> to vector<8x8xf32>
    %200 = arith.addf %198, %199 : vector<8x8xf32>
    %cst_89 = arith.constant dense<0xFF800000> : vector<8xf32>
    %201 = vector.multi_reduction <maximumf>, %200, %cst_89 [1] : vector<8x8xf32> to vector<8xf32>
    %202 = vector.shape_cast %201 : vector<8xf32> to vector<8x1xf32>
    %203 = vector.broadcast %202 : vector<8x1xf32> to vector<8x8xf32>
    %204 = arith.subf %200, %203 : vector<8x8xf32>
    %205 = math.exp %204 : vector<8x8xf32>
    %cst_90 = arith.constant dense<0.000000e+00> : vector<8xf32>
    %206 = vector.multi_reduction <add>, %205, %cst_90 [1] : vector<8x8xf32> to vector<8xf32>
    %207 = vector.shape_cast %206 : vector<8xf32> to vector<8x1xf32>
    %208 = tpu.reciprocal %207 {approx = true} : vector<8x1xf32> -> vector<8x1xf32>
    %209 = vector.broadcast %208 : vector<8x1xf32> to vector<8x8xf32>
    %210 = arith.mulf %205, %209 : vector<8x8xf32>
    %211 = arith.truncf %210 : vector<8x8xf32> to vector<8x8xbf16>
    %cst_91 = arith.constant dense<0.000000e+00> : vector<8x16xf32>
    %212 = tpu.matmul %211, %195, %cst_91 {dimension_numbers = #tpu.dot_dimension_numbers<[1], [0], [0], [1], [0, 0, 1, 1], [], []>} : vector<8x8xbf16>, vector<8x16xbf16>, vector<8x16xf32> -> vector<8x16xf32>
    %213 = vector.extract_strided_slice %180 {offsets = [0, 16], sizes = [8, 16], strides = [1, 1]} : vector<8x32xf32> to vector<8x16xf32>
    %214 = arith.truncf %213 : vector<8x16xf32> to vector<8x16xbf16>
    %215 = vector.extract_strided_slice %188 {offsets = [0, 16], sizes = [8, 16], strides = [1, 1]} : vector<8x32xf32> to vector<8x16xf32>
    %216 = arith.truncf %215 : vector<8x16xf32> to vector<8x16xbf16>
    %217 = vector.extract_strided_slice %189 {offsets = [0, 16], sizes = [8, 16], strides = [1, 1]} : vector<8x32xf32> to vector<8x16xf32>
    %218 = arith.truncf %217 : vector<8x16xf32> to vector<8x16xbf16>
    %cst_92 = arith.constant dense<0.000000e+00> : vector<8x8xf32>
    %219 = tpu.matmul %214, %216, %cst_92 {dimension_numbers = #tpu.dot_dimension_numbers<[1], [1], [0], [0], [0, 0, 1, 0], [], []>} : vector<8x16xbf16>, vector<8x16xbf16>, vector<8x8xf32> -> vector<8x8xf32>
    %cst_93 = arith.constant 2.500000e-01 : f32
    %220 = vector.broadcast %cst_93 : f32 to vector<8x8xf32>
    %221 = arith.mulf %219, %220 : vector<8x8xf32>
    %222 = vector.broadcast %19 : vector<1x8xf32> to vector<8x8xf32>
    %223 = arith.addf %221, %222 : vector<8x8xf32>
    %cst_94 = arith.constant dense<0xFF800000> : vector<8xf32>
    %224 = vector.multi_reduction <maximumf>, %223, %cst_94 [1] : vector<8x8xf32> to vector<8xf32>
    %225 = vector.shape_cast %224 : vector<8xf32> to vector<8x1xf32>
    %226 = vector.broadcast %225 : vector<8x1xf32> to vector<8x8xf32>
    %227 = arith.subf %223, %226 : vector<8x8xf32>
    %228 = math.exp %227 : vector<8x8xf32>
    %cst_95 = arith.constant dense<0.000000e+00> : vector<8xf32>
    %229 = vector.multi_reduction <add>, %228, %cst_95 [1] : vector<8x8xf32> to vector<8xf32>
    %230 = vector.shape_cast %229 : vector<8xf32> to vector<8x1xf32>
    %231 = tpu.reciprocal %230 {approx = true} : vector<8x1xf32> -> vector<8x1xf32>
    %232 = vector.broadcast %231 : vector<8x1xf32> to vector<8x8xf32>
    %233 = arith.mulf %228, %232 : vector<8x8xf32>
    %234 = arith.truncf %233 : vector<8x8xf32> to vector<8x8xbf16>
    %cst_96 = arith.constant dense<0.000000e+00> : vector<8x16xf32>
    %235 = tpu.matmul %234, %218, %cst_96 {dimension_numbers = #tpu.dot_dimension_numbers<[1], [0], [0], [1], [0, 0, 1, 1], [], []>} : vector<8x8xbf16>, vector<8x16xbf16>, vector<8x16xf32> -> vector<8x16xf32>
    %236 = tpu.concatenate %212, %235 in 1 : vector<8x16xf32>, vector<8x16xf32> -> vector<8x32xf32>
    %237 = arith.truncf %236 : vector<8x32xf32> to vector<8x32xbf16>
    %c0_97 = arith.constant 0 : index
    %c1_98 = arith.constant 1 : index
    %c0_99 = arith.constant 0 : index
    %c0_100 = arith.constant 0 : index
    %238 = vector.load %arg6[%c0_97, %c1_98, %c0_99, %c0_100] : memref<1x4x32x32xf32, #tpu.memory_space<vmem>>, vector<1x1x32x32xf32>
    %239 = vector.shape_cast %238 : vector<1x1x32x32xf32> to vector<32x32xf32>
    %240 = arith.truncf %239 : vector<32x32xf32> to vector<32x32xbf16>
    %cst_101 = arith.constant dense<0.000000e+00> : vector<8x32xf32>
    %241 = tpu.matmul %237, %240, %cst_101 {dimension_numbers = #tpu.dot_dimension_numbers<[1], [0], [0], [1], [0, 0, 1, 1], [], []>} : vector<8x32xbf16>, vector<32x32xbf16>, vector<8x32xf32> -> vector<8x32xf32>
    %c0_102 = arith.constant 0 : index
    %c1_103 = arith.constant 1 : index
    %c0_104 = arith.constant 0 : index
    %c0_105 = arith.constant 0 : index
    %242 = vector.load %arg7[%c0_102, %c1_103, %c0_104, %c0_105] : memref<1x4x1x32xf32, #tpu.memory_space<vmem>>, vector<1x1x1x32xf32>
    %243 = vector.shape_cast %242 : vector<1x1x1x32xf32> to vector<1x32xf32>
    %244 = vector.broadcast %243 : vector<1x32xf32> to vector<8x32xf32>
    %245 = arith.addf %241, %244 : vector<8x32xf32>
    %246 = arith.addf %245, %7 : vector<8x32xf32>
    %c0_106 = arith.constant 0 : index
    %c1_107 = arith.constant 1 : index
    %c0_108 = arith.constant 0 : index
    %c0_109 = arith.constant 0 : index
    %247 = vector.load %arg8[%c0_106, %c1_107, %c0_108, %c0_109] : memref<1x4x1x32xf32, #tpu.memory_space<vmem>>, vector<1x1x1x32xf32>
    %248 = vector.shape_cast %247 : vector<1x1x1x32xf32> to vector<1x32xf32>
    %c0_110 = arith.constant 0 : index
    %c1_111 = arith.constant 1 : index
    %c0_112 = arith.constant 0 : index
    %c0_113 = arith.constant 0 : index
    %249 = vector.load %arg9[%c0_110, %c1_111, %c0_112, %c0_113] : memref<1x4x1x32xf32, #tpu.memory_space<vmem>>, vector<1x1x1x32xf32>
    %250 = vector.shape_cast %249 : vector<1x1x1x32xf32> to vector<1x32xf32>
    %cst_114 = arith.constant dense<0.000000e+00> : vector<8xf32>
    %251 = vector.multi_reduction <add>, %246, %cst_114 [1] : vector<8x32xf32> to vector<8xf32>
    %252 = vector.shape_cast %251 : vector<8xf32> to vector<8x1xf32>
    %cst_115 = arith.constant 3.200000e+01 : f32
    %253 = vector.broadcast %cst_115 : f32 to vector<8x1xf32>
    %254 = arith.divf %252, %253 : vector<8x1xf32>
    %255 = vector.broadcast %254 : vector<8x1xf32> to vector<8x32xf32>
    %256 = arith.subf %246, %255 : vector<8x32xf32>
    %257 = arith.mulf %256, %256 : vector<8x32xf32>
    %cst_116 = arith.constant dense<0.000000e+00> : vector<8xf32>
    %258 = vector.multi_reduction <add>, %257, %cst_116 [1] : vector<8x32xf32> to vector<8xf32>
    %259 = vector.shape_cast %258 : vector<8xf32> to vector<8x1xf32>
    %cst_117 = arith.constant 3.200000e+01 : f32
    %260 = vector.broadcast %cst_117 : f32 to vector<8x1xf32>
    %261 = arith.divf %259, %260 : vector<8x1xf32>
    %262 = vector.broadcast %254 : vector<8x1xf32> to vector<8x32xf32>
    %263 = arith.subf %246, %262 : vector<8x32xf32>
    %cst_118 = arith.constant 9.99999974E-6 : f32
    %264 = vector.broadcast %cst_118 : f32 to vector<8x1xf32>
    %265 = arith.addf %261, %264 : vector<8x1xf32>
    %266 = math.rsqrt %265 : vector<8x1xf32>
    %267 = vector.broadcast %266 : vector<8x1xf32> to vector<8x32xf32>
    %268 = arith.mulf %263, %267 : vector<8x32xf32>
    %269 = vector.broadcast %248 : vector<1x32xf32> to vector<8x32xf32>
    %270 = arith.mulf %268, %269 : vector<8x32xf32>
    %271 = vector.broadcast %250 : vector<1x32xf32> to vector<8x32xf32>
    %272 = arith.addf %270, %271 : vector<8x32xf32>
    %273 = vector.broadcast %23 : vector<8x1xf32> to vector<8x32xf32>
    %274 = arith.mulf %272, %273 : vector<8x32xf32>
    %275 = arith.truncf %274 : vector<8x32xf32> to vector<8x32xbf16>
    %c0_119 = arith.constant 0 : index
    %c1_120 = arith.constant 1 : index
    %c0_121 = arith.constant 0 : index
    %c0_122 = arith.constant 0 : index
    %276 = vector.load %arg10[%c0_119, %c1_120, %c0_121, %c0_122] : memref<1x4x32x64xf32, #tpu.memory_space<vmem>>, vector<1x1x32x64xf32>
    %277 = vector.shape_cast %276 : vector<1x1x32x64xf32> to vector<32x64xf32>
    %278 = arith.truncf %277 : vector<32x64xf32> to vector<32x64xbf16>
    %cst_123 = arith.constant dense<0.000000e+00> : vector<8x64xf32>
    %279 = tpu.matmul %275, %278, %cst_123 {dimension_numbers = #tpu.dot_dimension_numbers<[1], [0], [0], [1], [0, 0, 1, 1], [], []>} : vector<8x32xbf16>, vector<32x64xbf16>, vector<8x64xf32> -> vector<8x64xf32>
    %c0_124 = arith.constant 0 : index
    %c1_125 = arith.constant 1 : index
    %c0_126 = arith.constant 0 : index
    %c0_127 = arith.constant 0 : index
    %280 = vector.load %arg11[%c0_124, %c1_125, %c0_126, %c0_127] : memref<1x4x1x64xf32, #tpu.memory_space<vmem>>, vector<1x1x1x64xf32>
    %281 = vector.shape_cast %280 : vector<1x1x1x64xf32> to vector<1x64xf32>
    %282 = vector.broadcast %281 : vector<1x64xf32> to vector<8x64xf32>
    %283 = arith.addf %279, %282 : vector<8x64xf32>
    %cst_128 = arith.constant 0.000000e+00 : f32
    %284 = vector.broadcast %cst_128 : f32 to vector<8x64xf32>
    %285 = arith.maximumf %283, %284 : vector<8x64xf32>
    %286 = arith.truncf %285 : vector<8x64xf32> to vector<8x64xbf16>
    %c0_129 = arith.constant 0 : index
    %c1_130 = arith.constant 1 : index
    %c0_131 = arith.constant 0 : index
    %c0_132 = arith.constant 0 : index
    %287 = vector.load %arg12[%c0_129, %c1_130, %c0_131, %c0_132] : memref<1x4x64x32xf32, #tpu.memory_space<vmem>>, vector<1x1x64x32xf32>
    %288 = vector.shape_cast %287 : vector<1x1x64x32xf32> to vector<64x32xf32>
    %289 = arith.truncf %288 : vector<64x32xf32> to vector<64x32xbf16>
    %cst_133 = arith.constant dense<0.000000e+00> : vector<8x32xf32>
    %290 = tpu.matmul %286, %289, %cst_133 {dimension_numbers = #tpu.dot_dimension_numbers<[1], [0], [0], [1], [0, 0, 1, 1], [], []>} : vector<8x64xbf16>, vector<64x32xbf16>, vector<8x32xf32> -> vector<8x32xf32>
    %c0_134 = arith.constant 0 : index
    %c1_135 = arith.constant 1 : index
    %c0_136 = arith.constant 0 : index
    %c0_137 = arith.constant 0 : index
    %291 = vector.load %arg13[%c0_134, %c1_135, %c0_136, %c0_137] : memref<1x4x1x32xf32, #tpu.memory_space<vmem>>, vector<1x1x1x32xf32>
    %292 = vector.shape_cast %291 : vector<1x1x1x32xf32> to vector<1x32xf32>
    %293 = vector.broadcast %292 : vector<1x32xf32> to vector<8x32xf32>
    %294 = arith.addf %290, %293 : vector<8x32xf32>
    %295 = arith.addf %294, %274 : vector<8x32xf32>
    %c0_138 = arith.constant 0 : index
    %c1_139 = arith.constant 1 : index
    %c0_140 = arith.constant 0 : index
    %c0_141 = arith.constant 0 : index
    %296 = vector.load %arg14[%c0_138, %c1_139, %c0_140, %c0_141] : memref<1x4x1x32xf32, #tpu.memory_space<vmem>>, vector<1x1x1x32xf32>
    %297 = vector.shape_cast %296 : vector<1x1x1x32xf32> to vector<1x32xf32>
    %c0_142 = arith.constant 0 : index
    %c1_143 = arith.constant 1 : index
    %c0_144 = arith.constant 0 : index
    %c0_145 = arith.constant 0 : index
    %298 = vector.load %arg15[%c0_142, %c1_143, %c0_144, %c0_145] : memref<1x4x1x32xf32, #tpu.memory_space<vmem>>, vector<1x1x1x32xf32>
    %299 = vector.shape_cast %298 : vector<1x1x1x32xf32> to vector<1x32xf32>
    %cst_146 = arith.constant dense<0.000000e+00> : vector<8xf32>
    %300 = vector.multi_reduction <add>, %295, %cst_146 [1] : vector<8x32xf32> to vector<8xf32>
    %301 = vector.shape_cast %300 : vector<8xf32> to vector<8x1xf32>
    %cst_147 = arith.constant 3.200000e+01 : f32
    %302 = vector.broadcast %cst_147 : f32 to vector<8x1xf32>
    %303 = arith.divf %301, %302 : vector<8x1xf32>
    %304 = vector.broadcast %303 : vector<8x1xf32> to vector<8x32xf32>
    %305 = arith.subf %295, %304 : vector<8x32xf32>
    %306 = arith.mulf %305, %305 : vector<8x32xf32>
    %cst_148 = arith.constant dense<0.000000e+00> : vector<8xf32>
    %307 = vector.multi_reduction <add>, %306, %cst_148 [1] : vector<8x32xf32> to vector<8xf32>
    %308 = vector.shape_cast %307 : vector<8xf32> to vector<8x1xf32>
    %cst_149 = arith.constant 3.200000e+01 : f32
    %309 = vector.broadcast %cst_149 : f32 to vector<8x1xf32>
    %310 = arith.divf %308, %309 : vector<8x1xf32>
    %311 = vector.broadcast %303 : vector<8x1xf32> to vector<8x32xf32>
    %312 = arith.subf %295, %311 : vector<8x32xf32>
    %cst_150 = arith.constant 9.99999974E-6 : f32
    %313 = vector.broadcast %cst_150 : f32 to vector<8x1xf32>
    %314 = arith.addf %310, %313 : vector<8x1xf32>
    %315 = math.rsqrt %314 : vector<8x1xf32>
    %316 = vector.broadcast %315 : vector<8x1xf32> to vector<8x32xf32>
    %317 = arith.mulf %312, %316 : vector<8x32xf32>
    %318 = vector.broadcast %297 : vector<1x32xf32> to vector<8x32xf32>
    %319 = arith.mulf %317, %318 : vector<8x32xf32>
    %320 = vector.broadcast %299 : vector<1x32xf32> to vector<8x32xf32>
    %321 = arith.addf %319, %320 : vector<8x32xf32>
    %322 = vector.broadcast %23 : vector<8x1xf32> to vector<8x32xf32>
    %323 = arith.mulf %321, %322 : vector<8x32xf32>
    %324 = arith.addf %169, %323 : vector<8x32xf32>
    %c0_151 = arith.constant 0 : index
    %c2 = arith.constant 2 : index
    %c0_152 = arith.constant 0 : index
    %c0_153 = arith.constant 0 : index
    %325 = vector.load %arg4[%c0_151, %c2, %c0_152, %c0_153] : memref<1x4x32x96xf32, #tpu.memory_space<vmem>>, vector<1x1x32x96xf32>
    %326 = vector.shape_cast %325 : vector<1x1x32x96xf32> to vector<32x96xf32>
    %c0_154 = arith.constant 0 : index
    %c2_155 = arith.constant 2 : index
    %c0_156 = arith.constant 0 : index
    %c0_157 = arith.constant 0 : index
    %327 = vector.load %arg5[%c0_154, %c2_155, %c0_156, %c0_157] : memref<1x4x1x96xf32, #tpu.memory_space<vmem>>, vector<1x1x1x96xf32>
    %328 = vector.shape_cast %327 : vector<1x1x1x96xf32> to vector<1x96xf32>
    %329 = arith.truncf %10 : vector<8x32xf32> to vector<8x32xbf16>
    %330 = arith.truncf %326 : vector<32x96xf32> to vector<32x96xbf16>
    %cst_158 = arith.constant dense<0.000000e+00> : vector<8x96xf32>
    %331 = tpu.matmul %329, %330, %cst_158 {dimension_numbers = #tpu.dot_dimension_numbers<[1], [0], [0], [1], [0, 0, 1, 1], [], []>} : vector<8x32xbf16>, vector<32x96xbf16>, vector<8x96xf32> -> vector<8x96xf32>
    %332 = vector.broadcast %328 : vector<1x96xf32> to vector<8x96xf32>
    %333 = arith.addf %331, %332 : vector<8x96xf32>
    %334 = vector.extract_strided_slice %333 {offsets = [0, 0], sizes = [8, 32], strides = [1, 1]} : vector<8x96xf32> to vector<8x32xf32>
    %335 = vector.extract_strided_slice %333 {offsets = [0, 32], sizes = [8, 32], strides = [1, 1]} : vector<8x96xf32> to vector<8x32xf32>
    %336 = vector.extract_strided_slice %333 {offsets = [0, 64], sizes = [8, 32], strides = [1, 1]} : vector<8x96xf32> to vector<8x32xf32>
    %337 = vector.extract_strided_slice %334 {offsets = [0, 0], sizes = [8, 16], strides = [1, 1]} : vector<8x32xf32> to vector<8x16xf32>
    %338 = arith.truncf %337 : vector<8x16xf32> to vector<8x16xbf16>
    %339 = vector.extract_strided_slice %335 {offsets = [0, 0], sizes = [8, 16], strides = [1, 1]} : vector<8x32xf32> to vector<8x16xf32>
    %340 = arith.truncf %339 : vector<8x16xf32> to vector<8x16xbf16>
    %341 = vector.extract_strided_slice %336 {offsets = [0, 0], sizes = [8, 16], strides = [1, 1]} : vector<8x32xf32> to vector<8x16xf32>
    %342 = arith.truncf %341 : vector<8x16xf32> to vector<8x16xbf16>
    %cst_159 = arith.constant dense<0.000000e+00> : vector<8x8xf32>
    %343 = tpu.matmul %338, %340, %cst_159 {dimension_numbers = #tpu.dot_dimension_numbers<[1], [1], [0], [0], [0, 0, 1, 0], [], []>} : vector<8x16xbf16>, vector<8x16xbf16>, vector<8x8xf32> -> vector<8x8xf32>
    %cst_160 = arith.constant 2.500000e-01 : f32
    %344 = vector.broadcast %cst_160 : f32 to vector<8x8xf32>
    %345 = arith.mulf %343, %344 : vector<8x8xf32>
    %346 = vector.broadcast %19 : vector<1x8xf32> to vector<8x8xf32>
    %347 = arith.addf %345, %346 : vector<8x8xf32>
    %cst_161 = arith.constant dense<0xFF800000> : vector<8xf32>
    %348 = vector.multi_reduction <maximumf>, %347, %cst_161 [1] : vector<8x8xf32> to vector<8xf32>
    %349 = vector.shape_cast %348 : vector<8xf32> to vector<8x1xf32>
    %350 = vector.broadcast %349 : vector<8x1xf32> to vector<8x8xf32>
    %351 = arith.subf %347, %350 : vector<8x8xf32>
    %352 = math.exp %351 : vector<8x8xf32>
    %cst_162 = arith.constant dense<0.000000e+00> : vector<8xf32>
    %353 = vector.multi_reduction <add>, %352, %cst_162 [1] : vector<8x8xf32> to vector<8xf32>
    %354 = vector.shape_cast %353 : vector<8xf32> to vector<8x1xf32>
    %355 = tpu.reciprocal %354 {approx = true} : vector<8x1xf32> -> vector<8x1xf32>
    %356 = vector.broadcast %355 : vector<8x1xf32> to vector<8x8xf32>
    %357 = arith.mulf %352, %356 : vector<8x8xf32>
    %358 = arith.truncf %357 : vector<8x8xf32> to vector<8x8xbf16>
    %cst_163 = arith.constant dense<0.000000e+00> : vector<8x16xf32>
    %359 = tpu.matmul %358, %342, %cst_163 {dimension_numbers = #tpu.dot_dimension_numbers<[1], [0], [0], [1], [0, 0, 1, 1], [], []>} : vector<8x8xbf16>, vector<8x16xbf16>, vector<8x16xf32> -> vector<8x16xf32>
    %360 = vector.extract_strided_slice %334 {offsets = [0, 16], sizes = [8, 16], strides = [1, 1]} : vector<8x32xf32> to vector<8x16xf32>
    %361 = arith.truncf %360 : vector<8x16xf32> to vector<8x16xbf16>
    %362 = vector.extract_strided_slice %335 {offsets = [0, 16], sizes = [8, 16], strides = [1, 1]} : vector<8x32xf32> to vector<8x16xf32>
    %363 = arith.truncf %362 : vector<8x16xf32> to vector<8x16xbf16>
    %364 = vector.extract_strided_slice %336 {offsets = [0, 16], sizes = [8, 16], strides = [1, 1]} : vector<8x32xf32> to vector<8x16xf32>
    %365 = arith.truncf %364 : vector<8x16xf32> to vector<8x16xbf16>
    %cst_164 = arith.constant dense<0.000000e+00> : vector<8x8xf32>
    %366 = tpu.matmul %361, %363, %cst_164 {dimension_numbers = #tpu.dot_dimension_numbers<[1], [1], [0], [0], [0, 0, 1, 0], [], []>} : vector<8x16xbf16>, vector<8x16xbf16>, vector<8x8xf32> -> vector<8x8xf32>
    %cst_165 = arith.constant 2.500000e-01 : f32
    %367 = vector.broadcast %cst_165 : f32 to vector<8x8xf32>
    %368 = arith.mulf %366, %367 : vector<8x8xf32>
    %369 = vector.broadcast %19 : vector<1x8xf32> to vector<8x8xf32>
    %370 = arith.addf %368, %369 : vector<8x8xf32>
    %cst_166 = arith.constant dense<0xFF800000> : vector<8xf32>
    %371 = vector.multi_reduction <maximumf>, %370, %cst_166 [1] : vector<8x8xf32> to vector<8xf32>
    %372 = vector.shape_cast %371 : vector<8xf32> to vector<8x1xf32>
    %373 = vector.broadcast %372 : vector<8x1xf32> to vector<8x8xf32>
    %374 = arith.subf %370, %373 : vector<8x8xf32>
    %375 = math.exp %374 : vector<8x8xf32>
    %cst_167 = arith.constant dense<0.000000e+00> : vector<8xf32>
    %376 = vector.multi_reduction <add>, %375, %cst_167 [1] : vector<8x8xf32> to vector<8xf32>
    %377 = vector.shape_cast %376 : vector<8xf32> to vector<8x1xf32>
    %378 = tpu.reciprocal %377 {approx = true} : vector<8x1xf32> -> vector<8x1xf32>
    %379 = vector.broadcast %378 : vector<8x1xf32> to vector<8x8xf32>
    %380 = arith.mulf %375, %379 : vector<8x8xf32>
    %381 = arith.truncf %380 : vector<8x8xf32> to vector<8x8xbf16>
    %cst_168 = arith.constant dense<0.000000e+00> : vector<8x16xf32>
    %382 = tpu.matmul %381, %365, %cst_168 {dimension_numbers = #tpu.dot_dimension_numbers<[1], [0], [0], [1], [0, 0, 1, 1], [], []>} : vector<8x8xbf16>, vector<8x16xbf16>, vector<8x16xf32> -> vector<8x16xf32>
    %383 = tpu.concatenate %359, %382 in 1 : vector<8x16xf32>, vector<8x16xf32> -> vector<8x32xf32>
    %384 = arith.truncf %383 : vector<8x32xf32> to vector<8x32xbf16>
    %c0_169 = arith.constant 0 : index
    %c2_170 = arith.constant 2 : index
    %c0_171 = arith.constant 0 : index
    %c0_172 = arith.constant 0 : index
    %385 = vector.load %arg6[%c0_169, %c2_170, %c0_171, %c0_172] : memref<1x4x32x32xf32, #tpu.memory_space<vmem>>, vector<1x1x32x32xf32>
    %386 = vector.shape_cast %385 : vector<1x1x32x32xf32> to vector<32x32xf32>
    %387 = arith.truncf %386 : vector<32x32xf32> to vector<32x32xbf16>
    %cst_173 = arith.constant dense<0.000000e+00> : vector<8x32xf32>
    %388 = tpu.matmul %384, %387, %cst_173 {dimension_numbers = #tpu.dot_dimension_numbers<[1], [0], [0], [1], [0, 0, 1, 1], [], []>} : vector<8x32xbf16>, vector<32x32xbf16>, vector<8x32xf32> -> vector<8x32xf32>
    %c0_174 = arith.constant 0 : index
    %c2_175 = arith.constant 2 : index
    %c0_176 = arith.constant 0 : index
    %c0_177 = arith.constant 0 : index
    %389 = vector.load %arg7[%c0_174, %c2_175, %c0_176, %c0_177] : memref<1x4x1x32xf32, #tpu.memory_space<vmem>>, vector<1x1x1x32xf32>
    %390 = vector.shape_cast %389 : vector<1x1x1x32xf32> to vector<1x32xf32>
    %391 = vector.broadcast %390 : vector<1x32xf32> to vector<8x32xf32>
    %392 = arith.addf %388, %391 : vector<8x32xf32>
    %393 = arith.addf %392, %10 : vector<8x32xf32>
    %c0_178 = arith.constant 0 : index
    %c2_179 = arith.constant 2 : index
    %c0_180 = arith.constant 0 : index
    %c0_181 = arith.constant 0 : index
    %394 = vector.load %arg8[%c0_178, %c2_179, %c0_180, %c0_181] : memref<1x4x1x32xf32, #tpu.memory_space<vmem>>, vector<1x1x1x32xf32>
    %395 = vector.shape_cast %394 : vector<1x1x1x32xf32> to vector<1x32xf32>
    %c0_182 = arith.constant 0 : index
    %c2_183 = arith.constant 2 : index
    %c0_184 = arith.constant 0 : index
    %c0_185 = arith.constant 0 : index
    %396 = vector.load %arg9[%c0_182, %c2_183, %c0_184, %c0_185] : memref<1x4x1x32xf32, #tpu.memory_space<vmem>>, vector<1x1x1x32xf32>
    %397 = vector.shape_cast %396 : vector<1x1x1x32xf32> to vector<1x32xf32>
    %cst_186 = arith.constant dense<0.000000e+00> : vector<8xf32>
    %398 = vector.multi_reduction <add>, %393, %cst_186 [1] : vector<8x32xf32> to vector<8xf32>
    %399 = vector.shape_cast %398 : vector<8xf32> to vector<8x1xf32>
    %cst_187 = arith.constant 3.200000e+01 : f32
    %400 = vector.broadcast %cst_187 : f32 to vector<8x1xf32>
    %401 = arith.divf %399, %400 : vector<8x1xf32>
    %402 = vector.broadcast %401 : vector<8x1xf32> to vector<8x32xf32>
    %403 = arith.subf %393, %402 : vector<8x32xf32>
    %404 = arith.mulf %403, %403 : vector<8x32xf32>
    %cst_188 = arith.constant dense<0.000000e+00> : vector<8xf32>
    %405 = vector.multi_reduction <add>, %404, %cst_188 [1] : vector<8x32xf32> to vector<8xf32>
    %406 = vector.shape_cast %405 : vector<8xf32> to vector<8x1xf32>
    %cst_189 = arith.constant 3.200000e+01 : f32
    %407 = vector.broadcast %cst_189 : f32 to vector<8x1xf32>
    %408 = arith.divf %406, %407 : vector<8x1xf32>
    %409 = vector.broadcast %401 : vector<8x1xf32> to vector<8x32xf32>
    %410 = arith.subf %393, %409 : vector<8x32xf32>
    %cst_190 = arith.constant 9.99999974E-6 : f32
    %411 = vector.broadcast %cst_190 : f32 to vector<8x1xf32>
    %412 = arith.addf %408, %411 : vector<8x1xf32>
    %413 = math.rsqrt %412 : vector<8x1xf32>
    %414 = vector.broadcast %413 : vector<8x1xf32> to vector<8x32xf32>
    %415 = arith.mulf %410, %414 : vector<8x32xf32>
    %416 = vector.broadcast %395 : vector<1x32xf32> to vector<8x32xf32>
    %417 = arith.mulf %415, %416 : vector<8x32xf32>
    %418 = vector.broadcast %397 : vector<1x32xf32> to vector<8x32xf32>
    %419 = arith.addf %417, %418 : vector<8x32xf32>
    %420 = vector.broadcast %23 : vector<8x1xf32> to vector<8x32xf32>
    %421 = arith.mulf %419, %420 : vector<8x32xf32>
    %422 = arith.truncf %421 : vector<8x32xf32> to vector<8x32xbf16>
    %c0_191 = arith.constant 0 : index
    %c2_192 = arith.constant 2 : index
    %c0_193 = arith.constant 0 : index
    %c0_194 = arith.constant 0 : index
    %423 = vector.load %arg10[%c0_191, %c2_192, %c0_193, %c0_194] : memref<1x4x32x64xf32, #tpu.memory_space<vmem>>, vector<1x1x32x64xf32>
    %424 = vector.shape_cast %423 : vector<1x1x32x64xf32> to vector<32x64xf32>
    %425 = arith.truncf %424 : vector<32x64xf32> to vector<32x64xbf16>
    %cst_195 = arith.constant dense<0.000000e+00> : vector<8x64xf32>
    %426 = tpu.matmul %422, %425, %cst_195 {dimension_numbers = #tpu.dot_dimension_numbers<[1], [0], [0], [1], [0, 0, 1, 1], [], []>} : vector<8x32xbf16>, vector<32x64xbf16>, vector<8x64xf32> -> vector<8x64xf32>
    %c0_196 = arith.constant 0 : index
    %c2_197 = arith.constant 2 : index
    %c0_198 = arith.constant 0 : index
    %c0_199 = arith.constant 0 : index
    %427 = vector.load %arg11[%c0_196, %c2_197, %c0_198, %c0_199] : memref<1x4x1x64xf32, #tpu.memory_space<vmem>>, vector<1x1x1x64xf32>
    %428 = vector.shape_cast %427 : vector<1x1x1x64xf32> to vector<1x64xf32>
    %429 = vector.broadcast %428 : vector<1x64xf32> to vector<8x64xf32>
    %430 = arith.addf %426, %429 : vector<8x64xf32>
    %cst_200 = arith.constant 0.000000e+00 : f32
    %431 = vector.broadcast %cst_200 : f32 to vector<8x64xf32>
    %432 = arith.maximumf %430, %431 : vector<8x64xf32>
    %433 = arith.truncf %432 : vector<8x64xf32> to vector<8x64xbf16>
    %c0_201 = arith.constant 0 : index
    %c2_202 = arith.constant 2 : index
    %c0_203 = arith.constant 0 : index
    %c0_204 = arith.constant 0 : index
    %434 = vector.load %arg12[%c0_201, %c2_202, %c0_203, %c0_204] : memref<1x4x64x32xf32, #tpu.memory_space<vmem>>, vector<1x1x64x32xf32>
    %435 = vector.shape_cast %434 : vector<1x1x64x32xf32> to vector<64x32xf32>
    %436 = arith.truncf %435 : vector<64x32xf32> to vector<64x32xbf16>
    %cst_205 = arith.constant dense<0.000000e+00> : vector<8x32xf32>
    %437 = tpu.matmul %433, %436, %cst_205 {dimension_numbers = #tpu.dot_dimension_numbers<[1], [0], [0], [1], [0, 0, 1, 1], [], []>} : vector<8x64xbf16>, vector<64x32xbf16>, vector<8x32xf32> -> vector<8x32xf32>
    %c0_206 = arith.constant 0 : index
    %c2_207 = arith.constant 2 : index
    %c0_208 = arith.constant 0 : index
    %c0_209 = arith.constant 0 : index
    %438 = vector.load %arg13[%c0_206, %c2_207, %c0_208, %c0_209] : memref<1x4x1x32xf32, #tpu.memory_space<vmem>>, vector<1x1x1x32xf32>
    %439 = vector.shape_cast %438 : vector<1x1x1x32xf32> to vector<1x32xf32>
    %440 = vector.broadcast %439 : vector<1x32xf32> to vector<8x32xf32>
    %441 = arith.addf %437, %440 : vector<8x32xf32>
    %442 = arith.addf %441, %421 : vector<8x32xf32>
    %c0_210 = arith.constant 0 : index
    %c2_211 = arith.constant 2 : index
    %c0_212 = arith.constant 0 : index
    %c0_213 = arith.constant 0 : index
    %443 = vector.load %arg14[%c0_210, %c2_211, %c0_212, %c0_213] : memref<1x4x1x32xf32, #tpu.memory_space<vmem>>, vector<1x1x1x32xf32>
    %444 = vector.shape_cast %443 : vector<1x1x1x32xf32> to vector<1x32xf32>
    %c0_214 = arith.constant 0 : index
    %c2_215 = arith.constant 2 : index
    %c0_216 = arith.constant 0 : index
    %c0_217 = arith.constant 0 : index
    %445 = vector.load %arg15[%c0_214, %c2_215, %c0_216, %c0_217] : memref<1x4x1x32xf32, #tpu.memory_space<vmem>>, vector<1x1x1x32xf32>
    %446 = vector.shape_cast %445 : vector<1x1x1x32xf32> to vector<1x32xf32>
    %cst_218 = arith.constant dense<0.000000e+00> : vector<8xf32>
    %447 = vector.multi_reduction <add>, %442, %cst_218 [1] : vector<8x32xf32> to vector<8xf32>
    %448 = vector.shape_cast %447 : vector<8xf32> to vector<8x1xf32>
    %cst_219 = arith.constant 3.200000e+01 : f32
    %449 = vector.broadcast %cst_219 : f32 to vector<8x1xf32>
    %450 = arith.divf %448, %449 : vector<8x1xf32>
    %451 = vector.broadcast %450 : vector<8x1xf32> to vector<8x32xf32>
    %452 = arith.subf %442, %451 : vector<8x32xf32>
    %453 = arith.mulf %452, %452 : vector<8x32xf32>
    %cst_220 = arith.constant dense<0.000000e+00> : vector<8xf32>
    %454 = vector.multi_reduction <add>, %453, %cst_220 [1] : vector<8x32xf32> to vector<8xf32>
    %455 = vector.shape_cast %454 : vector<8xf32> to vector<8x1xf32>
    %cst_221 = arith.constant 3.200000e+01 : f32
    %456 = vector.broadcast %cst_221 : f32 to vector<8x1xf32>
    %457 = arith.divf %455, %456 : vector<8x1xf32>
    %458 = vector.broadcast %450 : vector<8x1xf32> to vector<8x32xf32>
    %459 = arith.subf %442, %458 : vector<8x32xf32>
    %cst_222 = arith.constant 9.99999974E-6 : f32
    %460 = vector.broadcast %cst_222 : f32 to vector<8x1xf32>
    %461 = arith.addf %457, %460 : vector<8x1xf32>
    %462 = math.rsqrt %461 : vector<8x1xf32>
    %463 = vector.broadcast %462 : vector<8x1xf32> to vector<8x32xf32>
    %464 = arith.mulf %459, %463 : vector<8x32xf32>
    %465 = vector.broadcast %444 : vector<1x32xf32> to vector<8x32xf32>
    %466 = arith.mulf %464, %465 : vector<8x32xf32>
    %467 = vector.broadcast %446 : vector<1x32xf32> to vector<8x32xf32>
    %468 = arith.addf %466, %467 : vector<8x32xf32>
    %469 = vector.broadcast %23 : vector<8x1xf32> to vector<8x32xf32>
    %470 = arith.mulf %468, %469 : vector<8x32xf32>
    %c0_223 = arith.constant 0 : index
    %c3 = arith.constant 3 : index
    %c0_224 = arith.constant 0 : index
    %c0_225 = arith.constant 0 : index
    %471 = vector.load %arg4[%c0_223, %c3, %c0_224, %c0_225] : memref<1x4x32x96xf32, #tpu.memory_space<vmem>>, vector<1x1x32x96xf32>
    %472 = vector.shape_cast %471 : vector<1x1x32x96xf32> to vector<32x96xf32>
    %c0_226 = arith.constant 0 : index
    %c3_227 = arith.constant 3 : index
    %c0_228 = arith.constant 0 : index
    %c0_229 = arith.constant 0 : index
    %473 = vector.load %arg5[%c0_226, %c3_227, %c0_228, %c0_229] : memref<1x4x1x96xf32, #tpu.memory_space<vmem>>, vector<1x1x1x96xf32>
    %474 = vector.shape_cast %473 : vector<1x1x1x96xf32> to vector<1x96xf32>
    %475 = arith.truncf %10 : vector<8x32xf32> to vector<8x32xbf16>
    %476 = vector.extract_strided_slice %472 {offsets = [0, 0], sizes = [32, 32], strides = [1, 1]} : vector<32x96xf32> to vector<32x32xf32>
    %477 = arith.truncf %476 : vector<32x32xf32> to vector<32x32xbf16>
    %cst_230 = arith.constant dense<0.000000e+00> : vector<8x32xf32>
    %478 = tpu.matmul %475, %477, %cst_230 {dimension_numbers = #tpu.dot_dimension_numbers<[1], [0], [0], [1], [0, 0, 1, 1], [], []>} : vector<8x32xbf16>, vector<32x32xbf16>, vector<8x32xf32> -> vector<8x32xf32>
    %479 = vector.extract_strided_slice %474 {offsets = [0, 0], sizes = [1, 32], strides = [1, 1]} : vector<1x96xf32> to vector<1x32xf32>
    %480 = vector.broadcast %479 : vector<1x32xf32> to vector<8x32xf32>
    %481 = arith.addf %478, %480 : vector<8x32xf32>
    %482 = arith.truncf %7 : vector<8x32xf32> to vector<8x32xbf16>
    %483 = vector.extract_strided_slice %472 {offsets = [0, 32], sizes = [32, 64], strides = [1, 1]} : vector<32x96xf32> to vector<32x64xf32>
    %484 = arith.truncf %483 : vector<32x64xf32> to vector<32x64xbf16>
    %cst_231 = arith.constant dense<0.000000e+00> : vector<8x64xf32>
    %485 = tpu.matmul %482, %484, %cst_231 {dimension_numbers = #tpu.dot_dimension_numbers<[1], [0], [0], [1], [0, 0, 1, 1], [], []>} : vector<8x32xbf16>, vector<32x64xbf16>, vector<8x64xf32> -> vector<8x64xf32>
    %486 = vector.extract_strided_slice %474 {offsets = [0, 32], sizes = [1, 64], strides = [1, 1]} : vector<1x96xf32> to vector<1x64xf32>
    %487 = vector.broadcast %486 : vector<1x64xf32> to vector<8x64xf32>
    %488 = arith.addf %485, %487 : vector<8x64xf32>
    %489 = vector.extract_strided_slice %488 {offsets = [0, 0], sizes = [8, 32], strides = [1, 1]} : vector<8x64xf32> to vector<8x32xf32>
    %490 = vector.extract_strided_slice %488 {offsets = [0, 32], sizes = [8, 32], strides = [1, 1]} : vector<8x64xf32> to vector<8x32xf32>
    %491 = vector.extract_strided_slice %481 {offsets = [0, 0], sizes = [8, 16], strides = [1, 1]} : vector<8x32xf32> to vector<8x16xf32>
    %492 = arith.truncf %491 : vector<8x16xf32> to vector<8x16xbf16>
    %493 = vector.extract_strided_slice %489 {offsets = [0, 0], sizes = [8, 16], strides = [1, 1]} : vector<8x32xf32> to vector<8x16xf32>
    %494 = arith.truncf %493 : vector<8x16xf32> to vector<8x16xbf16>
    %495 = vector.extract_strided_slice %490 {offsets = [0, 0], sizes = [8, 16], strides = [1, 1]} : vector<8x32xf32> to vector<8x16xf32>
    %496 = arith.truncf %495 : vector<8x16xf32> to vector<8x16xbf16>
    %cst_232 = arith.constant dense<0.000000e+00> : vector<8x8xf32>
    %497 = tpu.matmul %492, %494, %cst_232 {dimension_numbers = #tpu.dot_dimension_numbers<[1], [1], [0], [0], [0, 0, 1, 0], [], []>} : vector<8x16xbf16>, vector<8x16xbf16>, vector<8x8xf32> -> vector<8x8xf32>
    %cst_233 = arith.constant 2.500000e-01 : f32
    %498 = vector.broadcast %cst_233 : f32 to vector<8x8xf32>
    %499 = arith.mulf %497, %498 : vector<8x8xf32>
    %500 = vector.broadcast %19 : vector<1x8xf32> to vector<8x8xf32>
    %501 = arith.addf %499, %500 : vector<8x8xf32>
    %cst_234 = arith.constant dense<0xFF800000> : vector<8xf32>
    %502 = vector.multi_reduction <maximumf>, %501, %cst_234 [1] : vector<8x8xf32> to vector<8xf32>
    %503 = vector.shape_cast %502 : vector<8xf32> to vector<8x1xf32>
    %504 = vector.broadcast %503 : vector<8x1xf32> to vector<8x8xf32>
    %505 = arith.subf %501, %504 : vector<8x8xf32>
    %506 = math.exp %505 : vector<8x8xf32>
    %cst_235 = arith.constant dense<0.000000e+00> : vector<8xf32>
    %507 = vector.multi_reduction <add>, %506, %cst_235 [1] : vector<8x8xf32> to vector<8xf32>
    %508 = vector.shape_cast %507 : vector<8xf32> to vector<8x1xf32>
    %509 = tpu.reciprocal %508 {approx = true} : vector<8x1xf32> -> vector<8x1xf32>
    %510 = vector.broadcast %509 : vector<8x1xf32> to vector<8x8xf32>
    %511 = arith.mulf %506, %510 : vector<8x8xf32>
    %512 = arith.truncf %511 : vector<8x8xf32> to vector<8x8xbf16>
    %cst_236 = arith.constant dense<0.000000e+00> : vector<8x16xf32>
    %513 = tpu.matmul %512, %496, %cst_236 {dimension_numbers = #tpu.dot_dimension_numbers<[1], [0], [0], [1], [0, 0, 1, 1], [], []>} : vector<8x8xbf16>, vector<8x16xbf16>, vector<8x16xf32> -> vector<8x16xf32>
    %514 = vector.extract_strided_slice %481 {offsets = [0, 16], sizes = [8, 16], strides = [1, 1]} : vector<8x32xf32> to vector<8x16xf32>
    %515 = arith.truncf %514 : vector<8x16xf32> to vector<8x16xbf16>
    %516 = vector.extract_strided_slice %489 {offsets = [0, 16], sizes = [8, 16], strides = [1, 1]} : vector<8x32xf32> to vector<8x16xf32>
    %517 = arith.truncf %516 : vector<8x16xf32> to vector<8x16xbf16>
    %518 = vector.extract_strided_slice %490 {offsets = [0, 16], sizes = [8, 16], strides = [1, 1]} : vector<8x32xf32> to vector<8x16xf32>
    %519 = arith.truncf %518 : vector<8x16xf32> to vector<8x16xbf16>
    %cst_237 = arith.constant dense<0.000000e+00> : vector<8x8xf32>
    %520 = tpu.matmul %515, %517, %cst_237 {dimension_numbers = #tpu.dot_dimension_numbers<[1], [1], [0], [0], [0, 0, 1, 0], [], []>} : vector<8x16xbf16>, vector<8x16xbf16>, vector<8x8xf32> -> vector<8x8xf32>
    %cst_238 = arith.constant 2.500000e-01 : f32
    %521 = vector.broadcast %cst_238 : f32 to vector<8x8xf32>
    %522 = arith.mulf %520, %521 : vector<8x8xf32>
    %523 = vector.broadcast %19 : vector<1x8xf32> to vector<8x8xf32>
    %524 = arith.addf %522, %523 : vector<8x8xf32>
    %cst_239 = arith.constant dense<0xFF800000> : vector<8xf32>
    %525 = vector.multi_reduction <maximumf>, %524, %cst_239 [1] : vector<8x8xf32> to vector<8xf32>
    %526 = vector.shape_cast %525 : vector<8xf32> to vector<8x1xf32>
    %527 = vector.broadcast %526 : vector<8x1xf32> to vector<8x8xf32>
    %528 = arith.subf %524, %527 : vector<8x8xf32>
    %529 = math.exp %528 : vector<8x8xf32>
    %cst_240 = arith.constant dense<0.000000e+00> : vector<8xf32>
    %530 = vector.multi_reduction <add>, %529, %cst_240 [1] : vector<8x8xf32> to vector<8xf32>
    %531 = vector.shape_cast %530 : vector<8xf32> to vector<8x1xf32>
    %532 = tpu.reciprocal %531 {approx = true} : vector<8x1xf32> -> vector<8x1xf32>
    %533 = vector.broadcast %532 : vector<8x1xf32> to vector<8x8xf32>
    %534 = arith.mulf %529, %533 : vector<8x8xf32>
    %535 = arith.truncf %534 : vector<8x8xf32> to vector<8x8xbf16>
    %cst_241 = arith.constant dense<0.000000e+00> : vector<8x16xf32>
    %536 = tpu.matmul %535, %519, %cst_241 {dimension_numbers = #tpu.dot_dimension_numbers<[1], [0], [0], [1], [0, 0, 1, 1], [], []>} : vector<8x8xbf16>, vector<8x16xbf16>, vector<8x16xf32> -> vector<8x16xf32>
    %537 = tpu.concatenate %513, %536 in 1 : vector<8x16xf32>, vector<8x16xf32> -> vector<8x32xf32>
    %538 = arith.truncf %537 : vector<8x32xf32> to vector<8x32xbf16>
    %c0_242 = arith.constant 0 : index
    %c3_243 = arith.constant 3 : index
    %c0_244 = arith.constant 0 : index
    %c0_245 = arith.constant 0 : index
    %539 = vector.load %arg6[%c0_242, %c3_243, %c0_244, %c0_245] : memref<1x4x32x32xf32, #tpu.memory_space<vmem>>, vector<1x1x32x32xf32>
    %540 = vector.shape_cast %539 : vector<1x1x32x32xf32> to vector<32x32xf32>
    %541 = arith.truncf %540 : vector<32x32xf32> to vector<32x32xbf16>
    %cst_246 = arith.constant dense<0.000000e+00> : vector<8x32xf32>
    %542 = tpu.matmul %538, %541, %cst_246 {dimension_numbers = #tpu.dot_dimension_numbers<[1], [0], [0], [1], [0, 0, 1, 1], [], []>} : vector<8x32xbf16>, vector<32x32xbf16>, vector<8x32xf32> -> vector<8x32xf32>
    %c0_247 = arith.constant 0 : index
    %c3_248 = arith.constant 3 : index
    %c0_249 = arith.constant 0 : index
    %c0_250 = arith.constant 0 : index
    %543 = vector.load %arg7[%c0_247, %c3_248, %c0_249, %c0_250] : memref<1x4x1x32xf32, #tpu.memory_space<vmem>>, vector<1x1x1x32xf32>
    %544 = vector.shape_cast %543 : vector<1x1x1x32xf32> to vector<1x32xf32>
    %545 = vector.broadcast %544 : vector<1x32xf32> to vector<8x32xf32>
    %546 = arith.addf %542, %545 : vector<8x32xf32>
    %547 = arith.addf %546, %10 : vector<8x32xf32>
    %c0_251 = arith.constant 0 : index
    %c3_252 = arith.constant 3 : index
    %c0_253 = arith.constant 0 : index
    %c0_254 = arith.constant 0 : index
    %548 = vector.load %arg8[%c0_251, %c3_252, %c0_253, %c0_254] : memref<1x4x1x32xf32, #tpu.memory_space<vmem>>, vector<1x1x1x32xf32>
    %549 = vector.shape_cast %548 : vector<1x1x1x32xf32> to vector<1x32xf32>
    %c0_255 = arith.constant 0 : index
    %c3_256 = arith.constant 3 : index
    %c0_257 = arith.constant 0 : index
    %c0_258 = arith.constant 0 : index
    %550 = vector.load %arg9[%c0_255, %c3_256, %c0_257, %c0_258] : memref<1x4x1x32xf32, #tpu.memory_space<vmem>>, vector<1x1x1x32xf32>
    %551 = vector.shape_cast %550 : vector<1x1x1x32xf32> to vector<1x32xf32>
    %cst_259 = arith.constant dense<0.000000e+00> : vector<8xf32>
    %552 = vector.multi_reduction <add>, %547, %cst_259 [1] : vector<8x32xf32> to vector<8xf32>
    %553 = vector.shape_cast %552 : vector<8xf32> to vector<8x1xf32>
    %cst_260 = arith.constant 3.200000e+01 : f32
    %554 = vector.broadcast %cst_260 : f32 to vector<8x1xf32>
    %555 = arith.divf %553, %554 : vector<8x1xf32>
    %556 = vector.broadcast %555 : vector<8x1xf32> to vector<8x32xf32>
    %557 = arith.subf %547, %556 : vector<8x32xf32>
    %558 = arith.mulf %557, %557 : vector<8x32xf32>
    %cst_261 = arith.constant dense<0.000000e+00> : vector<8xf32>
    %559 = vector.multi_reduction <add>, %558, %cst_261 [1] : vector<8x32xf32> to vector<8xf32>
    %560 = vector.shape_cast %559 : vector<8xf32> to vector<8x1xf32>
    %cst_262 = arith.constant 3.200000e+01 : f32
    %561 = vector.broadcast %cst_262 : f32 to vector<8x1xf32>
    %562 = arith.divf %560, %561 : vector<8x1xf32>
    %563 = vector.broadcast %555 : vector<8x1xf32> to vector<8x32xf32>
    %564 = arith.subf %547, %563 : vector<8x32xf32>
    %cst_263 = arith.constant 9.99999974E-6 : f32
    %565 = vector.broadcast %cst_263 : f32 to vector<8x1xf32>
    %566 = arith.addf %562, %565 : vector<8x1xf32>
    %567 = math.rsqrt %566 : vector<8x1xf32>
    %568 = vector.broadcast %567 : vector<8x1xf32> to vector<8x32xf32>
    %569 = arith.mulf %564, %568 : vector<8x32xf32>
    %570 = vector.broadcast %549 : vector<1x32xf32> to vector<8x32xf32>
    %571 = arith.mulf %569, %570 : vector<8x32xf32>
    %572 = vector.broadcast %551 : vector<1x32xf32> to vector<8x32xf32>
    %573 = arith.addf %571, %572 : vector<8x32xf32>
    %574 = vector.broadcast %23 : vector<8x1xf32> to vector<8x32xf32>
    %575 = arith.mulf %573, %574 : vector<8x32xf32>
    %576 = arith.truncf %575 : vector<8x32xf32> to vector<8x32xbf16>
    %c0_264 = arith.constant 0 : index
    %c3_265 = arith.constant 3 : index
    %c0_266 = arith.constant 0 : index
    %c0_267 = arith.constant 0 : index
    %577 = vector.load %arg10[%c0_264, %c3_265, %c0_266, %c0_267] : memref<1x4x32x64xf32, #tpu.memory_space<vmem>>, vector<1x1x32x64xf32>
    %578 = vector.shape_cast %577 : vector<1x1x32x64xf32> to vector<32x64xf32>
    %579 = arith.truncf %578 : vector<32x64xf32> to vector<32x64xbf16>
    %cst_268 = arith.constant dense<0.000000e+00> : vector<8x64xf32>
    %580 = tpu.matmul %576, %579, %cst_268 {dimension_numbers = #tpu.dot_dimension_numbers<[1], [0], [0], [1], [0, 0, 1, 1], [], []>} : vector<8x32xbf16>, vector<32x64xbf16>, vector<8x64xf32> -> vector<8x64xf32>
    %c0_269 = arith.constant 0 : index
    %c3_270 = arith.constant 3 : index
    %c0_271 = arith.constant 0 : index
    %c0_272 = arith.constant 0 : index
    %581 = vector.load %arg11[%c0_269, %c3_270, %c0_271, %c0_272] : memref<1x4x1x64xf32, #tpu.memory_space<vmem>>, vector<1x1x1x64xf32>
    %582 = vector.shape_cast %581 : vector<1x1x1x64xf32> to vector<1x64xf32>
    %583 = vector.broadcast %582 : vector<1x64xf32> to vector<8x64xf32>
    %584 = arith.addf %580, %583 : vector<8x64xf32>
    %cst_273 = arith.constant 0.000000e+00 : f32
    %585 = vector.broadcast %cst_273 : f32 to vector<8x64xf32>
    %586 = arith.maximumf %584, %585 : vector<8x64xf32>
    %587 = arith.truncf %586 : vector<8x64xf32> to vector<8x64xbf16>
    %c0_274 = arith.constant 0 : index
    %c3_275 = arith.constant 3 : index
    %c0_276 = arith.constant 0 : index
    %c0_277 = arith.constant 0 : index
    %588 = vector.load %arg12[%c0_274, %c3_275, %c0_276, %c0_277] : memref<1x4x64x32xf32, #tpu.memory_space<vmem>>, vector<1x1x64x32xf32>
    %589 = vector.shape_cast %588 : vector<1x1x64x32xf32> to vector<64x32xf32>
    %590 = arith.truncf %589 : vector<64x32xf32> to vector<64x32xbf16>
    %cst_278 = arith.constant dense<0.000000e+00> : vector<8x32xf32>
    %591 = tpu.matmul %587, %590, %cst_278 {dimension_numbers = #tpu.dot_dimension_numbers<[1], [0], [0], [1], [0, 0, 1, 1], [], []>} : vector<8x64xbf16>, vector<64x32xbf16>, vector<8x32xf32> -> vector<8x32xf32>
    %c0_279 = arith.constant 0 : index
    %c3_280 = arith.constant 3 : index
    %c0_281 = arith.constant 0 : index
    %c0_282 = arith.constant 0 : index
    %592 = vector.load %arg13[%c0_279, %c3_280, %c0_281, %c0_282] : memref<1x4x1x32xf32, #tpu.memory_space<vmem>>, vector<1x1x1x32xf32>
    %593 = vector.shape_cast %592 : vector<1x1x1x32xf32> to vector<1x32xf32>
    %594 = vector.broadcast %593 : vector<1x32xf32> to vector<8x32xf32>
    %595 = arith.addf %591, %594 : vector<8x32xf32>
    %596 = arith.addf %595, %575 : vector<8x32xf32>
    %c0_283 = arith.constant 0 : index
    %c3_284 = arith.constant 3 : index
    %c0_285 = arith.constant 0 : index
    %c0_286 = arith.constant 0 : index
    %597 = vector.load %arg14[%c0_283, %c3_284, %c0_285, %c0_286] : memref<1x4x1x32xf32, #tpu.memory_space<vmem>>, vector<1x1x1x32xf32>
    %598 = vector.shape_cast %597 : vector<1x1x1x32xf32> to vector<1x32xf32>
    %c0_287 = arith.constant 0 : index
    %c3_288 = arith.constant 3 : index
    %c0_289 = arith.constant 0 : index
    %c0_290 = arith.constant 0 : index
    %599 = vector.load %arg15[%c0_287, %c3_288, %c0_289, %c0_290] : memref<1x4x1x32xf32, #tpu.memory_space<vmem>>, vector<1x1x1x32xf32>
    %600 = vector.shape_cast %599 : vector<1x1x1x32xf32> to vector<1x32xf32>
    %cst_291 = arith.constant dense<0.000000e+00> : vector<8xf32>
    %601 = vector.multi_reduction <add>, %596, %cst_291 [1] : vector<8x32xf32> to vector<8xf32>
    %602 = vector.shape_cast %601 : vector<8xf32> to vector<8x1xf32>
    %cst_292 = arith.constant 3.200000e+01 : f32
    %603 = vector.broadcast %cst_292 : f32 to vector<8x1xf32>
    %604 = arith.divf %602, %603 : vector<8x1xf32>
    %605 = vector.broadcast %604 : vector<8x1xf32> to vector<8x32xf32>
    %606 = arith.subf %596, %605 : vector<8x32xf32>
    %607 = arith.mulf %606, %606 : vector<8x32xf32>
    %cst_293 = arith.constant dense<0.000000e+00> : vector<8xf32>
    %608 = vector.multi_reduction <add>, %607, %cst_293 [1] : vector<8x32xf32> to vector<8xf32>
    %609 = vector.shape_cast %608 : vector<8xf32> to vector<8x1xf32>
    %cst_294 = arith.constant 3.200000e+01 : f32
    %610 = vector.broadcast %cst_294 : f32 to vector<8x1xf32>
    %611 = arith.divf %609, %610 : vector<8x1xf32>
    %612 = vector.broadcast %604 : vector<8x1xf32> to vector<8x32xf32>
    %613 = arith.subf %596, %612 : vector<8x32xf32>
    %cst_295 = arith.constant 9.99999974E-6 : f32
    %614 = vector.broadcast %cst_295 : f32 to vector<8x1xf32>
    %615 = arith.addf %611, %614 : vector<8x1xf32>
    %616 = math.rsqrt %615 : vector<8x1xf32>
    %617 = vector.broadcast %616 : vector<8x1xf32> to vector<8x32xf32>
    %618 = arith.mulf %613, %617 : vector<8x32xf32>
    %619 = vector.broadcast %598 : vector<1x32xf32> to vector<8x32xf32>
    %620 = arith.mulf %618, %619 : vector<8x32xf32>
    %621 = vector.broadcast %600 : vector<1x32xf32> to vector<8x32xf32>
    %622 = arith.addf %620, %621 : vector<8x32xf32>
    %623 = vector.broadcast %23 : vector<8x1xf32> to vector<8x32xf32>
    %624 = arith.mulf %622, %623 : vector<8x32xf32>
    %625 = arith.addf %470, %624 : vector<8x32xf32>
    %c0_296 = arith.constant 0 : index
    %626 = arith.index_cast %1 : i32 to index
    %c0_297 = arith.constant 0 : index
    %627 = vector.load %arg16[%c0_296, %626, %c0_297] : memref<2x16x32xf32, #tpu.memory_space<vmem>>, vector<1x8x32xf32>
    %628 = vector.shape_cast %627 : vector<1x8x32xf32> to vector<8x32xf32>
    %629 = vector.shape_cast %324 : vector<8x32xf32> to vector<1x8x32xf32>
    tpu.vector_store %arg16[%c0_296, %626, %c0_297], %629 {strides = array<i32>} : memref<2x16x32xf32, #tpu.memory_space<vmem>>, vector<1x8x32xf32>,
    %c1_298 = arith.constant 1 : index
    %630 = arith.index_cast %1 : i32 to index
    %c0_299 = arith.constant 0 : index
    %631 = vector.load %arg16[%c1_298, %630, %c0_299] : memref<2x16x32xf32, #tpu.memory_space<vmem>>, vector<1x8x32xf32>
    %632 = vector.shape_cast %631 : vector<1x8x32xf32> to vector<8x32xf32>
    %633 = vector.shape_cast %625 : vector<8x32xf32> to vector<1x8x32xf32>
    tpu.vector_store %arg16[%c1_298, %630, %c0_299], %633 {strides = array<i32>} : memref<2x16x32xf32, #tpu.memory_space<vmem>>, vector<1x8x32xf32>,
    return
  }
  func.func @transform_0(%arg0: i32, %arg1: i32, %arg2: memref<2xi32, #tpu.memory_space<smem>>) -> (i32, i32, i32) {
    %c0_i32 = arith.constant 0 : i32
    %c0_i32_0 = arith.constant 0 : i32
    %c0_i32_1 = arith.constant 0 : i32
    %c0_i32_2 = arith.constant 0 : i32
    return %c0_i32, %c0_i32_0, %c0_i32_1 : i32, i32, i32
  }
  func.func @transform_1(%arg0: i32, %arg1: i32, %arg2: memref<2xi32, #tpu.memory_space<smem>>) -> (i32, i32, i32, i32) {
    %c0_i32 = arith.constant 0 : i32
    %c0_i32_0 = arith.constant 0 : i32
    %c0_i32_1 = arith.constant 0 : i32
    %c0_i32_2 = arith.constant 0 : i32
    return %arg0, %c0_i32, %c0_i32_0, %c0_i32_1 : i32, i32, i32, i32
  }
  func.func @transform_2(%arg0: i32, %arg1: i32, %arg2: memref<2xi32, #tpu.memory_space<smem>>) -> (i32, i32, i32, i32) {
    %c0_i32 = arith.constant 0 : i32
    %c0_i32_0 = arith.constant 0 : i32
    %c0_i32_1 = arith.constant 0 : i32
    %c0_i32_2 = arith.constant 0 : i32
    return %arg0, %c0_i32, %c0_i32_0, %c0_i32_1 : i32, i32, i32, i32
  }
  func.func @transform_3(%arg0: i32, %arg1: i32, %arg2: memref<2xi32, #tpu.memory_space<smem>>) -> (i32, i32, i32, i32) {
    %c0_i32 = arith.constant 0 : i32
    %c0_i32_0 = arith.constant 0 : i32
    %c0_i32_1 = arith.constant 0 : i32
    %c0_i32_2 = arith.constant 0 : i32
    return %arg0, %c0_i32, %c0_i32_0, %c0_i32_1 : i32, i32, i32, i32
  }
  func.func @transform_4(%arg0: i32, %arg1: i32, %arg2: memref<2xi32, #tpu.memory_space<smem>>) -> (i32, i32, i32, i32) {
    %c0_i32 = arith.constant 0 : i32
    %c0_i32_0 = arith.constant 0 : i32
    %c0_i32_1 = arith.constant 0 : i32
    %c0_i32_2 = arith.constant 0 : i32
    return %arg0, %c0_i32, %c0_i32_0, %c0_i32_1 : i32, i32, i32, i32
  }
  func.func @transform_5(%arg0: i32, %arg1: i32, %arg2: memref<2xi32, #tpu.memory_space<smem>>) -> (i32, i32, i32, i32) {
    %c0_i32 = arith.constant 0 : i32
    %c0_i32_0 = arith.constant 0 : i32
    %c0_i32_1 = arith.constant 0 : i32
    %c0_i32_2 = arith.constant 0 : i32
    return %arg0, %c0_i32, %c0_i32_0, %c0_i32_1 : i32, i32, i32, i32
  }
  func.func @transform_6(%arg0: i32, %arg1: i32, %arg2: memref<2xi32, #tpu.memory_space<smem>>) -> (i32, i32, i32, i32) {
    %c0_i32 = arith.constant 0 : i32
    %c0_i32_0 = arith.constant 0 : i32
    %c0_i32_1 = arith.constant 0 : i32
    %c0_i32_2 = arith.constant 0 : i32
    return %arg0, %c0_i32, %c0_i32_0, %c0_i32_1 : i32, i32, i32, i32
  }
  func.func @transform_7(%arg0: i32, %arg1: i32, %arg2: memref<2xi32, #tpu.memory_space<smem>>) -> (i32, i32, i32, i32) {
    %c0_i32 = arith.constant 0 : i32
    %c0_i32_0 = arith.constant 0 : i32
    %c0_i32_1 = arith.constant 0 : i32
    %c0_i32_2 = arith.constant 0 : i32
    return %arg0, %c0_i32, %c0_i32_0, %c0_i32_1 : i32, i32, i32, i32
  }
  func.func @transform_8(%arg0: i32, %arg1: i32, %arg2: memref<2xi32, #tpu.memory_space<smem>>) -> (i32, i32, i32, i32) {
    %c0_i32 = arith.constant 0 : i32
    %c0_i32_0 = arith.constant 0 : i32
    %c0_i32_1 = arith.constant 0 : i32
    %c0_i32_2 = arith.constant 0 : i32
    return %arg0, %c0_i32, %c0_i32_0, %c0_i32_1 : i32, i32, i32, i32
  }
  func.func @transform_9(%arg0: i32, %arg1: i32, %arg2: memref<2xi32, #tpu.memory_space<smem>>) -> (i32, i32, i32, i32) {
    %c0_i32 = arith.constant 0 : i32
    %c0_i32_0 = arith.constant 0 : i32
    %c0_i32_1 = arith.constant 0 : i32
    %c0_i32_2 = arith.constant 0 : i32
    return %arg0, %c0_i32, %c0_i32_0, %c0_i32_1 : i32, i32, i32, i32
  }
  func.func @transform_10(%arg0: i32, %arg1: i32, %arg2: memref<2xi32, #tpu.memory_space<smem>>) -> (i32, i32, i32, i32) {
    %c0_i32 = arith.constant 0 : i32
    %c0_i32_0 = arith.constant 0 : i32
    %c0_i32_1 = arith.constant 0 : i32
    %c0_i32_2 = arith.constant 0 : i32
    return %arg0, %c0_i32, %c0_i32_0, %c0_i32_1 : i32, i32, i32, i32
  }
  func.func @transform_11(%arg0: i32, %arg1: i32, %arg2: memref<2xi32, #tpu.memory_space<smem>>) -> (i32, i32, i32, i32) {
    %c0_i32 = arith.constant 0 : i32
    %c0_i32_0 = arith.constant 0 : i32
    %c0_i32_1 = arith.constant 0 : i32
    %c0_i32_2 = arith.constant 0 : i32
    return %arg0, %c0_i32, %c0_i32_0, %c0_i32_1 : i32, i32, i32, i32
  }
  func.func @transform_12(%arg0: i32, %arg1: i32, %arg2: memref<2xi32, #tpu.memory_space<smem>>) -> (i32, i32, i32, i32) {
    %c0_i32 = arith.constant 0 : i32
    %c0_i32_0 = arith.constant 0 : i32
    %c0_i32_1 = arith.constant 0 : i32
    %c0_i32_2 = arith.constant 0 : i32
    return %arg0, %c0_i32, %c0_i32_0, %c0_i32_1 : i32, i32, i32, i32
  }
  func.func @transform_13(%arg0: i32, %arg1: i32, %arg2: memref<2xi32, #tpu.memory_space<smem>>) -> (i32, i32, i32) {
    %c0_i32 = arith.constant 0 : i32
    %c0_i32_0 = arith.constant 0 : i32
    %c0_i32_1 = arith.constant 0 : i32
    %c0_i32_2 = arith.constant 0 : i32
    return %c0_i32, %c0_i32_0, %c0_i32_1 : i32, i32, i32
  }
}

</mosaic_0001>

<bundles_post_ra>
// kernel: tpu_custom_call.1
= control target key start
LH: loop header
LB: loop body
LE: loop exit
PB: predicated region body
PF: predicated region fallthrough
CT: control target
= control target key end

     0   :  { %s5125_s0 = inlined_call_operand.hbm [shape: s32[2], index: 0, kind: input, shape index: {}]   ;;  %s5126_s1 = inlined_call_operand.hbm [shape: f32[2,16,32], index: 1, kind: input, shape index: {}]   ;;  %s5127_s2 = inlined_call_operand.vmem [shape: f32[2,4,32,96], index: 2, kind: input, shape index: {}]   ;;  %s5128_s3 = inlined_call_operand.vmem [shape: f32[2,4,1,96], index: 3, kind: input, shape index: {}]   ;;  %s5129_s4 = inlined_call_operand.vmem [shape: f32[2,4,32,32], index: 4, kind: input, shape index: {}]   ;;  %s5130_s5 = inlined_call_operand.hbm [shape: f32[2,4,1,32], index: 5, kind: input, shape index: {}]   ;;  %s5131_s6 = inlined_call_operand.vmem [shape: f32[2,4,1,32], index: 6, kind: input, shape index: {}]   ;;  %s5132_s7 = inlined_call_operand.hbm [shape: f32[2,4,1,32], index: 7, kind: input, shape index: {}]   ;;  %s5133_s8 = inlined_call_operand.vmem [shape: f32[2,4,32,64], index: 8, kind: input, shape index: {}]   ;;  %s5134_s9 = inlined_call_operand.vmem [shape: f32[2,4,1,64], index: 9, kind: input, shape index: {}]   ;;  %s5135_s10 = inlined_call_operand.vmem [shape: f32[2,4,64,32], index: 10, kind: input, shape index: {}]   ;;  %s5136_s11 = inlined_call_operand.vmem [shape: f32[2,4,1,32], index: 11, kind: input, shape index: {}]   ;;  %s5137_s12 = inlined_call_operand.vmem [shape: f32[2,4,1,32], index: 12, kind: input, shape index: {}]   ;;  %s5138_s13 = inlined_call_operand.hbm [shape: f32[2,4,1,32], index: 13, kind: input, shape index: {}]   ;;  %s5139_s14 = inlined_call_operand.hbm [shape: f32[2,16,32], index: 14, kind: output, shape index: {}]  }
   0x1   :  { %5161 = sst [smem:[#allocation27_spill]] %s5126_s1  ;;  %s3962_s15 = scalar_lea.hbm %s5125_s0, 16 }
   0x2   :  { %5162 = sst [smem:[#allocation28_spill]] %s5127_s2  ;;  %p3963_p0 = scmp.ne.s32.totalorder %s5125_s0, %s3962_s15 }
   0x3   :  { %5163 = sst [smem:[#allocation29_spill]] %s5128_s3  ;;  %p3966_p1 = scmp.lt.u32.totalorder %s3962_s15, %s5125_s0 }
   0x4   :  { %5164 = sst [smem:[#allocation30_spill]] %s5129_s4 }
   0x5   :  { %5165 = sst [smem:[#allocation31_spill]] %s5130_s5  ;;  %p3968_p2 = pnand %p3966_p1, %p3963_p0 }
   0x6   :  { %5166 = sst [smem:[#allocation32_spill]] %s5131_s6 }
   0x7   :  { %5167 = sst [smem:[#allocation33_spill]] %s5132_s7 }
   0x8   :  { %5168 = sst [smem:[#allocation34_spill]] %s5133_s8 }
   0x9   :  { %5169 = sst [smem:[#allocation35_spill]] %s5134_s9 }
   0xa   :  { %5170 = sst [smem:[#allocation36_spill]] %s5135_s10 }
   0xb   :  { %5171 = sst [smem:[#allocation37_spill]] %s5136_s11 }
   0xc   :  { %5172 = sst [smem:[#allocation38_spill]] %s5137_s12 }
   0xd   :  { %5173 = sst [smem:[#allocation39_spill]] %s5138_s13 }
   0xe   :  { %5174 = sst [smem:[#allocation40_spill]] %s5139_s14 }
   0xf   :  { %3971 = shalt.err (!%p3968_p2)  }
  0x10   :  { %s4198_s20 = smov [#allocation3]  }
  0x11   :  { %20 = dma.hbm_to_smem %s5125_s0, 16, %s4198_s20, [#allocation2] }
  0x12   :  { %4148 = dma.done.wait [#allocation2], 16 }
  0x13   :  { %4149 = vsyncadd [#allocation2], 4294967280 }
  0x14   :  { %22 = sfence }
  0x15   :  { %23 = vsyncpa [#allocation5], 0 }
  0x16   :  { %24 = vsyncpa [#allocation8], 0 }
  0x17   :  { %26 = vsyncpa [#allocation8 + $0x1], 0 }
  0x18   :  { %27 = vsyncpa [#allocation11], 0 }
  0x19   :  { %29 = vsyncpa [#allocation11 + $0x1], 0 }
  0x1a   :  { %30 = vsyncpa [#allocation6], 0  ;;  %s4306_s23 = smov 0   ;;  %s4308_s24 = smov 0  }
  0x1b   :  { %s4310_s25 = smov 0   ;;  %s4312_s26 = smov 0  }
  0x1c   :  { %s4314_s27 = smov 0   ;;  %s4316_s0 = smov 0  }
  0x1d   :  { %s4318_s28 = smov 0   ;;  %s4320_s29 = smov 0  }
  0x1e LB: > { %5175 = sst [smem:[#allocation18_spill]] %s4172_s24  ;;  %s45_s30 = sadd.s32 1, %s4188_s0  ;;  %s4196_s29 = sphi %s4320_s29, %s36_s29   ;;  %s4192_s28 = sphi %s4318_s28, %s5223_s28   ;;  %s4188_s0 = sphi %s4316_s0, %s5222_s0   ;;  %s4184_s27 = sphi %s4314_s27, %s5221_s27   ;;  %s4180_s26 = sphi %s4312_s26, %s5220_s26   ;;  %s4176_s25 = sphi %s4310_s25, %s5219_s25   ;;  %s4172_s24 = sphi %s4308_s24, %s5218_s24   ;;  %s4168_s23 = sphi %s4306_s23, %s5217_s23  }
  0x1f   : > { %5176 = sst [smem:[#allocation19_spill]] %s4176_s25  ;;  %s48_s15 = sadd.s32 1, %s4192_s28 }
  0x20   : > { %5177 = sst [smem:[#allocation20_spill]] %s4188_s0  ;;  %p46_p3 = scmp.ge.s32.totalorder %s45_s30, 2 }
  0x21   : > { %5178 = sst [smem:[#allocation21_spill]] %s4192_s28  ;;  %s154_s16 = sadd.s32 1, %s4176_s25 }
  0x22   : > { %5179 = sst [smem:[#allocation22_spill]] %s4196_s29  ;;  %p161_p4 = scmp.ne.s32.totalorder %s4176_s25, %s4172_s24 }
  0x23   : > { %p162_p5 = scmp.eq.s32.totalorder %s4196_s29, 0  ;;  %s5225_s30 = smov (%p46_p3, %s45_s30), 0 }
  0x24   : > { %5180 = sst [smem:[#allocation23_spill]] %s5225_s30  ;;  %s5227_s15 = smov (!%p46_p3, %s48_s15), %s4192_s28 }
  0x25   : > { %p4355_p6 = por %p162_p5, %p161_p4  ;;  %p50_p7 = scmp.ge.s32.totalorder %s5227_s15, 2 }
  0x26   : > { %p3827_p8 = scmp.lt.s32.totalorder %s4196_s29, 4  ;;  %s456_s18 = sand.u32 1, %s4196_s29  }
  0x27   : > { %s5142_s19 = sand.u32 1, %s4176_s25   ;;  %s5229_s15 = smov (%p50_p7, %s5227_s15), 0 }
  0x28   : > { %5182 = sst [smem:[#allocation24_spill]] %s5229_s15  ;;  %s4366_s20 = sshll.u32 %s5142_s19, 2 }
  0x29   : > { %s151_s21 = ssub.s32 %s4192_s28, %s5229_s15  ;;  %s4371_s22 = sshll.u32 %s4192_s28, 6 }
  0x2a   : > { %p152_p9 = scmp.eq.s32.totalorder %s151_s21, 0  ;;  %s5183_s5 = sld [smem:[#allocation31_spill]] }
  0x2b   : > { %s460_s12 = scalar_lea.vmem [#allocation7], %s4366_s20  ;;  %p4389_p10 = pnand %p3827_p8, %p4355_p6 }
  0x2c   : > { %s467_s10 = sshll.u32 %s460_s12, 4  ;;  %s4393_s0 = scalar_lea.sflag [#allocation8], %s456_s18  ;;  %s4383_s10 = int_to_ptr.vmem [resolvable:$true] %s467_s10 }
  0x2d   : > { %s4381_s11 = scalar_select %p152_p9, %s4176_s25, %s154_s16  }
  0x2e   : > { %s5185_s21 = scalar_select %p4389_p10, 1, 0 }
  0x2f   : > { %5184 = sst [smem:[#allocation25_spill]] %s4381_s11  ;;  %p4399_p12 = pneg %p4389_p10 }
  0x30   : > { %s4377_s14 = scalar_lea.hbm %s5183_s5, %s4371_s22  ;;  %s3977_s17 = scalar_lea.hbm %s5183_s5, 128 }
  0x31   : > { %s3972_s30 = scalar_lea.hbm %s4377_s14, 64  ;;  %p3978_p1 = scmp.lt.u32.totalorder %s4377_s14, %s5183_s5 }
  0x32   : > { %p3973_p11 = scmp.ne.s32.totalorder %s4377_s14, %s3972_s30  ;;  %p3979_p2 = scmp.lt.u32.totalorder %s3977_s17, %s3972_s30 }
  0x33   : > { %s5186_s19 = scalar_select %p4399_p12, 1, 0 }
  0x34   : > { %p3975_p13 = pnand %p4399_p12, %p3973_p11  ;;  %p3980_p3 = por %p3979_p2, %p3978_p1 }
  0x35   : > { %p3981_p4 = scmp.lt.u32.totalorder %s3972_s30, %s4377_s14 }
  0x36   : > { %p3976_p0 = pneg %p3975_p13 }
  0x37   : > { %p3982_p5 = por %p3981_p4, %p3980_p3 }
  0x39   : > { %p3983_p6 = pnand %p3982_p5, %p3976_p0 }
  0x3b   : > { %3986 = shalt.err (!%p3983_p6)
}
  0x3c   : > { %s3987_s18 = scalar_lea.vmem %s4383_s10, 64  ;;  %s4199_s12 = smov [#allocation7]  }
  0x3d   : > { %p3988_p7 = scmp.ne.s32.totalorder %s4383_s10, %s3987_s18  ;;  %s3992_s16 = sshll.u32 %s4199_s12, 4  ;;  %s3993_s16 = int_to_ptr.vmem [resolvable:$false] %s3992_s16 }
  0x3e   : > { %s3994_s28 = scalar_lea.vmem %s3993_s16, 128  ;;  %p3995_p11 = scmp.lt.s32.totalorder %s4383_s10, %s3993_s16 }
  0x3f   : > { %p3990_p8 = pnand %p3988_p7, %p4399_p12  ;;  %p3996_p13 = scmp.lt.s32.totalorder %s3994_s28, %s3987_s18 }
  0x41   : > { %p3991_p9 = pneg %p3990_p8  ;;  %p3997_p1 = por %p3996_p13, %p3995_p11 }
  0x43   : > { %p3998_p2 = pnand %p3997_p1, %p3991_p9 }
  0x45   : > { %4001 = shalt.err (!%p3998_p2)
}
  0x46   : > { %s5145_s15 = smov 16   ;;  %s5147_s30 = smov 1  }
  0x47   : > { %3819 = dma.hbm_to_vmem [thread:$0]  (!%p4389_p10), %s4377_s14, 64, %s4383_s10, %s4393_s0, %s5145_s15, %s5145_s15, %s5147_s30  }
  0x48   : > { %s4427_s17 = sadd.s32 4294967295, %s4196_s29   ;;  %p167_p0 = scmp.ne.s32.totalorder %s4172_s24, %s4168_s23 }
  0x49   : > { %5187 = sst [smem:[#allocation26_spill]] %s4427_s17  ;;  %p5150_p3 = scmp.eq.s32.totalorder %s4427_s17, 0 }
  0x4a   : > { %p3247_p4 = scmp.ge.s32.totalorder %s4196_s29, 1  ;;  %p407_p5 = scmp.lt.s32.totalorder %s4196_s29, 5 }
  0x4b   : > { %p4436_p6 = por %p5150_p3, %p167_p0  ;;  %s4202_s10 = smov [#allocation4]  }
  0x4c   : > { %p4440_p7 = pnand %p3247_p4, %p407_p5  ;;  %s419_s14 = sshll.u32 %s4202_s10, 4  ;;  %s420_s14 = int_to_ptr.vmem [resolvable:$true] %s419_s14 }
  0x4d   : > { %s5188_s18 = scalar_select %p4436_p6, 1, 0 }
  0x4e   : > { %s5189_s12 = scalar_select %p4440_p7, 1, 0 }
  0x4f   : > { %p3812_p8 = pneg %p4440_p7  ;;  %s5191_s7 = sld [smem:[#allocation33_spill]] }
  0x50   : > { %s488_s30 = scalar_lea.vmem [#allocation9], %s4366_s20  ;;  %s5192_s1 = sld [smem:[#allocation27_spill]] }
  0x51   : > { %p4448_p9 = pnand %p3812_p8, %p5150_p3  ;;  %s495_s5 = sshll.u32 %s488_s30, 4  ;;  %s4459_s5 = int_to_ptr.vmem [resolvable:$true] %s495_s5 }
  0x53   : > { %p4004_p13 = pneg %p4448_p9 }
  0x55   : > { %s4456_s15 = scalar_lea.hbm %s5191_s7, %s4371_s22 }
  0x56   : > { %s4002_s29 = scalar_lea.hbm %s5192_s1, 512 }
  0x57   : > { %p4003_p11 = scmp.ne.s32.totalorder %s5192_s1, %s4002_s29  ;;  %p4009_p0 = scmp.lt.u32.totalorder %s4002_s29, %s5192_s1 }
  0x59   : > { %p4005_p1 = pnand %p4004_p13, %p4003_p11 }
  0x5b   : > { %p4006_p2 = pneg %p4005_p1 }
  0x5d   : > { %p4011_p4 = pnand %p4009_p0, %p4006_p2 }
  0x5f   : > { %4014 = shalt.err (!%p4011_p4)
}
  0x60   : > { %s4015_s30 = scalar_lea.vmem %s420_s14, 512  ;;  %p4023_p6 = scmp.lt.s32.totalorder %s420_s14, %s420_s14 }
  0x61   : > { %p4016_p5 = scmp.ne.s32.totalorder %s420_s14, %s4015_s30  ;;  %p4024_p7 = scmp.lt.s32.totalorder %s4015_s30, %s4015_s30 }
  0x63   : > { %p4018_p8 = pnand %p4016_p5, %p4004_p13  ;;  %p4025_p10 = por %p4024_p7, %p4023_p6 }
  0x65   : > { %p4019_p3 = pneg %p4018_p8 }
  0x67   : > { %p4026_p12 = pnand %p4025_p10, %p4019_p3 }
  0x69   : > { %4029 = shalt.err (!%p4026_p12)
}
  0x6a   : > { %s4203_s8 = smov 128   ;;  %s4204_s9 = smov 8  }
  0x6b   : > { %3815 = dma.hbm_to_vmem [thread:$0]  (!%p4448_p9), %s5192_s1, 512, %s420_s14, [#allocation5], %s4203_s8, %s4203_s8, %s4204_s9  }
  0x6c   : > { %s4030_s10 = scalar_lea.hbm %s4456_s15, 64  ;;  %p5193_p13 = scmp.ne.s32.totalorder %s5186_s19, 0 }
  0x6d   : > { %p4031_p11 = scmp.ne.s32.totalorder %s4456_s15, %s4030_s10  ;;  %s4035_s30 = scalar_lea.hbm %s5191_s7, 128 }
  0x6e   : > { %p4036_p10 = scmp.lt.u32.totalorder %s4456_s15, %s5191_s7  ;;  %p4037_p12 = scmp.lt.u32.totalorder %s4035_s30, %s4030_s10 }
  0x6f   : > { %p4033_p1 = pnand %p4031_p11, %p5193_p13  ;;  %p4039_p7 = scmp.lt.u32.totalorder %s4030_s10, %s4456_s15 }
  0x70   : > { %p4038_p3 = por %p4037_p12, %p4036_p10 }
  0x71   : > { %p4034_p6 = pneg %p4033_p1 }
  0x72   : > { %p4040_p2 = por %p4039_p7, %p4038_p3 }
  0x74   : > { %p4041_p0 = pnand %p4040_p2, %p4034_p6 }
  0x76   : > { %4044 = shalt.err (!%p4041_p0)
}
  0x77   : > { %s4045_s14 = scalar_lea.vmem %s4459_s5, 64  ;;  %s4205_s23 = smov [#allocation9]  }
  0x78   : > { %p4046_p9 = scmp.ne.s32.totalorder %s4459_s5, %s4045_s14  ;;  %s4050_s8 = sshll.u32 %s4205_s23, 4  ;;  %s4051_s8 = int_to_ptr.vmem [resolvable:$false] %s4050_s8 }
  0x79   : > { %s4052_s4 = scalar_lea.vmem %s4051_s8, 128  ;;  %p4053_p8 = scmp.lt.s32.totalorder %s4459_s5, %s4051_s8 }
  0x7a   : > { %p4048_p4 = pnand %p4046_p9, %p5193_p13  ;;  %p4054_p11 = scmp.lt.s32.totalorder %s4052_s4, %s4045_s14 }
  0x7c   : > { %p4049_p5 = pneg %p4048_p4  ;;  %p4055_p1 = por %p4054_p11, %p4053_p8 }
  0x7e   : > { %p4056_p10 = pnand %p4055_p1, %p4049_p5 }
  0x80   : > { %4059 = shalt.err (!%p4056_p10)
}
  0x81   : > { %p5194_p6 = scmp.ne.s32.totalorder %s5185_s21, 0  ;;  %s5195_s6 = smov 1  }
  0x82   : > { %s5196_s9 = smov 16   ;;  %s5197_s13 = sld [smem:[#allocation39_spill]] }
  0x83   : > { %3822 = dma.hbm_to_vmem [thread:$0]  (!%p5194_p6), %s4456_s15, 64, %s4459_s5, %s4393_s0, %s5196_s9, %s5196_s9, %s5195_s6  }
  0x84   : > { %s546_s16 = scalar_lea.vmem [#allocation10], %s4366_s20  ;;  %s5198_s30 = sand.u32 1, %s4176_s25  }
  0x85   : > { %s553_s28 = sshll.u32 %s546_s16, 4  ;;  %s4513_s14 = scalar_lea.sflag [#allocation11], %s5198_s30  ;;  %s4509_s28 = int_to_ptr.vmem [resolvable:$true] %s553_s28 }
  0x88   : > { %s4506_s10 = scalar_lea.hbm %s5197_s13, %s4371_s22  ;;  %s4065_s22 = scalar_lea.hbm %s5197_s13, 128 }
  0x89   : > { %s4060_s23 = scalar_lea.hbm %s4506_s10, 64  ;;  %p4066_p2 = scmp.lt.u32.totalorder %s4506_s10, %s5197_s13 }
  0x8a   : > { %p4061_p12 = scmp.ne.s32.totalorder %s4506_s10, %s4060_s23  ;;  %p4067_p0 = scmp.lt.u32.totalorder %s4065_s22, %s4060_s23 }
  0x8b   : > { %p4069_p4 = scmp.lt.u32.totalorder %s4060_s23, %s4506_s10 }
  0x8c   : > { %p4063_p3 = pnand %p4061_p12, %p5193_p13  ;;  %p4068_p9 = por %p4067_p0, %p4066_p2 }
  0x8e   : > { %p4064_p7 = pneg %p4063_p3  ;;  %p4070_p5 = por %p4069_p4, %p4068_p9 }
  0x90   : > { %p4071_p8 = pnand %p4070_p5, %p4064_p7 }
  0x92   : > { %4074 = shalt.err (!%p4071_p8)
}
  0x93   : > { %s4075_s20 = scalar_lea.vmem %s4509_s28, 64  ;;  %s4206_s4 = smov [#allocation10]  }
  0x94   : > { %p4076_p11 = scmp.ne.s32.totalorder %s4509_s28, %s4075_s20  ;;  %s4080_s11 = sshll.u32 %s4206_s4, 4  ;;  %s4081_s11 = int_to_ptr.vmem [resolvable:$false] %s4080_s11 }
  0x95   : > { %s4082_s29 = scalar_lea.vmem %s4081_s11, 128  ;;  %p4083_p12 = scmp.lt.s32.totalorder %s4509_s28, %s4081_s11 }
  0x96   : > { %p4078_p1 = pnand %p4076_p11, %p5193_p13  ;;  %p4084_p3 = scmp.lt.s32.totalorder %s4082_s29, %s4075_s20 }
  0x98   : > { %p4079_p10 = pneg %p4078_p1  ;;  %p4085_p2 = por %p4084_p3, %p4083_p12 }
  0x9a   : > { %p4086_p0 = pnand %p4085_p2, %p4079_p10 }
  0x9c   : > { %4089 = shalt.err (!%p4086_p0)
}
  0x9d   : > { %3825 = dma.hbm_to_vmem [thread:$0]  (!%p5194_p6), %s4506_s10, 64, %s4509_s28, %s4513_s14, %s5196_s9, %s5196_s9, %s5195_s6  }
  0x9e   : > { %p5199_p13 = scmp.ne.s32.totalorder %s5189_s12, 0 }
  0x9f   : > { %p5200_p7 = scmp.eq.s32.totalorder (!%p5199_p13), %s4427_s17, 0 }
  0xa0   : > { %565 = sbr.rel (%p5199_p13) target bundleno = 7971 (0x1f23), region = 72 }
  0xa7   : > { %4151 = dma.done.wait (%p5200_p7), [#allocation5], 512   ;;  %p5201_p9 = pmov %p5200_p7 }
  0xa8   : > { %s571_s19 = sand.u32 1, %s4427_s17   ;;  %s573_s21 = sand.u32 1, %s4172_s24  }
  0xa9   : > { %4153 = vsyncadd (%p5201_p9), [#allocation5], 4294966784  ;;  %s3261_s16 = sshll.u32 %s573_s21, 2  ;;  %s572_s30 = scalar_lea.sflag [#allocation8], %s571_s19 }
  0xaa   : > { %s4548_s23 = scalar_lea.vmem [#allocation7], %s3261_s16  ;;  %p5202_p4 = scmp.ne.s32.totalorder %s5188_s18, 0 }
  0xac   : > { %4155 = dma.done.wait (%p5202_p4), %s572_s30, 128  }
  0xad   : > { %4157 = vsyncadd (%p5202_p4), %s572_s30, 4294967168  ;;  %s4554_s12 = scalar_lea.vmem [#allocation9], %s3261_s16  ;;  %s590_s6 = scalar_lea.sflag [#allocation11], %s573_s21 }
  0xae   : > { %s4556_s9 = scalar_lea.vmem [#allocation10], %s3261_s16 }
  0xaf   : > { %4159 = dma.done.wait (%p5202_p4), %s590_s6, 64  }
  0xb0   : > { %4161 = vsyncadd (%p5202_p4), %s590_s6, 4294967232  ;;  %p681_p6 = scmp.lt.s32.totalorder %s4184_s27, 1  ;;  %s4564_s10 = sshll.u32 %s4180_s26, 3 }
  0xb1   : > { %s5203_s2 = sld [smem:[#allocation28_spill]]  ;;  %s5204_s3 = sld [smem:[#allocation29_spill]] }
  0xb2   : > { %s682_s28 = scalar_select %p681_p6, %s4184_s27, 1 }
  0xb3   : > { %s5205_s29 = sld [smem:[#allocation30_spill]]  ;;  %s5206_s30 = sld [smem:[#allocation32_spill]] }
  0xb4   : > { %s3444_s14 = sshll.u32 %s682_s28, 7  ;;  %s3266_s5 = sshll.u32 %s682_s28, 2 }
  0xb5   : > { %s5207_s0 = sld [smem:[#allocation34_spill]]  ;;  %s5208_s8 = sld [smem:[#allocation35_spill]] }
  0xb6   : > { %s5209_s11 = sld [smem:[#allocation37_spill]]  ;;  %s5210_s16 = sld [smem:[#allocation36_spill]] }
  0xb7   : > { %s4570_s15 = scalar_lea.vmem %s5203_s2, %s3444_s14  ;;  %s4575_s4 = scalar_lea.vmem %s5204_s3, %s3266_s5 }
  0xb8   : > { %s3447_s3 = sshll.u32 %s682_s28, 8  ;;  %s5211_s7 = sld [smem:[#allocation38_spill]] }
  0xb9   : > { %s4580_s19 = scalar_lea.vmem %s5205_s29, %s3444_s14  ;;  %s4585_s6 = scalar_lea.vmem %s5206_s30, %s3266_s5 }
  0xba   : > { %p3278_p5 = scmp.ne.s32.totalorder %s4184_s27, 0 }
  0xbb   : > { %s4590_s22 = scalar_lea.vmem %s5207_s0, %s3444_s14  ;;  %s4595_s20 = scalar_lea.vmem %s5208_s8, %s3266_s5  ;;  %vm730_vm0 = vcmask (!%p3278_p5), 261120  }
  0xbc   : > { %s4600_s29 = scalar_lea.vmem %s5209_s11, %s3266_s5  ;;  %s4605_s30 = scalar_lea.vmem %s5210_s16, %s3447_s3 }
  0xbd   : > { %726 = sbr.rel (%p3278_p5) target bundleno = 196 (0xc4), region = 92  ;;  %s727_s2 = scalar_lea.vmem (!%p3278_p5), [#allocation4], %s4564_s10 }
  0xbe   : > { %s4610_s14 = scalar_lea.vmem %s5211_s7, %s3266_s5  ;;  %v728_v0 = vld [vmem:[%s727_s2] sm:$0xff] (!%p3278_p5)  ;;  %v3280_v1 = vld [vmem:[%s727_s2 + $0x10] sm:$0xff] (!%p3278_p5)  ;;  %s729_s13 = scalar_lea.vmem (!%p3278_p5), [#allocation12], %s4564_s10 }
  0xbf   : > { %731 = vst.msk [vmem:[%s729_s13] sm:$0xff] (!%p3278_p5), %vm730_vm0, %v728_v0  ;;  %3282 = vst.msk [vmem:[%s729_s13 + $0x10] sm:$0xff] (!%p3278_p5), %vm730_vm0, %v3280_v1 }
  0xc4 PF: > { %v753_v2 = vld [vmem:[%s4570_s15] sm:$0xff]  ;;  %v754_v3 = vld [vmem:[%s4570_s15 + $0x8] sm:$0xff]  ;;  %v755_v4 = vld [vmem:[%s4570_s15 + $0x10] sm:$0xff]  ;;  %v4207_v5 = vmov 0.0   ;;  %vm4208_vm1 = vmmov 0   ;;  %s4626_s3 = scalar_lea.vmem [#allocation12], %s4564_s10  ;;  %v743_v23 = vlaneseq }
  0xc5   : > { %3542 = vmatprep.subr.bf16.mxu1 %v4207_v5  ;;  %v759_v6 = vpack.c.bf16 %v754_v3, %v753_v2  ;;  %v756_v7 = vld [vmem:[%s4570_s15 + $0x18] sm:$0xff]  ;;  %3546 = vmatprep.mubr.msk.bf16.mxu1 %vm4208_vm1, %v4207_v5  ;;  %vm767_vm2 = vcmask 261120   ;;  %v3286_v11 = vld [vmem:[%s4575_s4] ss:$0 sm:$0xff]  ;;  %s4209_s24 = smov 112   ;;  %s4210_s25 = smov 96  }
  0xc6   : > { %3556 = vmatprep.subr.bf16.mxu0 %v4207_v5  ;;  %3558 = vmatprep.mubr.msk.bf16.mxu0 %vm4208_vm1, %v4207_v5  ;;  %v760_v8 = vpack.c.bf16 %v756_v7, %v755_v4  ;;  %v4629_v9 = vld [vmem:[%s4626_s3] sm:$0xff]  ;;  %s4211_s27 = smov 80   ;;  %vm815_vm3 = vcmask 130048   ;;  %s742_s17 = sld [smem:[#allocation3 + %s4180_s26]]  ;;  %v746_v24 = vshrl.u32 %v743_v23, 7  ;;  %v744_v27 = vand.u32 127, %v743_v23 }
  0xc7   : > { %3543 = vmatpush3.bf16.msra.mxu1 %v759_v6  ;;  %v4634_v10 = vpack.c.bf16 %v4629_v9, %v4629_v9  ;;  %v4212_v29 = vmov -1e+30   ;;  %vm864_vm6 = vcmask 64512   ;;  %s4213_s26 = smov 64   ;;  %s4214_s10 = smov 48   ;;  %vm882_vm7 = vcmask 1043456  }
  0xc8   : > { %3544 = vmatprep.subr.bf16.mxu1 %v4207_v5  ;;  %v1044_v2 = vld [vmem:[%s4580_s19] sm:$0xff]  ;;  %v1045_v3 = vld [vmem:[%s4580_s19 + $0x8] sm:$0xff]  ;;  %v1046_v6 = vld [vmem:[%s4580_s19 + $0x10] sm:$0xff]  ;;  %s4215_s28 = smov 16   ;;  %vm1210_vm8 = vcmask 523264  }
  0xc9   : > { %v1048_v4 = vpack.c.bf16 %v1045_v3, %v1044_v2  ;;  %v1047_v7 = vld [vmem:[%s4580_s19 + $0x18] sm:$0xff] }
  0xcb   : > { %3545 = vmatpush3.bf16.msra.mxu1 %v760_v8  ;;  %v1049_v8 = vpack.c.bf16 %v1047_v7, %v1046_v6 }
  0xcc   : > { %3550 = vmatprep.subr.bf16.mxu1 %v4207_v5  ;;  %v747_v25 = vstv %s742_s17 }
  0xcd   : > { %vm4662_vm4 = vcmp.lt.s32.totalorder %v746_v24, %v747_v25  ;;  %vm748_vm5 = vcmp.lt.s32.totalorder %v744_v27, %v747_v25 }
  0xce   : > { %3547 = vmatmul.mubr.msk.bf16.vlgmr.msra.gmra.mrb[0].mxu1 %vm767_vm2, %v4634_v10  ;;  %v4666_v30 = vsel %vm748_vm5, 0.0, %v4212_v29 }
  0xcf   : > { %3552 = vmatprep.mubr.msk.bf16.mxu1 %vm4208_vm1, %v4207_v5 }
 0x1a1   : > { %v805_v12 = vpop.f32.mrb[0].mxu1 }
 0x1a2   : > { %v806_v13 = vadd.f32 %v3286_v11, %v805_v12  ;;  %v3548_v14 = vpop.f32.mrb[1].mxu1 }
 0x1a3   : > { %v808_v15 = vpop.f32.mrb[2].mxu1 }
 0x1a4   : > { %v4642_v16 = vpack.c.bf16 %v806_v13, %v806_v13  ;;  %v3549_v17 = vpop.f32.mrb[3].mxu1 }
 0x1a6   : > { %926 = vrot.lane.b32.xlu1 %v4642_v16, %s4209_s24  ;;  %813 = vrot.lane.b32.xlu0 %v4642_v16, %s4210_s25 }
 0x1aa   : > { %928 = vrot.lane.b32.xlu0 %v4642_v16, %s4211_s27 }
 0x218   : > { %v814_v18 = vpop.permute.xlu0 %813  ;;  %v927_v22 = vpop.permute.xlu1 %926 }
 0x219   : > { %v820_v19 = vsel %vm815_vm3, %v814_v18, 0 }
 0x21a   : > { %3551 = vmatpush3.bf16.xpose.msra.mxu1 %v820_v19 }
 0x21b   : > { %3562 = vmatprep.subr.bf16.mxu1 %v4207_v5 }
 0x21c   : > { %v929_v20 = vpop.permute.xlu0 %928 }
 0x21d   : > { %v934_v21 = vsel %vm815_vm3, %v929_v20, 0 }
 0x221   : > { %3553 = vmatmul.mubr.msk.bf16.vlgmr.msra.gmra.mrb[4].mxu1 %vm815_vm3, %v4642_v16 }
 0x222   : > { %3563 = vmatpush3.bf16.xpose.msra.mxu1 %v934_v21  ;;  %3564 = vmatprep.mubr.msk.bf16.mxu1 %vm4208_vm1, %v4207_v5 }
 0x223   : > { %3574 = vmatprep.subr.bf16.mxu1 %v4207_v5 }
 0x229   : > { %3565 = vmatmul.mubr.msk.bf16.vlgmr.msra.gmra.mrb[8].mxu1 %vm815_vm3, %v927_v22  ;;  %v3292_v22 = vld [vmem:[%s4548_s23] ss:$0 sm:$0xff] }
 0x22a   : > { %3578 = vmatprep.mubr.msk.bf16.mxu1 %vm4208_vm1, %v4207_v5  ;;  %3575 = vmatpush3.bf16.msra.mxu1 %v1048_v4  ;;  %v4748_v4 = vld [vmem:[%s4626_s3 + $0x10] sm:$0xff] }
 0x22b   : > { %3576 = vmatprep.subr.bf16.mxu1 %v4207_v5  ;;  %v4753_v7 = vpack.c.bf16 %v4748_v4, %v4748_v4 }
 0x22e   : > { %3577 = vmatpush3.bf16.msra.mxu1 %v1049_v8  ;;  %v1195_v8 = vld [vmem:[%s4605_s30 + $0x20] sm:$0xff] }
 0x22f   : > { %3590 = vmatprep.subr.bf16.mxu1 %v4207_v5 }
 0x2f4   : > { %v856_v28 = vpop.f32.mrb[4].mxu1 }
 0x2f5   : > { %v862_v31 = vmul.f32 0.25, %v856_v28  ;;  %v3554_v32 = vpop.f32.mrb[5].mxu1 }
 0x2f6   : > { %v859_v33 = vpop.f32.mrb[6].mxu1  ;;  %v3302_v32 = vld [vmem:[%s4570_s15 + $0x20] sm:$0xff] }
 0x2f7   : > { %v3555_v34 = vpop.f32.mrb[7].mxu1  ;;  %v863_v35 = vadd.f32 %v862_v31, %v4666_v30  ;;  %v3303_v33 = vld [vmem:[%s4570_s15 + $0x28] sm:$0xff] }
 0x2f8   : > { %v1292_v34 = vpack.c.bf16 %v3303_v33, %v3302_v32 }
 0x2f9   : > { %v865_v36 = vsel %vm864_vm6, %v863_v35, -inf }
 0x2fa   : > { %866 = vmax.xlane.f32.xlu1 %v865_v36 }
 0x2fc   : > { %v970_v37 = vpop.f32.mrb[8].mxu1 }
 0x2fd   : > { %v976_v38 = vmul.f32 0.25, %v970_v37  ;;  %v3566_v39 = vpop.f32.mrb[9].mxu1 }
 0x2fe   : > { %v973_v40 = vpop.f32.mrb[10].mxu1 }
 0x2ff   : > { %v3567_v41 = vpop.f32.mrb[11].mxu1  ;;  %v977_v42 = vadd.f32 %v976_v38, %v4666_v30  ;;  %v3304_v40 = vld [vmem:[%s4570_s15 + $0x30] sm:$0xff] }
 0x300   : > { %v3305_v41 = vld [vmem:[%s4570_s15 + $0x38] sm:$0xff] }
 0x301   : > { %v978_v43 = vsel %vm864_vm6, %v977_v42, -inf }
 0x302   : > { %979 = vmax.xlane.f32.xlu0 %v978_v43  ;;  %v1133_v43 = vld [vmem:[%s4590_s22] sm:$0xff] }
 0x387   : > { %v867_v44 = vpop.xlane.xlu1 %866 }
 0x388   : > { %v868_v45 = vsub.f32 %v863_v35, %v867_v44  ;;  %v1134_v44 = vld [vmem:[%s4590_s22 + $0x8] sm:$0xff] }
 0x38a   : > { %v869_v46 = vmul.f32 1.442695, %v868_v45  ;;  %v1137_v45 = vpack.c.bf16 %v1134_v44, %v1133_v43 }
 0x38c   : > { %3913 = vpow2.f32 %v869_v46  ;;  %v1135_v46 = vld [vmem:[%s4590_s22 + $0x10] sm:$0xff] }
 0x38f   : > { %v980_v47 = vpop.xlane.xlu0 %979 }
 0x390   : > { %v981_v48 = vsub.f32 %v977_v42, %v980_v47  ;;  %v1293_v42 = vpack.c.bf16 %v3305_v41, %v3304_v40  ;;  %v1136_v47 = vld [vmem:[%s4590_s22 + $0x18] sm:$0xff] }
 0x392   : > { %v982_v49 = vmul.f32 1.442695, %v981_v48  ;;  %v1138_v48 = vpack.c.bf16 %v1136_v47, %v1135_v46 }
 0x394   : > { %3915 = vpow2.f32 %v982_v49  ;;  %v4716_v49 = vld [vmem:[%s4575_s4 + $0x1] ss:$0 sm:$0xff] }
 0x396   : > { %v3914_v50 = vpop.eup %3913 }
 0x397   : > { %v871_v51 = vsel %vm864_vm6, %v3914_v50, 0.0 }
 0x398   : > { %872 = vadd.xlane.f32.xlu0 %v871_v51  ;;  %v1192_v51 = vld [vmem:[%s4605_s30 + $0x8] sm:$0xff] }
 0x39e   : > { %v3916_v52 = vpop.eup %3915 }
 0x39f   : > { %v984_v53 = vsel %vm864_vm6, %v3916_v52, 0.0 }
 0x3a0   : > { %985 = vadd.xlane.f32.xlu1 %v984_v53  ;;  %v1193_v53 = vld [vmem:[%s4605_s30 + $0x10] sm:$0xff] }
 0x3ae   : > { %877 = vrot.lane.b32.xlu0 %v4642_v16, %s4213_s26 }
 0x3b1   : > { %990 = vrot.lane.b32.xlu1 %v4642_v16, %s4214_s10 }
 0x425   : > { %v873_v54 = vpop.xlane.xlu0 %872 }
 0x426   : > { %3917 = vrcp.f32 %v873_v54  ;;  %v1194_v54 = vld [vmem:[%s4605_s30 + $0x18] sm:$0xff] }
 0x429   : > { %v878_v55 = vpop.permute.xlu0 %877 }
 0x42a   : > { %v884_v56 = vsel %vm882_vm7, %v878_v55, 0  ;;  %v1200_v55 = vpack.c.bf16 %v1194_v54, %v1193_v53 }
 0x42b   : > { %3557 = vmatpush3.bf16.msra.mxu0 %v884_v56 }
 0x42c   : > { %3568 = vmatprep.subr.bf16.mxu0 %v4207_v5 }
 0x42d   : > { %v986_v57 = vpop.xlane.xlu1 %985 }
 0x42e   : > { %3919 = vrcp.f32 %v986_v57 }
 0x430   : > { %v3918_v58 = vpop.eup %3917 }
 0x431   : > { %v875_v59 = vmul.f32 %v3918_v58, %v3914_v50  ;;  %v991_v60 = vpop.permute.xlu1 %990  ;;  %v1191_v50 = vld [vmem:[%s4605_s30] sm:$0xff] }
 0x432   : > { %v996_v62 = vsel %vm882_vm7, %v991_v60, 0  ;;  %v3294_v60 = vld [vmem:[%s4585_s6] ss:$0 sm:$0xff] }
 0x433   : > { %v876_v61 = vpack.c.bf16 %v875_v59, %v875_v59 }
 0x435   : > { %3559 = vmatmul.mubr.msk.bf16.vlgmr.msra.gmra.mrb[0].mxu0 %vm864_vm6, %v876_v61 }
 0x436   : > { %3569 = vmatpush3.bf16.msra.mxu0 %v996_v62  ;;  %3570 = vmatprep.mubr.msk.bf16.mxu0 %vm4208_vm1, %v4207_v5  ;;  %v3295_v62 = vld [vmem:[%s4554_s12] ss:$0 sm:$0xff] }
 0x437   : > { %3582 = vmatprep.subr.bf16.mxu0 %v4207_v5 }
 0x438   : > { %v3920_v63 = vpop.eup %3919 }
 0x439   : > { %v988_v0 = vmul.f32 %v3920_v63, %v3916_v52  ;;  %v1199_v52 = vpack.c.bf16 %v1192_v51, %v1191_v50 }
 0x43b   : > { %v989_v1 = vpack.c.bf16 %v988_v0, %v988_v0  ;;  %v4731_v0 = vsel %vm4662_vm4, 1.0, %v4207_v5 }
 0x43d   : > { %3571 = vmatmul.mubr.msk.bf16.vlgmr.msra.gmra.mrb[4].mxu0 %vm864_vm6, %v989_v1 }
 0x43e   : > { %3586 = vmatprep.mubr.msk.bf16.mxu0 %vm4208_vm1, %v4207_v5  ;;  %3583 = vmatpush3.bf16.msra.mxu0 %v1137_v45 }
 0x43f   : > { %3584 = vmatprep.subr.bf16.mxu0 %v4207_v5 }
 0x442   : > { %3585 = vmatpush3.bf16.msra.mxu0 %v1138_v48 }
 0x443   : > { %3602 = vmatprep.subr.bf16.mxu0 %v4207_v5 }
 0x508   : > { %v920_v11 = vpop.f32.mrb[0].mxu0 }
 0x509   : > { %v3560_v12 = vpop.f32.mrb[1].mxu0 }
 0x50a   : > { %v923_v13 = vpop.f32.mrb[2].mxu0 }
 0x50b   : > { %v3561_v14 = vpop.f32.mrb[3].mxu0  ;;  %v1197_v13 = vld [vmem:[%s4605_s30 + $0x30] sm:$0xff] }
 0x50c   : > { %v1198_v14 = vld [vmem:[%s4605_s30 + $0x38] sm:$0xff] }
 0x510   : > { %v1032_v15 = vpop.f32.mrb[4].mxu0 }
 0x511   : > { %1039 = vrot.lane.b32.xlu1 %v1032_v15, %s4215_s28  ;;  %v3572_v16 = vpop.f32.mrb[5].mxu0  ;;  %v1202_v15 = vpack.c.bf16 %v1198_v14, %v1197_v13 }
 0x512   : > { %v1035_v17 = vpop.f32.mrb[6].mxu0  ;;  %v3296_v16 = vld [vmem:[%s4595_s20] ss:$0 sm:$0xff] }
 0x513   : > { %v3573_v18 = vpop.f32.mrb[7].mxu0 }
 0x583   : > { %v1040_v19 = vpop.permute.xlu1 %1039 }
 0x584   : > { %v1042_v20 = vsel %vm815_vm3, %v920_v11, %v1040_v19  ;;  %v1196_v11 = vld [vmem:[%s4605_s30 + $0x28] sm:$0xff] }
 0x585   : > { %v1043_v21 = vpack.c.bf16 %v1042_v20, %v1042_v20  ;;  %v1201_v12 = vpack.c.bf16 %v1196_v11, %v1195_v8 }
 0x587   : > { %3579 = vmatmul.mubr.msk.bf16.vlgmr.msra.gmra.mrb[12].mxu1 %vm767_vm2, %v1043_v21 }
 0x588   : > { %3598 = vmatprep.mubr.msk.bf16.mxu1 %vm4208_vm1, %v4207_v5  ;;  %3591 = vmatpush3.bf16.msra.mxu1 %v1199_v52 }
 0x589   : > { %3592 = vmatprep.subr.bf16.mxu1 %v4207_v5 }
 0x58c   : > { %3593 = vmatpush3.bf16.msra.mxu1 %v1200_v55 }
 0x58d   : > { %3594 = vmatprep.subr.bf16.mxu1 %v4207_v5 }
 0x590   : > { %3595 = vmatpush3.bf16.msra.mxu1 %v1201_v12 }
 0x591   : > { %3596 = vmatprep.subr.bf16.mxu1 %v4207_v5 }
 0x594   : > { %3597 = vmatpush3.bf16.msra.mxu1 %v1202_v15 }
 0x595   : > { %3618 = vmatprep.subr.bf16.mxu1 %v4207_v5 }
 0x65a   : > { %v1094_v23 = vpop.f32.mrb[12].mxu1 }
 0x65b   : > { %v1095_v24 = vadd.f32 %v3292_v22, %v1094_v23  ;;  %v3580_v25 = vpop.f32.mrb[13].mxu1 }
 0x65c   : > { %v1097_v27 = vpop.f32.mrb[14].mxu1 }
 0x65d   : > { %v3581_v28 = vpop.f32.mrb[15].mxu1  ;;  %v1100_v29 = vadd.f32 %v1095_v24, %v4629_v9 }
 0x65f   : > { %v1103_v31 = vsel %vm767_vm2, %v1100_v29, 0.0 }
 0x660   : > { %1104 = vadd.xlane.f32.xlu0 %v1103_v31 }
 0x676   : > { %1343 = vrot.lane.b32.xlu0 %v1292_v34, %s4210_s25 }
 0x67a   : > { %1349 = vrot.lane.b32.xlu0 %v4716_v49, %s4210_s25 }
 0x6ed   : > { %v1105_v35 = vpop.xlane.xlu0 %1104 }
 0x6ee   : > { %v1107_v36 = vmul.f32 0.03125, %v1105_v35 }
 0x6f0   : > { %v1108_v37 = vsub.f32 %v1100_v29, %v1107_v36 }
 0x6f1   : > { %v1344_v26 = vpop.permute.xlu0 %1343 }
 0x6f2   : > { %v1109_v38 = vmul.f32 %v1108_v37, %v1108_v37 }
 0x6f4   : > { %v1110_v39 = vsel %vm767_vm2, %v1109_v38, 0.0 }
 0x6f5   : > { %1111 = vadd.xlane.f32.xlu1 %v1110_v39  ;;  %v1350_v32 = vpop.permute.xlu0 %1349 }
 0x706   : > { %1345 = vrot.lane.b32.xlu1 %v1293_v42, %s4210_s25 }
 0x782   : > { %v1112_v56 = vpop.xlane.xlu1 %1111 }
 0x783   : > { %v1113_v57 = vmul.f32 0.03125, %v1112_v56 }
 0x785   : > { %v1114_v58 = vadd.f32 1e-05, %v1113_v57 }
 0x786   : > { %v1346_v6 = vpop.permute.xlu1 %1345 }
 0x787   : > { %3921 = vrsqrt.f32 %v1114_v58 }
 0x791   : > { %v3922_v59 = vpop.eup %3921 }
 0x792   : > { %v1116_v61 = vmul.f32 %v3922_v59, %v1108_v37 }
 0x794   : > { %v1123_v63 = vmul.f32 %v3294_v60, %v1116_v61 }
 0x796   : > { %v1130_v1 = vadd.f32 %v3295_v62, %v1123_v63 }
 0x798   : > { %v4734_v2 = vmul.f32 %v4731_v0, %v1130_v1 }
 0x79a   : > { %v1132_v3 = vpack.c.bf16 %v4734_v2, %v4734_v2 }
 0x79c   : > { %3587 = vmatmul.mubr.msk.bf16.vlgmr.msra.gmra.mrb[8].mxu0 %vm767_vm2, %v1132_v3 }
 0x79d   : > { %3603 = vmatpush3.bf16.msra.mxu0 %v1292_v34  ;;  %3606 = vmatprep.mubr.msk.bf16.mxu0 %vm4208_vm1, %v4207_v5 }
 0x79e   : > { %3604 = vmatprep.subr.bf16.mxu0 %v4207_v5 }
 0x7a1   : > { %3605 = vmatpush3.bf16.msra.mxu0 %v1293_v42 }
 0x7a2   : > { %3610 = vmatprep.subr.bf16.mxu0 %v4207_v5 }
 0x7a4   : > { %3607 = vmatmul.mubr.msk.bf16.vlgmr.msra.gmra.mrb[12].mxu0 %vm767_vm2, %v4634_v10 }
 0x7a5   : > { %3611 = vmatpush3.bf16.msra.mxu0 %v1344_v26  ;;  %3614 = vmatprep.mubr.msk.bf16.mxu0 %vm4208_vm1, %v4207_v5 }
 0x7a6   : > { %3612 = vmatprep.subr.bf16.mxu0 %v4207_v5 }
 0x7a9   : > { %3613 = vmatpush3.bf16.msra.mxu0 %v1346_v6 }
 0x7aa   : > { %3624 = vmatprep.subr.bf16.mxu0 %v4207_v5 }
 0x7ac   : > { %3615 = vmatmul.mubr.msk.bf16.vlgmr.msra.gmra.mrb[16].mxu0 %vm767_vm2, %v4753_v7 }
 0x7ad   : > { %3626 = vmatprep.mubr.msk.bf16.mxu0 %vm4208_vm1, %v4207_v5 }
 0x86f   : > { %v1183_v17 = vpop.f32.mrb[8].mxu0 }
 0x870   : > { %v1184_v18 = vadd.f32 %v3296_v16, %v1183_v17  ;;  %v3588_v19 = vpop.f32.mrb[9].mxu0 }
 0x871   : > { %v1186_v20 = vpop.f32.mrb[10].mxu0 }
 0x872   : > { %v1189_v21 = vmax.f32 %v1184_v18, 0.0  ;;  %v3589_v22 = vpop.f32.mrb[11].mxu0 }
 0x874   : > { %v1190_v23 = vpack.c.bf16 %v1189_v21, %v1189_v21 }
 0x876   : > { %3599 = vmatmul.mubr.msk.bf16.vlgmr.msra.gmra.mrb[16].mxu1 %vm1210_vm8, %v1190_v23 }
 0x877   : > { %v1334_v24 = vpop.f32.mrb[12].mxu0  ;;  %3620 = vmatprep.mubr.msk.bf16.mxu1 %vm4208_vm1, %v4207_v5 }
 0x878   : > { %v1335_v25 = vadd.f32 %v4716_v49, %v1334_v24  ;;  %v3608_v27 = vpop.f32.mrb[13].mxu0 }
 0x879   : > { %v1337_v28 = vpop.f32.mrb[14].mxu0  ;;  %v3315_v27 = vld [vmem:[%s4580_s19 + $0x28] sm:$0xff] }
 0x87a   : > { %v1395_v29 = vpack.c.bf16 %v1335_v25, %v1335_v25  ;;  %v3609_v31 = vpop.f32.mrb[15].mxu0  ;;  %v3314_v25 = vld [vmem:[%s4580_s19 + $0x20] sm:$0xff] }
 0x87b   : > { %v1630_v28 = vpack.c.bf16 %v3315_v27, %v3314_v25  ;;  %v3349_v25 = vld [vmem:[%s4570_s15 + $0x50] sm:$0xff]  ;;  %v3350_v27 = vld [vmem:[%s4570_s15 + $0x58] sm:$0xff] }
 0x87c   : > { %1507 = vrot.lane.b32.xlu0 %v1395_v29, %s4209_s24 }
 0x87f   : > { %v1389_v33 = vpop.f32.mrb[16].mxu0 }
 0x880   : > { %v1390_v34 = vadd.f32 %v1389_v33, %v1350_v32  ;;  %v3616_v35 = vpop.f32.mrb[17].mxu0 }
 0x881   : > { %v1392_v36 = vpop.f32.mrb[18].mxu0  ;;  %v3317_v35 = vld [vmem:[%s4580_s19 + $0x38] sm:$0xff] }
 0x882   : > { %v1396_v37 = vpack.c.bf16 %v1390_v34, %v1390_v34  ;;  %v3617_v38 = vpop.f32.mrb[19].mxu0  ;;  %v3316_v34 = vld [vmem:[%s4580_s19 + $0x30] sm:$0xff] }
 0x883   : > { %v1631_v36 = vpack.c.bf16 %v3317_v35, %v3316_v34  ;;  %v3339_v34 = vld [vmem:[%s4605_s30 + $0x78] sm:$0xff] }
 0x884   : > { %1509 = vrot.lane.b32.xlu1 %v1396_v37, %s4209_s24  ;;  %v1401_v39 = vsel %vm815_vm3, %v1396_v37, 0 }
 0x885   : > { %3619 = vmatpush3.bf16.xpose.msra.mxu1 %v1401_v39 }
 0x886   : > { %3630 = vmatprep.subr.bf16.mxu1 %v4207_v5 }
 0x88c   : > { %3621 = vmatmul.mubr.msk.bf16.vlgmr.msra.gmra.mrb[20].mxu1 %vm815_vm3, %v1395_v29 }
 0x88d   : > { %3632 = vmatprep.mubr.msk.bf16.mxu1 %vm4208_vm1, %v4207_v5 }
 0x8ee   : > { %v1508_v42 = vpop.permute.xlu0 %1507 }
 0x8f6   : > { %v1510_v40 = vpop.permute.xlu1 %1509 }
 0x8f7   : > { %v1515_v41 = vsel %vm815_vm3, %v1510_v40, 0 }
 0x8f8   : > { %3631 = vmatpush3.bf16.xpose.msra.mxu1 %v1515_v41 }
 0x8f9   : > { %3642 = vmatprep.subr.bf16.mxu1 %v4207_v5 }
 0x8ff   : > { %3633 = vmatmul.mubr.msk.bf16.vlgmr.msra.gmra.mrb[24].mxu1 %vm815_vm3, %v1508_v42 }
 0x900   : > { %3646 = vmatprep.mubr.msk.bf16.mxu1 %vm4208_vm1, %v4207_v5  ;;  %3643 = vmatpush3.bf16.msra.mxu1 %v1630_v28  ;;  %v1883_v28 = vpack.c.bf16 %v3350_v27, %v3349_v25 }
 0x901   : > { %3644 = vmatprep.subr.bf16.mxu1 %v4207_v5 }
 0x904   : > { %3645 = vmatpush3.bf16.msra.mxu1 %v1631_v36  ;;  %v3330_v36 = vld [vmem:[%s4595_s20 + $0x1] ss:$0 sm:$0xff] }
 0x905   : > { %3658 = vmatprep.subr.bf16.mxu1 %v4207_v5 }
 0x949   : > { %v4783_v43 = vpop.f32.mrb[16].mxu1 }
 0x94a   : > { %v3600_v44 = vpop.f32.mrb[17].mxu1 }
 0x94b   : > { %v1251_v45 = vpop.f32.mrb[18].mxu1 }
 0x94c   : > { %v3601_v46 = vpop.f32.mrb[19].mxu1  ;;  %v3319_v45 = vld [vmem:[%s4548_s23 + $0x1] ss:$0 sm:$0xff] }
 0x95f   : > { %v1437_v47 = vpop.f32.mrb[20].mxu1 }
 0x960   : > { %v1443_v48 = vmul.f32 0.25, %v1437_v47  ;;  %v3622_v49 = vpop.f32.mrb[21].mxu1 }
 0x961   : > { %v1440_v50 = vpop.f32.mrb[22].mxu1 }
 0x962   : > { %v3623_v51 = vpop.f32.mrb[23].mxu1  ;;  %v1444_v52 = vadd.f32 %v1443_v48, %v4666_v30 }
 0x964   : > { %v1445_v53 = vsel %vm864_vm6, %v1444_v52, -inf }
 0x965   : > { %1446 = vmax.xlane.f32.xlu1 %v1445_v53 }
 0x9d2   : > { %v1551_v54 = vpop.f32.mrb[24].mxu1 }
 0x9d3   : > { %v1557_v55 = vmul.f32 0.25, %v1551_v54  ;;  %v3634_v56 = vpop.f32.mrb[25].mxu1 }
 0x9d4   : > { %v1554_v57 = vpop.f32.mrb[26].mxu1 }
 0x9d5   : > { %v3635_v58 = vpop.f32.mrb[27].mxu1  ;;  %v1558_v59 = vadd.f32 %v1557_v55, %v4666_v30 }
 0x9d6   : > { %v3325_v58 = vld [vmem:[%s4590_s22 + $0x20] sm:$0xff] }
 0x9d7   : > { %v1559_v60 = vsel %vm864_vm6, %v1558_v59, -inf }
 0x9d8   : > { %1560 = vmax.xlane.f32.xlu0 %v1559_v60 }
 0x9f2   : > { %v1447_v61 = vpop.xlane.xlu1 %1446 }
 0x9f3   : > { %v1448_v62 = vsub.f32 %v1444_v52, %v1447_v61  ;;  %v3327_v61 = vld [vmem:[%s4590_s22 + $0x30] sm:$0xff] }
 0x9f5   : > { %v1449_v63 = vmul.f32 1.442695, %v1448_v62  ;;  %v3328_v62 = vld [vmem:[%s4590_s22 + $0x38] sm:$0xff] }
 0x9f7   : > { %3923 = vpow2.f32 %v1449_v63  ;;  %v3332_v63 = vld [vmem:[%s4605_s30 + $0x40] sm:$0xff] }
 0xa01   : > { %v3924_v1 = vpop.eup %3923 }
 0xa02   : > { %v1451_v3 = vsel %vm864_vm6, %v3924_v1, 0.0 }
 0xa03   : > { %1452 = vadd.xlane.f32.xlu0 %v1451_v3  ;;  %v3334_v3 = vld [vmem:[%s4605_s30 + $0x50] sm:$0xff] }
 0xa19   : > { %1458 = vrot.lane.b32.xlu0 %v1396_v37, %s4210_s25 }
 0xa65   : > { %v1561_v26 = vpop.xlane.xlu0 %1560 }
 0xa66   : > { %v1562_v6 = vsub.f32 %v1558_v59, %v1561_v26  ;;  %v3326_v59 = vld [vmem:[%s4590_s22 + $0x28] sm:$0xff] }
 0xa67   : > { %v1722_v60 = vpack.c.bf16 %v3326_v59, %v3325_v58 }
 0xa68   : > { %v1563_v8 = vmul.f32 1.442695, %v1562_v6  ;;  %v3335_v6 = vld [vmem:[%s4605_s30 + $0x58] sm:$0xff] }
 0xa6a   : > { %3925 = vpow2.f32 %v1563_v8  ;;  %v1787_v8 = vpack.c.bf16 %v3335_v6, %v3334_v3 }
 0xa74   : > { %v3926_v11 = vpop.eup %3925 }
 0xa75   : > { %v1565_v12 = vsel %vm864_vm6, %v3926_v11, 0.0 }
 0xa76   : > { %1566 = vadd.xlane.f32.xlu1 %v1565_v12 }
 0xa87   : > { %1571 = vrot.lane.b32.xlu1 %v1396_v37, %s4211_s27 }
 0xa90   : > { %v1453_v13 = vpop.xlane.xlu0 %1452 }
 0xa91   : > { %3927 = vrcp.f32 %v1453_v13 }
 0xa94   : > { %v1459_v14 = vpop.permute.xlu0 %1458 }
 0xa95   : > { %v1464_v15 = vsel %vm882_vm7, %v1459_v14, 0 }
 0xa96   : > { %3625 = vmatpush3.bf16.msra.mxu0 %v1464_v15  ;;  %v3323_v15 = vld [vmem:[%s4585_s6 + $0x1] ss:$0 sm:$0xff] }
 0xa97   : > { %3636 = vmatprep.subr.bf16.mxu0 %v4207_v5 }
 0xa9b   : > { %v3928_v16 = vpop.eup %3927 }
 0xa9c   : > { %v1455_v17 = vmul.f32 %v3928_v16, %v3924_v1  ;;  %v3333_v1 = vld [vmem:[%s4605_s30 + $0x48] sm:$0xff] }
 0xa9d   : > { %v1786_v26 = vpack.c.bf16 %v3333_v1, %v3332_v63 }
 0xa9e   : > { %v1456_v18 = vpack.c.bf16 %v1455_v17, %v1455_v17  ;;  %v3324_v17 = vld [vmem:[%s4554_s12 + $0x1] ss:$0 sm:$0xff] }
 0xaa0   : > { %3627 = vmatmul.mubr.msk.bf16.vlgmr.msra.gmra.mrb[20].mxu0 %vm864_vm6, %v1456_v18 }
 0xaa1   : > { %3638 = vmatprep.mubr.msk.bf16.mxu0 %vm4208_vm1, %v4207_v5 }
 0xb03   : > { %v1567_v19 = vpop.xlane.xlu1 %1566 }
 0xb04   : > { %3929 = vrcp.f32 %v1567_v19 }
 0xb07   : > { %v1572_v20 = vpop.permute.xlu1 %1571 }
 0xb08   : > { %v1577_v21 = vsel %vm882_vm7, %v1572_v20, 0  ;;  %v3347_v20 = vld [vmem:[%s4570_s15 + $0x40] sm:$0xff] }
 0xb09   : > { %3637 = vmatpush3.bf16.msra.mxu0 %v1577_v21  ;;  %v3348_v21 = vld [vmem:[%s4570_s15 + $0x48] sm:$0xff] }
 0xb0a   : > { %3650 = vmatprep.subr.bf16.mxu0 %v4207_v5 }
 0xb0e   : > { %v3930_v22 = vpop.eup %3929 }
 0xb0f   : > { %v1569_v23 = vmul.f32 %v3930_v22, %v3926_v11 }
 0xb11   : > { %v1570_v24 = vpack.c.bf16 %v1569_v23, %v1569_v23  ;;  %v1882_v23 = vpack.c.bf16 %v3348_v21, %v3347_v20 }
 0xb13   : > { %3639 = vmatmul.mubr.msk.bf16.vlgmr.msra.gmra.mrb[24].mxu0 %vm864_vm6, %v1570_v24 }
 0xb14   : > { %3654 = vmatprep.mubr.msk.bf16.mxu0 %vm4208_vm1, %v4207_v5  ;;  %3651 = vmatpush3.bf16.msra.mxu0 %v1722_v60 }
 0xb15   : > { %3652 = vmatprep.subr.bf16.mxu0 %v4207_v5 }
 0xb73   : > { %v1500_v29 = vpop.f32.mrb[20].mxu0 }
 0xb74   : > { %v3628_v31 = vpop.f32.mrb[21].mxu0 }
 0xb75   : > { %v1503_v32 = vpop.f32.mrb[22].mxu0  ;;  %v3337_v31 = vld [vmem:[%s4605_s30 + $0x68] sm:$0xff] }
 0xb76   : > { %v3629_v33 = vpop.f32.mrb[23].mxu0 }
 0xb77   : > { %v3338_v33 = vld [vmem:[%s4605_s30 + $0x70] sm:$0xff] }
 0xb78   : > { %v1789_v35 = vpack.c.bf16 %v3339_v34, %v3338_v33 }
 0xbe6   : > { %v1613_v37 = vpop.f32.mrb[24].mxu0 }
 0xbe7   : > { %1620 = vrot.lane.b32.xlu1 %v1613_v37, %s4215_s28  ;;  %v3640_v38 = vpop.f32.mrb[25].mxu0 }
 0xbe8   : > { %v1616_v39 = vpop.f32.mrb[26].mxu0 }
 0xbe9   : > { %v3641_v40 = vpop.f32.mrb[27].mxu0 }
 0xc59   : > { %v1621_v41 = vpop.permute.xlu1 %1620 }
 0xc5a   : > { %v1623_v42 = vsel %vm815_vm3, %v1500_v29, %v1621_v41  ;;  %v3336_v29 = vld [vmem:[%s4605_s30 + $0x60] sm:$0xff] }
 0xc5b   : > { %v1624_v44 = vpack.c.bf16 %v1623_v42, %v1623_v42  ;;  %v1788_v32 = vpack.c.bf16 %v3337_v31, %v3336_v29 }
 0xc5d   : > { %3647 = vmatmul.mubr.msk.bf16.vlgmr.msra.gmra.mrb[28].mxu1 %vm767_vm2, %v1624_v44 }
 0xc5e   : > { %3666 = vmatprep.mubr.msk.bf16.mxu1 %vm4208_vm1, %v4207_v5  ;;  %3659 = vmatpush3.bf16.msra.mxu1 %v1786_v26 }
 0xc5f   : > { %3660 = vmatprep.subr.bf16.mxu1 %v4207_v5 }
 0xc62   : > { %3661 = vmatpush3.bf16.msra.mxu1 %v1787_v8 }
 0xc63   : > { %3662 = vmatprep.subr.bf16.mxu1 %v4207_v5 }
 0xc66   : > { %3663 = vmatpush3.bf16.msra.mxu1 %v1788_v32 }
 0xc67   : > { %3664 = vmatprep.subr.bf16.mxu1 %v4207_v5 }
 0xc6a   : > { %3665 = vmatpush3.bf16.msra.mxu1 %v1789_v35 }
 0xc6b   : > { %3684 = vmatprep.subr.bf16.mxu1 %v4207_v5 }
 0xd30   : > { %v1677_v46 = vpop.f32.mrb[28].mxu1 }
 0xd31   : > { %v1678_v47 = vadd.f32 %v3319_v45, %v1677_v46  ;;  %v3648_v48 = vpop.f32.mrb[29].mxu1  ;;  %v3352_v45 = vld [vmem:[%s4575_s4 + $0x2] ss:$0 sm:$0xff] }
 0xd32   : > { %v1680_v49 = vpop.f32.mrb[30].mxu1 }
 0xd33   : > { %v3649_v50 = vpop.f32.mrb[31].mxu1  ;;  %v1683_v51 = vadd.f32 %v1678_v47, %v4629_v9  ;;  %v1723_v9 = vpack.c.bf16 %v3328_v62, %v3327_v61 }
 0xd35   : > { %v1688_v52 = vsel %vm767_vm2, %v1683_v51, 0.0  ;;  %3653 = vmatpush3.bf16.msra.mxu0 %v1723_v9 }
 0xd36   : > { %1689 = vadd.xlane.f32.xlu0 %v1688_v52  ;;  %3670 = vmatprep.subr.bf16.mxu0 %v4207_v5 }
 0xdc3   : > { %v1690_v53 = vpop.xlane.xlu0 %1689 }
 0xdc4   : > { %v1691_v54 = vmul.f32 0.03125, %v1690_v53 }
 0xdc6   : > { %v1692_v55 = vsub.f32 %v1683_v51, %v1691_v54 }
 0xdc8   : > { %v1693_v56 = vmul.f32 %v1692_v55, %v1692_v55 }
 0xdca   : > { %v1694_v57 = vsel %vm767_vm2, %v1693_v56, 0.0 }
 0xdcb   : > { %1695 = vadd.xlane.f32.xlu1 %v1694_v57 }
 0xe58   : > { %v1696_v11 = vpop.xlane.xlu1 %1695 }
 0xe59   : > { %v1697_v12 = vmul.f32 0.03125, %v1696_v11 }
 0xe5b   : > { %v1698_v13 = vadd.f32 1e-05, %v1697_v12 }
 0xe5d   : > { %3931 = vrsqrt.f32 %v1698_v13 }
 0xe67   : > { %v3932_v14 = vpop.eup %3931 }
 0xe68   : > { %v1700_v16 = vmul.f32 %v3932_v14, %v1692_v55 }
 0xe6a   : > { %v1707_v18 = vmul.f32 %v3323_v15, %v1700_v16 }
 0xe6c   : > { %v1714_v19 = vadd.f32 %v3324_v17, %v1707_v18 }
 0xe6e   : > { %v4835_v22 = vmul.f32 %v4731_v0, %v1714_v19 }
 0xe70   : > { %v1716_v24 = vpack.c.bf16 %v4835_v22, %v4835_v22 }
 0xe72   : > { %3655 = vmatmul.mubr.msk.bf16.vlgmr.msra.gmra.mrb[28].mxu0 %vm767_vm2, %v1716_v24 }
 0xe73   : > { %3671 = vmatpush3.bf16.msra.mxu0 %v1882_v23  ;;  %3674 = vmatprep.mubr.msk.bf16.mxu0 %vm4208_vm1, %v4207_v5 }
 0xe74   : > { %3672 = vmatprep.subr.bf16.mxu0 %v4207_v5 }
 0xe77   : > { %3673 = vmatpush3.bf16.msra.mxu0 %v1883_v28 }
 0xe78   : > { %3678 = vmatprep.subr.bf16.mxu0 %v4207_v5 }
 0xe7a   : > { %3675 = vmatmul.mubr.msk.bf16.vlgmr.msra.gmra.mrb[32].mxu0 %vm767_vm2, %v4753_v7 }
 0xe7b   : > { %3680 = vmatprep.mubr.msk.bf16.mxu0 %vm4208_vm1, %v4207_v5 }
 0xf45   : > { %v1769_v37 = vpop.f32.mrb[28].mxu0 }
 0xf46   : > { %v1770_v38 = vadd.f32 %v3330_v36, %v1769_v37  ;;  %v3656_v39 = vpop.f32.mrb[29].mxu0 }
 0xf47   : > { %v1772_v40 = vpop.f32.mrb[30].mxu0 }
 0xf48   : > { %v1775_v41 = vmax.f32 %v1770_v38, 0.0  ;;  %v3657_v42 = vpop.f32.mrb[31].mxu0 }
 0xf49   : > { %v3359_v42 = vld [vmem:[%s4580_s19 + $0x48] sm:$0xff] }
 0xf4a   : > { %v1776_v44 = vpack.c.bf16 %v1775_v41, %v1775_v41  ;;  %v3358_v41 = vld [vmem:[%s4580_s19 + $0x40] sm:$0xff] }
 0xf4c   : > { %3667 = vmatmul.mubr.msk.bf16.vlgmr.msra.gmra.mrb[32].mxu1 %vm1210_vm8, %v1776_v44  ;;  %v2165_v44 = vpack.c.bf16 %v3359_v42, %v3358_v41  ;;  %v3368_v41 = vld [vmem:[%s4554_s12 + $0x2] ss:$0 sm:$0xff] }
 0xf4d   : > { %v1924_v46 = vpop.f32.mrb[32].mxu0  ;;  %3686 = vmatprep.mubr.msk.bf16.mxu1 %vm4208_vm1, %v4207_v5 }
 0xf4e   : > { %v1925_v47 = vadd.f32 %v3352_v45, %v1924_v46  ;;  %v3676_v48 = vpop.f32.mrb[33].mxu0  ;;  %v3360_v45 = vld [vmem:[%s4580_s19 + $0x50] sm:$0xff]  ;;  %v3361_v46 = vld [vmem:[%s4580_s19 + $0x58] sm:$0xff] }
 0xf4f   : > { %v1927_v49 = vpop.f32.mrb[34].mxu0 }
 0xf50   : > { %v1930_v50 = vpack.c.bf16 %v1925_v47, %v1925_v47  ;;  %v3677_v51 = vpop.f32.mrb[35].mxu0  ;;  %v2166_v47 = vpack.c.bf16 %v3361_v46, %v3360_v45 }
 0xf52   : > { %2044 = vrot.lane.b32.xlu1 %v1930_v50, %s4211_s27  ;;  %1932 = vrot.lane.b32.xlu0 %v1930_v50, %s4210_s25 }
 0xf56   : > { %2042 = vrot.lane.b32.xlu0 %v1930_v50, %s4209_s24 }
 0xfc4   : > { %v1933_v52 = vpop.permute.xlu0 %1932  ;;  %v2045_v54 = vpop.permute.xlu1 %2044 }
 0xfc5   : > { %v1938_v53 = vsel %vm815_vm3, %v1933_v52, 0  ;;  %v2050_v55 = vsel %vm815_vm3, %v2045_v54, 0 }
 0xfc6   : > { %3679 = vmatpush3.bf16.xpose.msra.mxu0 %v1938_v53 }
 0xfc7   : > { %3690 = vmatprep.subr.bf16.mxu0 %v4207_v5 }
 0xfc8   : > { %v2043_v56 = vpop.permute.xlu0 %2042 }
 0xfcd   : > { %3681 = vmatmul.mubr.msk.bf16.vlgmr.msra.gmra.mrb[36].mxu0 %vm815_vm3, %v1930_v50 }
 0xfce   : > { %3691 = vmatpush3.bf16.xpose.msra.mxu0 %v2050_v55  ;;  %3692 = vmatprep.mubr.msk.bf16.mxu0 %vm4208_vm1, %v4207_v5 }
 0xfcf   : > { %3702 = vmatprep.subr.bf16.mxu0 %v4207_v5 }
 0xfd5   : > { %3693 = vmatmul.mubr.msk.bf16.vlgmr.msra.gmra.mrb[40].mxu0 %vm815_vm3, %v2043_v56 }
 0xfd6   : > { %3706 = vmatprep.mubr.msk.bf16.mxu0 %vm4208_vm1, %v4207_v5  ;;  %3703 = vmatpush3.bf16.msra.mxu0 %v2165_v44 }
 0xfd7   : > { %3704 = vmatprep.subr.bf16.mxu0 %v4207_v5 }
 0xfda   : > { %3705 = vmatpush3.bf16.msra.mxu0 %v2166_v47 }
 0xfdb   : > { %3718 = vmatprep.subr.bf16.mxu0 %v4207_v5 }
0x101f   : > { %v4874_v57 = vpop.f32.mrb[32].mxu1 }
0x1020   : > { %v3668_v58 = vpop.f32.mrb[33].mxu1 }
0x1021   : > { %v1838_v59 = vpop.f32.mrb[34].mxu1 }
0x1022   : > { %v3669_v60 = vpop.f32.mrb[35].mxu1 }
0x1023   : > { %v3363_v60 = vld [vmem:[%s4548_s23 + $0x2] ss:$0 sm:$0xff] }
0x10a0   : > { %v1974_v61 = vpop.f32.mrb[36].mxu0 }
0x10a1   : > { %v1980_v62 = vmul.f32 0.25, %v1974_v61  ;;  %v3682_v9 = vpop.f32.mrb[37].mxu0 }
0x10a2   : > { %v1977_v63 = vpop.f32.mrb[38].mxu0 }
0x10a3   : > { %v3683_v1 = vpop.f32.mrb[39].mxu0  ;;  %v1981_v3 = vadd.f32 %v1980_v62, %v4666_v30 }
0x10a5   : > { %v1982_v26 = vsel %vm864_vm6, %v1981_v3, -inf }
0x10a6   : > { %1983 = vmax.xlane.f32.xlu1 %v1982_v26 }
0x10a8   : > { %v2086_v6 = vpop.f32.mrb[40].mxu0 }
0x10a9   : > { %v2092_v8 = vmul.f32 0.25, %v2086_v6  ;;  %v3694_v11 = vpop.f32.mrb[41].mxu0  ;;  %v3391_v6 = vld [vmem:[%s4570_s15 + $0x60] sm:$0xff] }
0x10aa   : > { %v2089_v12 = vpop.f32.mrb[42].mxu0 }
0x10ab   : > { %v3695_v13 = vpop.f32.mrb[43].mxu0  ;;  %v2093_v14 = vadd.f32 %v2092_v8, %v4666_v30  ;;  %v3392_v8 = vld [vmem:[%s4570_s15 + $0x68] sm:$0xff] }
0x10ac   : > { %v2416_v11 = vpack.c.bf16 %v3392_v8, %v3391_v6 }
0x10ad   : > { %v2094_v15 = vsel %vm864_vm6, %v2093_v14, -inf }
0x10ae   : > { %2095 = vmax.xlane.f32.xlu0 %v2094_v15 }
0x1133   : > { %v1984_v16 = vpop.xlane.xlu1 %1983 }
0x1134   : > { %v1985_v17 = vsub.f32 %v1981_v3, %v1984_v16 }
0x1136   : > { %v1986_v18 = vmul.f32 1.442695, %v1985_v17  ;;  %v3394_v17 = vld [vmem:[%s4570_s15 + $0x78] sm:$0xff] }
0x1138   : > { %3933 = vpow2.f32 %v1986_v18 }
0x113b   : > { %v2096_v19 = vpop.xlane.xlu0 %2095 }
0x113c   : > { %v2097_v20 = vsub.f32 %v2093_v14, %v2096_v19  ;;  %v3369_v19 = vld [vmem:[%s4590_s22 + $0x40] sm:$0xff] }
0x113e   : > { %v2098_v21 = vmul.f32 1.442695, %v2097_v20  ;;  %v3370_v20 = vld [vmem:[%s4590_s22 + $0x48] sm:$0xff] }
0x1140   : > { %3935 = vpow2.f32 %v2098_v21  ;;  %v2257_v21 = vpack.c.bf16 %v3370_v20, %v3369_v19 }
0x1142   : > { %v3934_v23 = vpop.eup %3933 }
0x1143   : > { %v1988_v24 = vsel %vm864_vm6, %v3934_v23, 0.0 }
0x1144   : > { %1989 = vadd.xlane.f32.xlu0 %v1988_v24  ;;  %v3372_v24 = vld [vmem:[%s4590_s22 + $0x58] sm:$0xff] }
0x114a   : > { %v3936_v25 = vpop.eup %3935 }
0x114b   : > { %v2100_v27 = vsel %vm864_vm6, %v3936_v25, 0.0 }
0x114c   : > { %2101 = vadd.xlane.f32.xlu1 %v2100_v27  ;;  %v3396_v27 = vld [vmem:[%s4575_s4 + $0x3] ss:$0 sm:$0xff] }
0x115a   : > { %1994 = vrot.lane.b32.xlu0 %v1930_v50, %s4213_s26 }
0x115d   : > { %2106 = vrot.lane.b32.xlu1 %v1930_v50, %s4214_s10 }
0x11d1   : > { %v1990_v28 = vpop.xlane.xlu0 %1989 }
0x11d2   : > { %3937 = vrcp.f32 %v1990_v28  ;;  %v3376_v28 = vld [vmem:[%s4605_s30 + $0x80] sm:$0xff] }
0x11d5   : > { %v1995_v29 = vpop.permute.xlu0 %1994 }
0x11d6   : > { %v2000_v31 = vsel %vm882_vm7, %v1995_v29, 0  ;;  %v3377_v29 = vld [vmem:[%s4605_s30 + $0x88] sm:$0xff] }
0x11d7   : > { %3685 = vmatpush3.bf16.msra.mxu1 %v2000_v31  ;;  %v2321_v31 = vpack.c.bf16 %v3377_v29, %v3376_v28 }
0x11d8   : > { %3696 = vmatprep.subr.bf16.mxu1 %v4207_v5 }
0x11d9   : > { %v2102_v32 = vpop.xlane.xlu1 %2101 }
0x11da   : > { %3939 = vrcp.f32 %v2102_v32  ;;  %v3378_v32 = vld [vmem:[%s4605_s30 + $0x90] sm:$0xff] }
0x11dc   : > { %v3938_v33 = vpop.eup %3937 }
0x11dd   : > { %v1992_v34 = vmul.f32 %v3938_v33, %v3934_v23  ;;  %v2107_v35 = vpop.permute.xlu1 %2106  ;;  %v3371_v23 = vld [vmem:[%s4590_s22 + $0x50] sm:$0xff]  ;;  %v3379_v33 = vld [vmem:[%s4605_s30 + $0x98] sm:$0xff] }
0x11de   : > { %v2112_v37 = vsel %vm882_vm7, %v2107_v35, 0 }
0x11df   : > { %v1993_v36 = vpack.c.bf16 %v1992_v34, %v1992_v34  ;;  %v2322_v34 = vpack.c.bf16 %v3379_v33, %v3378_v32 }
0x11e1   : > { %3687 = vmatmul.mubr.msk.bf16.vlgmr.msra.gmra.mrb[36].mxu1 %vm864_vm6, %v1993_v36 }
0x11e2   : > { %3697 = vmatpush3.bf16.msra.mxu1 %v2112_v37  ;;  %3698 = vmatprep.mubr.msk.bf16.mxu1 %vm4208_vm1, %v4207_v5 }
0x11e3   : > { %3710 = vmatprep.subr.bf16.mxu1 %v4207_v5 }
0x11e4   : > { %v3940_v38 = vpop.eup %3939 }
0x11e5   : > { %v2104_v39 = vmul.f32 %v3940_v38, %v3936_v25  ;;  %v2258_v25 = vpack.c.bf16 %v3372_v24, %v3371_v23 }
0x11e7   : > { %v2105_v40 = vpack.c.bf16 %v2104_v39, %v2104_v39  ;;  %v3367_v39 = vld [vmem:[%s4585_s6 + $0x2] ss:$0 sm:$0xff] }
0x11e9   : > { %3699 = vmatmul.mubr.msk.bf16.vlgmr.msra.gmra.mrb[40].mxu1 %vm864_vm6, %v2105_v40 }
0x11ea   : > { %3714 = vmatprep.mubr.msk.bf16.mxu1 %vm4208_vm1, %v4207_v5  ;;  %3711 = vmatpush3.bf16.msra.mxu1 %v2257_v21 }
0x11eb   : > { %3712 = vmatprep.subr.bf16.mxu1 %v4207_v5 }
0x11ee   : > { %3713 = vmatpush3.bf16.msra.mxu1 %v2258_v25 }
0x11ef   : > { %3730 = vmatprep.subr.bf16.mxu1 %v4207_v5 }
0x12b4   : > { %v2036_v48 = vpop.f32.mrb[36].mxu1 }
0x12b5   : > { %v3688_v49 = vpop.f32.mrb[37].mxu1 }
0x12b6   : > { %v2039_v50 = vpop.f32.mrb[38].mxu1  ;;  %v3380_v49 = vld [vmem:[%s4605_s30 + $0xa0] sm:$0xff] }
0x12b7   : > { %v3689_v51 = vpop.f32.mrb[39].mxu1  ;;  %v3381_v50 = vld [vmem:[%s4605_s30 + $0xa8] sm:$0xff] }
0x12b8   : > { %v3382_v51 = vld [vmem:[%s4605_s30 + $0xb0] sm:$0xff] }
0x12bc   : > { %v2148_v52 = vpop.f32.mrb[40].mxu1 }
0x12bd   : > { %2155 = vrot.lane.b32.xlu1 %v2148_v52, %s4215_s28  ;;  %v3700_v53 = vpop.f32.mrb[41].mxu1  ;;  %v3383_v52 = vld [vmem:[%s4605_s30 + $0xb8] sm:$0xff] }
0x12be   : > { %v2151_v54 = vpop.f32.mrb[42].mxu1  ;;  %v2324_v53 = vpack.c.bf16 %v3383_v52, %v3382_v51 }
0x12bf   : > { %v3701_v55 = vpop.f32.mrb[43].mxu1  ;;  %v3374_v54 = vld [vmem:[%s4595_s20 + $0x2] ss:$0 sm:$0xff] }
0x132f   : > { %v2156_v56 = vpop.permute.xlu1 %2155 }
0x1330   : > { %v2158_v58 = vsel %vm815_vm3, %v2036_v48, %v2156_v56 }
0x1331   : > { %v2159_v59 = vpack.c.bf16 %v2158_v58, %v2158_v58 }
0x1333   : > { %3707 = vmatmul.mubr.msk.bf16.vlgmr.msra.gmra.mrb[44].mxu0 %vm767_vm2, %v2159_v59 }
0x1334   : > { %3726 = vmatprep.mubr.msk.bf16.mxu0 %vm4208_vm1, %v4207_v5  ;;  %3719 = vmatpush3.bf16.msra.mxu0 %v2321_v31 }
0x1335   : > { %3720 = vmatprep.subr.bf16.mxu0 %v4207_v5 }
0x1338   : > { %3721 = vmatpush3.bf16.msra.mxu0 %v2322_v34 }
0x1339   : > { %3722 = vmatprep.subr.bf16.mxu0 %v4207_v5 }
0x1406   : > { %v2212_v61 = vpop.f32.mrb[44].mxu0 }
0x1407   : > { %v2213_v62 = vadd.f32 %v3363_v60, %v2212_v61  ;;  %v3708_v9 = vpop.f32.mrb[45].mxu0 }
0x1408   : > { %v2215_v63 = vpop.f32.mrb[46].mxu0 }
0x1409   : > { %v3709_v1 = vpop.f32.mrb[47].mxu0  ;;  %v2218_v3 = vadd.f32 %v4748_v4, %v2213_v62  ;;  %v3393_v4 = vld [vmem:[%s4570_s15 + $0x70] sm:$0xff] }
0x140a   : > { %v2417_v18 = vpack.c.bf16 %v3394_v17, %v3393_v4 }
0x140b   : > { %v2223_v26 = vsel %vm767_vm2, %v2218_v3, 0.0 }
0x140c   : > { %2224 = vadd.xlane.f32.xlu0 %v2223_v26 }
0x1422   : > { %2466 = vrot.lane.b32.xlu0 %v2416_v11, %s4210_s25 }
0x1426   : > { %2472 = vrot.lane.b32.xlu0 %v3396_v27, %s4210_s25 }
0x1499   : > { %v2225_v12 = vpop.xlane.xlu0 %2224 }
0x149a   : > { %v2226_v13 = vmul.f32 0.03125, %v2225_v12 }
0x149c   : > { %v2227_v14 = vsub.f32 %v2218_v3, %v2226_v13 }
0x149d   : > { %v2467_v47 = vpop.permute.xlu0 %2466 }
0x149e   : > { %v2228_v15 = vmul.f32 %v2227_v14, %v2227_v14 }
0x14a0   : > { %v2229_v16 = vsel %vm767_vm2, %v2228_v15, 0.0 }
0x14a1   : > { %2230 = vadd.xlane.f32.xlu1 %v2229_v16  ;;  %v2473_v6 = vpop.permute.xlu0 %2472 }
0x14b2   : > { %2468 = vrot.lane.b32.xlu1 %v2417_v18, %s4210_s25 }
0x152e   : > { %v2231_v35 = vpop.xlane.xlu1 %2230 }
0x152f   : > { %v2232_v36 = vmul.f32 0.03125, %v2231_v35 }
0x1531   : > { %v2233_v37 = vadd.f32 1e-05, %v2232_v36 }
0x1532   : > { %v2469_v48 = vpop.permute.xlu1 %2468 }
0x1533   : > { %3941 = vrsqrt.f32 %v2233_v37 }
0x153d   : > { %v3942_v38 = vpop.eup %3941 }
0x153e   : > { %v2235_v40 = vmul.f32 %v3942_v38, %v2227_v14 }
0x1540   : > { %v2242_v42 = vmul.f32 %v3367_v39, %v2235_v40 }
0x1542   : > { %v2249_v44 = vadd.f32 %v3368_v41, %v2242_v42 }
0x1544   : > { %v4932_v45 = vmul.f32 %v4731_v0, %v2249_v44 }
0x1546   : > { %v2251_v46 = vpack.c.bf16 %v4932_v45, %v4932_v45 }
0x1548   : > { %3715 = vmatmul.mubr.msk.bf16.vlgmr.msra.gmra.mrb[44].mxu1 %vm767_vm2, %v2251_v46 }
0x1549   : > { %3731 = vmatpush3.bf16.msra.mxu1 %v2416_v11  ;;  %3734 = vmatprep.mubr.msk.bf16.mxu1 %vm4208_vm1, %v4207_v5 }
0x154a   : > { %3732 = vmatprep.subr.bf16.mxu1 %v4207_v5 }
0x154d   : > { %3733 = vmatpush3.bf16.msra.mxu1 %v2417_v18 }
0x154e   : > { %3738 = vmatprep.subr.bf16.mxu1 %v4207_v5 }
0x1550   : > { %3735 = vmatmul.mubr.msk.bf16.vlgmr.msra.gmra.mrb[48].mxu1 %vm767_vm2, %v4753_v7  ;;  %v2323_v7 = vpack.c.bf16 %v3381_v50, %v3380_v49 }
0x1551   : > { %3739 = vmatpush3.bf16.msra.mxu1 %v2467_v47  ;;  %3742 = vmatprep.mubr.msk.bf16.mxu1 %vm4208_vm1, %v4207_v5 }
0x1552   : > { %3740 = vmatprep.subr.bf16.mxu1 %v4207_v5  ;;  %3723 = vmatpush3.bf16.msra.mxu0 %v2323_v7 }
0x1553   : > { %3724 = vmatprep.subr.bf16.mxu0 %v4207_v5 }
0x1555   : > { %3741 = vmatpush3.bf16.msra.mxu1 %v2469_v48 }
0x1556   : > { %3752 = vmatprep.subr.bf16.mxu1 %v4207_v5  ;;  %3725 = vmatpush3.bf16.msra.mxu0 %v2324_v53 }
0x1557   : > { %3746 = vmatprep.subr.bf16.mxu0 %v4207_v5 }
0x1558   : > { %3743 = vmatmul.mubr.msk.bf16.vlgmr.msra.gmra.mrb[52].mxu1 %vm767_vm2, %v4634_v10 }
0x1559   : > { %3754 = vmatprep.mubr.msk.bf16.mxu1 %vm4208_vm1, %v4207_v5 }
0x161b   : > { %v2304_v55 = vpop.f32.mrb[44].mxu1 }
0x161c   : > { %v2305_v56 = vadd.f32 %v3374_v54, %v2304_v55  ;;  %v3716_v58 = vpop.f32.mrb[45].mxu1 }
0x161d   : > { %v2307_v10 = vpop.f32.mrb[46].mxu1 }
0x161e   : > { %v2310_v59 = vmax.f32 %v2305_v56, 0.0  ;;  %v3717_v60 = vpop.f32.mrb[47].mxu1 }
0x1620   : > { %v2311_v61 = vpack.c.bf16 %v2310_v59, %v2310_v59 }
0x1622   : > { %3727 = vmatmul.mubr.msk.bf16.vlgmr.msra.gmra.mrb[48].mxu0 %vm1210_vm8, %v2311_v61 }
0x1623   : > { %v2458_v62 = vpop.f32.mrb[48].mxu1  ;;  %3748 = vmatprep.mubr.msk.bf16.mxu0 %vm4208_vm1, %v4207_v5 }
0x1624   : > { %v2459_v9 = vadd.f32 %v3396_v27, %v2458_v62  ;;  %v3736_v63 = vpop.f32.mrb[49].mxu1  ;;  %v3403_v62 = vld [vmem:[%s4580_s19 + $0x60] sm:$0xff] }
0x1625   : > { %v2461_v1 = vpop.f32.mrb[50].mxu1 }
0x1626   : > { %v2515_v3 = vpack.c.bf16 %v2459_v9, %v2459_v9  ;;  %v3737_v26 = vpop.f32.mrb[51].mxu1  ;;  %v3404_v9 = vld [vmem:[%s4580_s19 + $0x68] sm:$0xff] }
0x1627   : > { %v2750_v63 = vpack.c.bf16 %v3404_v9, %v3403_v62  ;;  %v3412_v9 = vld [vmem:[%s4585_s6 + $0x3] ss:$0 sm:$0xff] }
0x1628   : > { %2627 = vrot.lane.b32.xlu0 %v2515_v3, %s4209_s24 }
0x162b   : > { %v2509_v8 = vpop.f32.mrb[52].mxu1 }
0x162c   : > { %v2510_v11 = vadd.f32 %v2509_v8, %v2473_v6  ;;  %v3744_v12 = vpop.f32.mrb[53].mxu1  ;;  %v3405_v8 = vld [vmem:[%s4580_s19 + $0x70] sm:$0xff] }
0x162d   : > { %v2512_v13 = vpop.f32.mrb[54].mxu1 }
0x162e   : > { %v2516_v14 = vpack.c.bf16 %v2510_v11, %v2510_v11  ;;  %v3745_v15 = vpop.f32.mrb[55].mxu1  ;;  %v3406_v11 = vld [vmem:[%s4580_s19 + $0x78] sm:$0xff] }
0x162f   : > { %v2751_v12 = vpack.c.bf16 %v3406_v11, %v3405_v8  ;;  %v3421_v11 = vld [vmem:[%s4605_s30 + $0xc0] sm:$0xff] }
0x1630   : > { %2629 = vrot.lane.b32.xlu1 %v2516_v14, %s4209_s24  ;;  %v2521_v16 = vsel %vm815_vm3, %v2516_v14, 0 }
0x1631   : > { %3747 = vmatpush3.bf16.xpose.msra.mxu0 %v2521_v16 }
0x1632   : > { %3758 = vmatprep.subr.bf16.mxu0 %v4207_v5 }
0x1638   : > { %3749 = vmatmul.mubr.msk.bf16.vlgmr.msra.gmra.mrb[52].mxu0 %vm815_vm3, %v2515_v3 }
0x1639   : > { %3760 = vmatprep.mubr.msk.bf16.mxu0 %vm4208_vm1, %v4207_v5 }
0x169a   : > { %v2628_v18 = vpop.permute.xlu0 %2627 }
0x16a2   : > { %v2630_v4 = vpop.permute.xlu1 %2629 }
0x16a3   : > { %v2635_v17 = vsel %vm815_vm3, %v2630_v4, 0 }
0x16a4   : > { %3759 = vmatpush3.bf16.xpose.msra.mxu0 %v2635_v17 }
0x16a5   : > { %3770 = vmatprep.subr.bf16.mxu0 %v4207_v5 }
0x16ab   : > { %3761 = vmatmul.mubr.msk.bf16.vlgmr.msra.gmra.mrb[56].mxu0 %vm815_vm3, %v2628_v18 }
0x16ac   : > { %3774 = vmatprep.mubr.msk.bf16.mxu0 %vm4208_vm1, %v4207_v5  ;;  %3771 = vmatpush3.bf16.msra.mxu0 %v2750_v63 }
0x16ad   : > { %3772 = vmatprep.subr.bf16.mxu0 %v4207_v5 }
0x16b0   : > { %3773 = vmatpush3.bf16.msra.mxu0 %v2751_v12  ;;  %v3422_v12 = vld [vmem:[%s4605_s30 + $0xc8] sm:$0xff] }
0x16b1   : > { %3786 = vmatprep.subr.bf16.mxu0 %v4207_v5 }
0x16f5   : > { %v4973_v19 = vpop.f32.mrb[48].mxu0 }
0x16f6   : > { %v3728_v20 = vpop.f32.mrb[49].mxu0 }
0x16f7   : > { %v2373_v21 = vpop.f32.mrb[50].mxu0  ;;  %v3298_v20 = vld [vmem:[%s4600_s29] ss:$0 sm:$0xff] }
0x16f8   : > { %v3729_v23 = vpop.f32.mrb[51].mxu0  ;;  %v3408_v21 = vld [vmem:[%s4548_s23 + $0x3] ss:$0 sm:$0xff]  ;;  %s5214_s23 = sld [smem:[#allocation26_spill]] }
0x16fe   : > { %p3829_p8 = scmp.eq.s32.totalorder %s5214_s23, 3 }
0x170b   : > { %v2557_v24 = vpop.f32.mrb[52].mxu0 }
0x170c   : > { %v2563_v25 = vmul.f32 0.25, %v2557_v24  ;;  %v3750_v27 = vpop.f32.mrb[53].mxu0  ;;  %v1249_v24 = vadd.f32 %v3298_v20, %v4783_v43  ;;  %v3427_v20 = vld [vmem:[%s4605_s30 + $0xf0] sm:$0xff] }
0x170d   : > { %v2560_v28 = vpop.f32.mrb[54].mxu0 }
0x170e   : > { %v3751_v29 = vpop.f32.mrb[55].mxu0  ;;  %v2564_v31 = vadd.f32 %v2563_v25, %v4666_v30  ;;  %v3341_v28 = vld [vmem:[%s4600_s29 + $0x1] ss:$0 sm:$0xff] }
0x1710   : > { %v2565_v32 = vsel %vm864_vm6, %v2564_v31, -inf }
0x1711   : > { %2566 = vmax.xlane.f32.xlu1 %v2565_v32  ;;  %v3961_v32 = vld [vmem:[%s4626_s3 + $0x10] sm:$0xff] }
0x177e   : > { %v2671_v33 = vpop.f32.mrb[56].mxu0 }
0x177f   : > { %v2677_v34 = vmul.f32 0.25, %v2671_v33  ;;  %v3762_v35 = vpop.f32.mrb[57].mxu0 }
0x1780   : > { %v2674_v36 = vpop.f32.mrb[58].mxu0 }
0x1781   : > { %v3763_v37 = vpop.f32.mrb[59].mxu0  ;;  %v2678_v38 = vadd.f32 %v2677_v34, %v4666_v30  ;;  %v1836_v34 = vadd.f32 %v3341_v28, %v4874_v57  ;;  %v1254_v36 = vadd.f32 %v1249_v24, %v4734_v2  ;;  %v3419_v24 = vld [vmem:[%s4595_s20 + $0x3] ss:$0 sm:$0xff] }
0x1783   : > { %v2679_v39 = vsel %vm864_vm6, %v2678_v38, -inf  ;;  %v1257_v37 = vsel %vm767_vm2, %v1254_v36, 0.0 }
0x1784   : > { %2680 = vmax.xlane.f32.xlu0 %v2679_v39  ;;  %v3385_v39 = vld [vmem:[%s4600_s29 + $0x2] ss:$0 sm:$0xff] }
0x1785   : > { %v2371_v57 = vadd.f32 %v3385_v39, %v4973_v19 }
0x179e   : > { %v2567_v40 = vpop.xlane.xlu1 %2566 }
0x179f   : > { %v2568_v41 = vsub.f32 %v2564_v31, %v2567_v40 }
0x17a1   : > { %v2569_v42 = vmul.f32 1.442695, %v2568_v41 }
0x17a3   : > { %3943 = vpow2.f32 %v2569_v42 }
0x17ad   : > { %v3944_v44 = vpop.eup %3943 }
0x17ae   : > { %v2571_v46 = vsel %vm864_vm6, %v3944_v44, 0.0 }
0x17af   : > { %2572 = vadd.xlane.f32.xlu0 %v2571_v46 }
0x17c5   : > { %2578 = vrot.lane.b32.xlu0 %v2516_v14, %s4210_s25 }
0x1811   : > { %v2681_v47 = vpop.xlane.xlu0 %2680 }
0x1812   : > { %v2682_v48 = vsub.f32 %v2678_v38, %v2681_v47  ;;  %v5014_v38 = vadd.f32 %v1836_v34, %v4835_v22 }
0x1814   : > { %v2683_v49 = vmul.f32 1.442695, %v2682_v48  ;;  %v1846_v43 = vsel %vm767_vm2, %v5014_v38, 0.0  ;;  %v2376_v48 = vadd.f32 %v2371_v57, %v4932_v45 }
0x1816   : > { %3945 = vpow2.f32 %v2683_v49  ;;  %v2381_v49 = vsel %vm767_vm2, %v2376_v48, 0.0 }
0x1820   : > { %v3946_v50 = vpop.eup %3945 }
0x1821   : > { %v2685_v30 = vsel %vm864_vm6, %v3946_v50, 0.0 }
0x1822   : > { %2686 = vadd.xlane.f32.xlu1 %v2685_v30  ;;  %v3414_v30 = vld [vmem:[%s4590_s22 + $0x60] sm:$0xff] }
0x1833   : > { %2691 = vrot.lane.b32.xlu1 %v2516_v14, %s4211_s27 }
0x183c   : > { %v2573_v7 = vpop.xlane.xlu0 %2572 }
0x183d   : > { %3947 = vrcp.f32 %v2573_v7  ;;  %v3415_v7 = vld [vmem:[%s4590_s22 + $0x68] sm:$0xff] }
0x1840   : > { %v2579_v51 = vpop.permute.xlu0 %2578 }
0x1841   : > { %v2584_v52 = vsel %vm882_vm7, %v2579_v51, 0  ;;  %v2842_v51 = vpack.c.bf16 %v3415_v7, %v3414_v30 }
0x1842   : > { %3753 = vmatpush3.bf16.msra.mxu1 %v2584_v52  ;;  %v3416_v52 = vld [vmem:[%s4590_s22 + $0x70] sm:$0xff] }
0x1843   : > { %3764 = vmatprep.subr.bf16.mxu1 %v4207_v5 }
0x1847   : > { %v3948_v53 = vpop.eup %3947 }
0x1848   : > { %v2575_v54 = vmul.f32 %v3948_v53, %v3944_v44  ;;  %v3417_v53 = vld [vmem:[%s4590_s22 + $0x78] sm:$0xff] }
0x1849   : > { %v2843_v45 = vpack.c.bf16 %v3417_v53, %v3416_v52 }
0x184a   : > { %v2576_v55 = vpack.c.bf16 %v2575_v54, %v2575_v54 }
0x184c   : > { %3755 = vmatmul.mubr.msk.bf16.vlgmr.msra.gmra.mrb[56].mxu1 %vm864_vm6, %v2576_v55 }
0x184d   : > { %3766 = vmatprep.mubr.msk.bf16.mxu1 %vm4208_vm1, %v4207_v5 }
0x18af   : > { %v2687_v56 = vpop.xlane.xlu1 %2686 }
0x18b0   : > { %3949 = vrcp.f32 %v2687_v56 }
0x18b3   : > { %v2692_v58 = vpop.permute.xlu1 %2691 }
0x18b4   : > { %v2697_v10 = vsel %vm882_vm7, %v2692_v58, 0 }
0x18b5   : > { %3765 = vmatpush3.bf16.msra.mxu1 %v2697_v10 }
0x18b6   : > { %3778 = vmatprep.subr.bf16.mxu1 %v4207_v5 }
0x18ba   : > { %v3950_v59 = vpop.eup %3949 }
0x18bb   : > { %v2689_v60 = vmul.f32 %v3950_v59, %v3946_v50 }
0x18bd   : > { %v2690_v61 = vpack.c.bf16 %v2689_v60, %v2689_v60 }
0x18bf   : > { %3767 = vmatmul.mubr.msk.bf16.vlgmr.msra.gmra.mrb[60].mxu1 %vm864_vm6, %v2690_v61 }
0x18c0   : > { %3782 = vmatprep.mubr.msk.bf16.mxu1 %vm4208_vm1, %v4207_v5  ;;  %3779 = vmatpush3.bf16.msra.mxu1 %v2842_v51 }
0x18c1   : > { %3780 = vmatprep.subr.bf16.mxu1 %v4207_v5 }
0x18c4   : > { %3781 = vmatpush3.bf16.msra.mxu1 %v2843_v45 }
0x191f   : > { %v2620_v1 = vpop.f32.mrb[56].mxu1 }
0x1920   : > { %v3756_v3 = vpop.f32.mrb[57].mxu1 }
0x1921   : > { %v2623_v26 = vpop.f32.mrb[58].mxu1 }
0x1922   : > { %v3757_v6 = vpop.f32.mrb[59].mxu1 }
0x1992   : > { %v2733_v13 = vpop.f32.mrb[60].mxu1 }
0x1993   : > { %2740 = vrot.lane.b32.xlu1 %v2733_v13, %s4215_s28  ;;  %v3768_v14 = vpop.f32.mrb[61].mxu1  ;;  %v3423_v13 = vld [vmem:[%s4605_s30 + $0xd0] sm:$0xff] }
0x1994   : > { %v2736_v15 = vpop.f32.mrb[62].mxu1  ;;  %v2906_v14 = vpack.c.bf16 %v3422_v12, %v3421_v11 }
0x1995   : > { %v3769_v16 = vpop.f32.mrb[63].mxu1  ;;  %v3424_v15 = vld [vmem:[%s4605_s30 + $0xd8] sm:$0xff] }
0x1996   : > { %v2907_v16 = vpack.c.bf16 %v3424_v15, %v3423_v13 }
0x1a05   : > { %v2741_v4 = vpop.permute.xlu1 %2740 }
0x1a06   : > { %v2743_v17 = vsel %vm815_vm3, %v2620_v1, %v2741_v4  ;;  %v3413_v1 = vld [vmem:[%s4554_s12 + $0x3] ss:$0 sm:$0xff]  ;;  %v3425_v4 = vld [vmem:[%s4605_s30 + $0xe0] sm:$0xff]  ;;  %s4216_s12 = smov [#allocation12]  }
0x1a07   : > { %v2744_v18 = vpack.c.bf16 %v2743_v17, %v2743_v17  ;;  %v3426_v17 = vld [vmem:[%s4605_s30 + $0xe8] sm:$0xff]  ;;  %s3003_s5 = sshll.u32 %s4216_s12, 4  ;;  %s3004_s5 = int_to_ptr.vmem [resolvable:$true] %s3003_s5 }
0x1a08   : > { %s4090_s15 = scalar_lea.vmem %s3004_s5, 512  ;;  %p4097_p12 = scmp.lt.s32.totalorder %s3004_s5, %s3004_s5 }
0x1a09   : > { %3775 = vmatmul.mubr.msk.bf16.vlgmr.msra.gmra.mrb[60].mxu0 %vm767_vm2, %v2744_v18  ;;  %v2908_v18 = vpack.c.bf16 %v3426_v17, %v3425_v4  ;;  %p4091_p11 = scmp.ne.s32.totalorder %s3004_s5, %s4090_s15  ;;  %p4098_p3 = scmp.lt.s32.totalorder %s4090_s15, %s4090_s15 }
0x1a0a   : > { %3794 = vmatprep.mubr.msk.bf16.mxu0 %vm4208_vm1, %v4207_v5  ;;  %3787 = vmatpush3.bf16.msra.mxu0 %v2906_v14 }
0x1a0b   : > { %3788 = vmatprep.subr.bf16.mxu0 %v4207_v5  ;;  %p4092_p1 = pnand %p4091_p11, %p3829_p8  ;;  %p4099_p2 = por %p4098_p3, %p4097_p12 }
0x1a0d   : > { %p4093_p10 = pneg %p4092_p1 }
0x1a0e   : > { %3789 = vmatpush3.bf16.msra.mxu0 %v2907_v16  ;;  %v3389_v16 = vld [vmem:[%s4610_s14 + $0x2] ss:$0 sm:$0xff] }
0x1a0f   : > { %3790 = vmatprep.subr.bf16.mxu0 %v4207_v5  ;;  %p4100_p0 = pnand %p4099_p2, %p4093_p10 }
0x1a12   : > { %3791 = vmatpush3.bf16.msra.mxu0 %v2908_v18  ;;  %v3390_v18 = vld [vmem:[%s4556_s9 + $0x2] ss:$0 sm:$0xff] }
0x1a13   : > { %3792 = vmatprep.subr.bf16.mxu0 %v4207_v5 }
0x1adc   : > { %v2797_v23 = vpop.f32.mrb[60].mxu0 }
0x1add   : > { %v2798_v25 = vadd.f32 %v3408_v21, %v2797_v23  ;;  %v3776_v27 = vpop.f32.mrb[61].mxu0  ;;  %v3428_v21 = vld [vmem:[%s4605_s30 + $0xf8] sm:$0xff] }
0x1ade   : > { %v2800_v29 = vpop.f32.mrb[62].mxu0  ;;  %v2909_v23 = vpack.c.bf16 %v3428_v21, %v3427_v20  ;;  %v3434_v20 = vld [vmem:[%s4610_s14 + $0x3] ss:$0 sm:$0xff] }
0x1adf   : > { %v3777_v31 = vpop.f32.mrb[63].mxu0  ;;  %v2803_v33 = vadd.f32 %v3961_v32, %v2798_v25 }
0x1ae0   : > { %3793 = vmatpush3.bf16.msra.mxu0 %v2909_v23  ;;  %v3435_v23 = vld [vmem:[%s4556_s9 + $0x3] ss:$0 sm:$0xff] }
0x1ae1   : > { %v2808_v35 = vsel %vm767_vm2, %v2803_v33, 0.0 }
0x1ae2   : > { %2809 = vadd.xlane.f32.xlu0 %v2808_v35 }
0x1ae6   : > { %1258 = vadd.xlane.f32.xlu0 %v1257_v37 }
0x1aea   : > { %1847 = vadd.xlane.f32.xlu0 %v1846_v43 }
0x1b6f   : > { %v2810_v40 = vpop.xlane.xlu0 %2809 }
0x1b70   : > { %v2811_v41 = vmul.f32 0.03125, %v2810_v40 }
0x1b72   : > { %v2812_v42 = vsub.f32 %v2803_v33, %v2811_v41 }
0x1b73   : > { %v1259_v2 = vpop.xlane.xlu0 %1258 }
0x1b74   : > { %v1260_v44 = vmul.f32 0.03125, %v1259_v2  ;;  %v2813_v46 = vmul.f32 %v2812_v42, %v2812_v42 }
0x1b76   : > { %v5020_v22 = vsub.f32 %v1254_v36, %v1260_v44  ;;  %v2814_v47 = vsel %vm767_vm2, %v2813_v46, 0.0  ;;  %v3430_v36 = vld [vmem:[%s4600_s29 + $0x3] ss:$0 sm:$0xff] }
0x1b77   : > { %2815 = vadd.xlane.f32.xlu1 %v2814_v47  ;;  %v1848_v34 = vpop.xlane.xlu0 %1847 }
0x1b78   : > { %v1262_v50 = vmul.f32 %v5020_v22, %v5020_v22  ;;  %v1849_v35 = vmul.f32 0.03125, %v1848_v34 }
0x1b7a   : > { %v1263_v19 = vsel %vm767_vm2, %v1262_v50, 0.0  ;;  %v1850_v5 = vsub.f32 %v5014_v38, %v1849_v35 }
0x1b7b   : > { %2382 = vadd.xlane.f32.xlu1 %v2381_v49 }
0x1b7c   : > { %v1851_v2 = vmul.f32 %v1850_v5, %v1850_v5 }
0x1b7e   : > { %v1852_v44 = vsel %vm767_vm2, %v1851_v2, 0.0 }
0x1b7f   : > { %1264 = vadd.xlane.f32.xlu1 %v1263_v19 }
0x1c04   : > { %v2816_v54 = vpop.xlane.xlu1 %2815 }
0x1c05   : > { %v2817_v55 = vmul.f32 0.03125, %v2816_v54  ;;  %v3300_v54 = vld [vmem:[%s4610_s14] ss:$0 sm:$0xff] }
0x1c07   : > { %v2818_v56 = vadd.f32 1e-05, %v2817_v55 }
0x1c08   : > { %v2383_v58 = vpop.xlane.xlu1 %2382 }
0x1c09   : > { %3951 = vrsqrt.f32 %v2818_v56  ;;  %v2384_v10 = vmul.f32 0.03125, %v2383_v58  ;;  %v3301_v58 = vld [vmem:[%s4556_s9] ss:$0 sm:$0xff] }
0x1c0b   : > { %v5033_v59 = vsub.f32 %v2376_v48, %v2384_v10  ;;  %v3345_v10 = vld [vmem:[%s4610_s14 + $0x1] ss:$0 sm:$0xff] }
0x1c0c   : > { %v1265_v46 = vpop.xlane.xlu1 %1264 }
0x1c0d   : > { %v2386_v60 = vmul.f32 %v5033_v59, %v5033_v59  ;;  %v1266_v47 = vmul.f32 0.03125, %v1265_v46 }
0x1c0f   : > { %v2387_v61 = vsel %vm767_vm2, %v2386_v60, 0.0  ;;  %v1267_v48 = vadd.f32 1e-05, %v1266_v47 }
0x1c10   : > { %2388 = vadd.xlane.f32.xlu1 %v2387_v61  ;;  %v3346_v61 = vld [vmem:[%s4556_s9 + $0x1] ss:$0 sm:$0xff] }
0x1c11   : > { %3953 = vrsqrt.f32 %v1267_v48 }
0x1c13   : > { %v3952_v62 = vpop.eup %3951 }
0x1c14   : > { %v2820_v63 = vmul.f32 %v3952_v62, %v2812_v42 }
0x1c16   : > { %v2827_v3 = vmul.f32 %v3412_v9, %v2820_v63 }
0x1c18   : > { %v2834_v26 = vadd.f32 %v3413_v1, %v2827_v3 }
0x1c1a   : > { %v2835_v6 = vmul.f32 %v4731_v0, %v2834_v26 }
0x1c1b   : > { %v3954_v53 = vpop.eup %3953 }
0x1c1c   : > { %v2836_v8 = vpack.c.bf16 %v2835_v6, %v2835_v6  ;;  %v1269_v45 = vmul.f32 %v3954_v53, %v5020_v22 }
0x1c1e   : > { %3783 = vmatmul.mubr.msk.bf16.vlgmr.msra.gmra.mrb[64].mxu1 %vm767_vm2, %v2836_v8  ;;  %v1276_v55 = vmul.f32 %v3300_v54, %v1269_v45 }
0x1c20   : > { %v1283_v62 = vadd.f32 %v3301_v58, %v1276_v55 }
0x1c22   : > { %v1284_v1 = vmul.f32 %v4731_v0, %v1283_v62 }
0x1c9d   : > { %v2389_v22 = vpop.xlane.xlu1 %2388 }
0x1cf1   : > { %v2889_v25 = vpop.f32.mrb[64].mxu1 }
0x1cf2   : > { %v2890_v27 = vadd.f32 %v3419_v24, %v2889_v25  ;;  %v3784_v28 = vpop.f32.mrb[65].mxu1 }
0x1cf3   : > { %v2892_v29 = vpop.f32.mrb[66].mxu1 }
0x1cf4   : > { %v2895_v31 = vmax.f32 %v2890_v27, 0.0  ;;  %v3785_v32 = vpop.f32.mrb[67].mxu1 }
0x1cf6   : > { %v2896_v33 = vpack.c.bf16 %v2895_v31, %v2895_v31 }
0x1cf8   : > { %3795 = vmatmul.mubr.msk.bf16.vlgmr.msra.gmra.mrb[64].mxu0 %vm1210_vm8, %v2896_v33 }
0x1dcb   : > { %v2955_v37 = vpop.f32.mrb[64].mxu0 }
0x1dcc   : > { %v2956_v43 = vadd.f32 %v3430_v36, %v2955_v37  ;;  %v3796_v39 = vpop.f32.mrb[65].mxu0 }
0x1dcd   : > { %v2958_v40 = vpop.f32.mrb[66].mxu0 }
0x1dce   : > { %v3797_v41 = vpop.f32.mrb[67].mxu0  ;;  %v2961_v57 = vadd.f32 %v2956_v43, %v2835_v6  ;;  %v2390_v6 = vmul.f32 0.03125, %v2389_v22 }
0x1dd0   : > { %v2966_v42 = vsel %vm767_vm2, %v2961_v57, 0.0  ;;  %v2391_v8 = vadd.f32 1e-05, %v2390_v6 }
0x1dd1   : > { %2967 = vadd.xlane.f32.xlu0 %v2966_v42 }
0x1dd5   : > { %1853 = vadd.xlane.f32.xlu0 %v1852_v44 }
0x1e5e   : > { %v2968_v49 = vpop.xlane.xlu0 %2967 }
0x1e5f   : > { %v2969_v38 = vmul.f32 0.03125, %v2968_v49 }
0x1e61   : > { %v2970_v50 = vsub.f32 %v2961_v57, %v2969_v38 }
0x1e62   : > { %v1854_v19 = vpop.xlane.xlu0 %1853 }
0x1e63   : > { %v1855_v30 = vmul.f32 0.03125, %v1854_v19  ;;  %v2971_v7 = vmul.f32 %v2970_v50, %v2970_v50 }
0x1e65   : > { %v1856_v51 = vadd.f32 1e-05, %v1855_v30  ;;  %v2972_v52 = vsel %vm767_vm2, %v2971_v7, 0.0 }
0x1e66   : > { %2973 = vadd.xlane.f32.xlu0 %v2972_v52 }
0x1e67   : > { %3955 = vrsqrt.f32 %v1856_v51 }
0x1e68   : > { %3957 = vrsqrt.f32 %v2391_v8 }
0x1e71   : > { %v3956_v56 = vpop.eup %3955 }
0x1e72   : > { %v1858_v60 = vmul.f32 %v3956_v56, %v1850_v5  ;;  %v3958_v14 = vpop.eup %3957 }
0x1e73   : > { %v2393_v15 = vmul.f32 %v3958_v14, %v5033_v59 }
0x1e74   : > { %v1865_v9 = vmul.f32 %v3345_v10, %v1858_v60 }
0x1e75   : > { %v2400_v4 = vmul.f32 %v3389_v16, %v2393_v15 }
0x1e76   : > { %v1872_v63 = vadd.f32 %v3346_v61, %v1865_v9 }
0x1e77   : > { %v2407_v24 = vadd.f32 %v3390_v18, %v2400_v4 }
0x1e78   : > { %v1873_v3 = vmul.f32 %v4731_v0, %v1872_v63 }
0x1e79   : > { %v2408_v28 = vmul.f32 %v4731_v0, %v2407_v24 }
0x1e7a   : > { %v1874_v26 = vadd.f32 %v1873_v3, %v1284_v1 }
0x1e7c   : > { %2995 = vst.msk [vmem:[%s4626_s3] sm:$0xff] %vm767_vm2, %v1874_v26 }
0x1ef3   : > { %v2974_v11 = vpop.xlane.xlu0 %2973 }
0x1ef4   : > { %v2975_v12 = vmul.f32 0.03125, %v2974_v11 }
0x1ef6   : > { %v2976_v13 = vadd.f32 1e-05, %v2975_v12 }
0x1ef8   : > { %3959 = vrsqrt.f32 %v2976_v13 }
0x1f02   : > { %v3960_v17 = vpop.eup %3959 }
0x1f03   : > { %v2978_v21 = vmul.f32 %v3960_v17, %v2970_v50 }
0x1f05   : > { %v2985_v25 = vmul.f32 %v3434_v20, %v2978_v21 }
0x1f07   : > { %v2992_v27 = vadd.f32 %v3435_v23, %v2985_v25 }
0x1f09   : > { %v2993_v29 = vmul.f32 %v4731_v0, %v2992_v27 }
0x1f0b   : > { %v2994_v59 = vadd.f32 %v2993_v29, %v2408_v28 }
0x1f0d   : > { %3436 = vst.msk [vmem:[%s4626_s3 + $0x10] sm:$0xff] %vm767_vm2, %v2994_v59 }
0x1f0e   : > { %4103 = shalt.err (!%p4100_p0)
}
0x1f0f   : > { %s5215_s19 = sld [smem:[#allocation40_spill]] }
0x1f15   : > { %s4104_s6 = scalar_lea.hbm %s5215_s19, 512 }
0x1f16   : > { %p4105_p13 = scmp.ne.s32.totalorder %s5215_s19, %s4104_s6  ;;  %p4110_p4 = scmp.lt.u32.totalorder %s4104_s6, %s5215_s19 }
0x1f18   : > { %p4106_p7 = pnand %p4105_p13, %p3829_p8 }
0x1f1a   : > { %p4107_p9 = pneg %p4106_p7 }
0x1f1c   : > { %p4112_p6 = pnand %p4110_p4, %p4107_p9 }
0x1f1e   : > { %4115 = shalt.err (!%p4112_p6)
}
0x1f1f   : > { %s4217_s18 = smov 128   ;;  %s4218_s11 = smov 8  }
0x1f20   : > { %3809 = dma.vmem_to_hbm [thread:$0]  (%p3829_p8), %s3004_s5, 512, %s5215_s19, [#allocation6], %s4217_s18, %s4217_s18, %s4218_s11  }
0x1f21   : > { %4163 = dma.done.wait (%p3829_p8), [#allocation6], 512  }
0x1f22   : > { %4165 = vsyncadd (%p3829_p8), [#allocation6], 4294966784 }
0x1f23 PF: > { %s5216_s16 = sld [smem:[#allocation22_spill]]  ;;  %s5217_s23 = sld [smem:[#allocation18_spill]] }
0x1f24   : > { %s5218_s24 = sld [smem:[#allocation19_spill]]  ;;  %s5219_s25 = sld [smem:[#allocation25_spill]] }
0x1f25   : > { %s5220_s26 = sld [smem:[#allocation20_spill]]  ;;  %s5221_s27 = sld [smem:[#allocation21_spill]] }
0x1f26   : > { %s5222_s0 = sld [smem:[#allocation23_spill]]  ;;  %s5223_s28 = sld [smem:[#allocation24_spill]] }
0x1f29   : > { %s36_s29 = sadd.s32 1, %s5216_s16  }
0x1f2a   : > { %p33_p5 = scmp.ge.s32.totalorder %s36_s29, 6  }
0x1f2c   :  { %35 = sbr.rel (!%p33_p5) target bundleno = 30 (0x1e), region = 211 }
0x1f33   :  { %3019 = vsyncpa [#allocation5], 1 }
0x1f34   :  { %3021 = vsyncpa [#allocation5 + $0x1], 1 }
0x1f35   :  { %3022 = vsyncpa [#allocation8], 1 }
0x1f36   :  { %3024 = vsyncpa [#allocation8 + $0x1], 1 }
0x1f37   :  { %3025 = vsyncpa [#allocation11], 1 }
0x1f38   :  { %3027 = vsyncpa [#allocation11 + $0x1], 1 }
0x1f39   :  { %3028 = vsyncpa [#allocation6], 1 }
0x1f3a   :  { %3030 = vsyncpa [#allocation6 + $0x1], 1 }

</bundles_post_ra>
